<compile_context>
chip_gen: v7x
topology: tpu7x:2x2x1
jax: 0.10.0
libtpu: 0.0.40
codegen_flags: <defaults>
</compile_context>

<pallas_src>
import math

import jax
import jax.numpy as jnp
from jax.experimental import pallas as pl
from jax.experimental.pallas import tpu as pltpu

# ---------------- model config (small synthetic sizes) ----------------
B = 2            # batch
S_TGT = 8        # decoder (target) sequence length
S_SRC = 8        # encoder (source) sequence length
D_MODEL = 32
N_HEADS = 4
D_K = D_MODEL // N_HEADS
D_FF = 64
N_LAYERS = 2
EPS = 1e-6
SCALE = 1.0 / math.sqrt(D_K)
NEG_INF = -1e9
# NOTE: dropout is identity at inference time, so it is omitted here.


# ---------------- in-kernel helpers (traced into the kernel body) ------
def _layer_norm(x):
    # Matches the tutorial LayerNormalization: unbiased (N-1) std, eps on std,
    # alpha=1, bias=0.
    d = x.shape[-1]
    mean = jnp.mean(x, axis=-1, keepdims=True)
    var = jnp.sum((x - mean) ** 2, axis=-1, keepdims=True) / (d - 1)
    std = jnp.sqrt(var)
    return (x - mean) / (std + EPS)


def _softmax_lastdim(s):
    s = s - jnp.max(s, axis=-1, keepdims=True)
    p = jnp.exp(s)
    return p * pl.reciprocal(jnp.sum(p, axis=-1, keepdims=True), approx=True)


def _split_heads(t2d, bb, s_len):
    # (bb*s_len, D_MODEL) -> (N_HEADS*bb, s_len, D_K), head-major ordering.
    heads = [
        t2d[:, h * D_K:(h + 1) * D_K].reshape(bb, s_len, D_K)
        for h in range(N_HEADS)
    ]
    return jnp.concatenate(heads, axis=0)


def _merge_heads(t3d, bb, s_len):
    # (N_HEADS*bb, s_len, D_K) -> (bb*s_len, D_MODEL)
    heads = [
        t3d[h * bb:(h + 1) * bb].reshape(bb * s_len, D_K)
        for h in range(N_HEADS)
    ]
    return jnp.concatenate(heads, axis=-1)


# ---------------- Pallas kernel ----------------------------------------
def decoder_kernel(x_ref, enc_ref, tgt_bias_ref, src_bias_ref,
                   wqkv_s_ref, wo_s_ref, wq_c_ref, wkv_c_ref, wo_c_ref,
                   fc1_w_ref, fc1_b_ref, fc2_w_ref, fc2_b_ref,
                   out_ref):
    bb = x_ref.shape[0]
    x2d = x_ref[...].reshape(bb * S_TGT, D_MODEL).astype(jnp.float32)
    enc2d = enc_ref[...].reshape(bb * S_SRC, D_MODEL).astype(jnp.float32)

    # Additive attention biases (0 / -1e9) broadcast to the head-major batch
    # axis ONCE for the whole stack (no per-layer select).
    tgt_bias = jnp.concatenate([tgt_bias_ref[...]] * N_HEADS, axis=0)  # (H*bb,St,St)
    src_bias = jnp.concatenate([src_bias_ref[...]] * N_HEADS, axis=0)  # (H*bb,St,Ss)

    # Cross-attention K/V projections for ALL layers, hoisted out of the layer
    # loop (encoder activations are loop-invariant): single matmul with a
    # lane-dense (D, N_LAYERS*2*D) = (32, 128) RHS.
    kv_all = jnp.dot(enc2d, wkv_c_ref[...], preferred_element_type=jnp.float32)

    for layer in range(N_LAYERS):
        # ---- residual 0: masked self-attention on pre-normed x ----
        n = _layer_norm(x2d)
        qkv = jnp.dot(n, wqkv_s_ref[layer],
                      preferred_element_type=jnp.float32)          # (bb*St, 3D)
        qh = _split_heads(qkv[:, :D_MODEL], bb, S_TGT)              # scale folded in
        kh = _split_heads(qkv[:, D_MODEL:2 * D_MODEL], bb, S_TGT)
        vh = _split_heads(qkv[:, 2 * D_MODEL:], bb, S_TGT)
        scores = jnp.einsum("gqd,gkd->gqk", qh, kh,
                            preferred_element_type=jnp.float32) + tgt_bias
        attn = _softmax_lastdim(scores)
        ctx = jnp.einsum("gqk,gkd->gqd", attn, vh,
                         preferred_element_type=jnp.float32)
        x2d = x2d + jnp.dot(_merge_heads(ctx, bb, S_TGT), wo_s_ref[layer],
                            preferred_element_type=jnp.float32)

        # ---- residual 1: cross-attention (q = norm(x), k/v = encoder) ----
        n = _layer_norm(x2d)
        q2d = jnp.dot(n, wq_c_ref[layer],
                      preferred_element_type=jnp.float32)           # scale folded in
        kv = kv_all[:, layer * 2 * D_MODEL:(layer + 1) * 2 * D_MODEL]
        qh = _split_heads(q2d, bb, S_TGT)
        kh = _split_heads(kv[:, :D_MODEL], bb, S_SRC)
        vh = _split_heads(kv[:, D_MODEL:], bb, S_SRC)
        scores = jnp.einsum("gqd,gkd->gqk", qh, kh,
                            preferred_element_type=jnp.float32) + src_bias
        attn = _softmax_lastdim(scores)
        ctx = jnp.einsum("gqk,gkd->gqd", attn, vh,
                         preferred_element_type=jnp.float32)
        x2d = x2d + jnp.dot(_merge_heads(ctx, bb, S_TGT), wo_c_ref[layer],
                            preferred_element_type=jnp.float32)

        # ---- residual 2: feed-forward ----
        n = _layer_norm(x2d)
        h = jnp.maximum(
            jnp.dot(n, fc1_w_ref[layer], preferred_element_type=jnp.float32)
            + fc1_b_ref[layer], 0.0)
        x2d = x2d + (jnp.dot(h, fc2_w_ref[layer],
                             preferred_element_type=jnp.float32)
                     + fc2_b_ref[layer])

    # Final LayerNormalization of the Decoder wrapper.
    x2d = _layer_norm(x2d)
    out_ref[...] = x2d.reshape(bb, S_TGT, D_MODEL).astype(out_ref.dtype)


# ---------------- wrapper -----------------------------------------------
def _two_tensorcores():
    try:
        kind = jax.devices()[0].device_kind.lower().replace(" ", "")
    except Exception:
        return False
    return ("v7" in kind) or ("tpu7" in kind)


def pack_decoder_params(layer_params):
    """One-time host-side packing.

    Pre-transpose all weights, fuse QKV (self) / KV (cross), fold 1/sqrt(dk)
    into Q, and stack every weight type across layers so the kernel takes 9
    weight tensors total (static ref[layer] indexing inside the kernel).
    """
    wqkv_s = jnp.stack([
        jnp.concatenate([p["wq_s"].T * SCALE, p["wk_s"].T, p["wv_s"].T], axis=1)
        for p in layer_params])                                       # (L, D, 3D)
    wo_s = jnp.stack([p["wo_s"].T for p in layer_params])             # (L, D, D)
    wq_c = jnp.stack([p["wq_c"].T * SCALE for p in layer_params])     # (L, D, D)
    # Cross-attention K/V weights concatenated along columns across layers so
    # the kernel projects the (loop-invariant) encoder output once: (D, L*2D).
    wkv_c = jnp.concatenate(
        [jnp.concatenate([p["wk_c"].T, p["wv_c"].T], axis=1) for p in layer_params],
        axis=1)                                                       # (D, L*2D)
    wo_c = jnp.stack([p["wo_c"].T for p in layer_params])             # (L, D, D)
    fc1_w = jnp.stack([p["fc1_w"].T for p in layer_params])           # (L, D, D_FF)
    fc1_b = jnp.stack([p["fc1_b"].reshape(1, D_FF) for p in layer_params])
    fc2_w = jnp.stack([p["fc2_w"].T for p in layer_params])           # (L, D_FF, D)
    fc2_b = jnp.stack([p["fc2_b"].reshape(1, D_MODEL) for p in layer_params])
    return [wqkv_s, wo_s, wq_c, wkv_c, wo_c, fc1_w, fc1_b, fc2_w, fc2_b]


def decoder_forward(x, enc, tgt_mask, src_mask, packed_weights, *,
                    batch_block=None):
    batch = x.shape[0]
    if batch_block is None:
        # v7x (2 TCs): keep batch as a parallel grid axis -> one element per core.
        # v5e/v6e (1 TC): collapse the grid to a single step (per-step overhead
        # ~0.35us is comparable to the whole block's compute at this size).
        batch_block = 1 if _two_tensorcores() else batch
    bb = batch_block
    assert batch % bb == 0
    grid = (batch // bb,)

    # {0,1} masks -> additive biases (tiny one-off elementwise op outside the
    # kernel); the kernel just adds them to the attention scores.
    tgt_bias = jnp.where(tgt_mask == 0, NEG_INF, 0.0).astype(jnp.float32)
    src_bias = jnp.where(src_mask == 0, NEG_INF, 0.0).astype(jnp.float32)

    data_specs = [
        pl.BlockSpec((bb, S_TGT, D_MODEL), lambda b: (b, 0, 0)),   # x
        pl.BlockSpec((bb, S_SRC, D_MODEL), lambda b: (b, 0, 0)),   # encoder output
        pl.BlockSpec((bb, S_TGT, S_TGT), lambda b: (b, 0, 0)),     # tgt additive bias
        pl.BlockSpec((bb, S_TGT, S_SRC), lambda b: (b, 0, 0)),     # src additive bias
    ]
    weight_specs = [
        pl.BlockSpec(w.shape, (lambda b, n=w.ndim: (0,) * n))
        for w in packed_weights
    ]
    return pl.pallas_call(
        decoder_kernel,
        out_shape=jax.ShapeDtypeStruct((batch, S_TGT, D_MODEL), x.dtype),
        grid_spec=pltpu.PrefetchScalarGridSpec(
            num_scalar_prefetch=0,
            grid=grid,
            in_specs=data_specs + weight_specs,
            out_specs=pl.BlockSpec((bb, S_TGT, D_MODEL), lambda b: (b, 0, 0)),
        ),
        compiler_params=pltpu.CompilerParams(
            dimension_semantics=("parallel",)),
    )(x, enc, tgt_bias, src_bias, *packed_weights)


# ---------------- plain-JAX reference (for the correctness check) ------
def _ref_layer_norm(x):
    d = x.shape[-1]
    mean = jnp.mean(x, axis=-1, keepdims=True)
    var = jnp.sum((x - mean) ** 2, axis=-1, keepdims=True) / (d - 1)
    return (x - mean) / (jnp.sqrt(var) + EPS)


def _ref_mha(q_in, k_in, v_in, mask, wq, wk, wv, wo):
    q = q_in @ wq.T
    k = k_in @ wk.T
    v = v_in @ wv.T

    def split(t):  # (S, D) -> (H, S, Dk)
        return t.reshape(t.shape[0], N_HEADS, D_K).transpose(1, 0, 2)

    qh, kh, vh = split(q), split(k), split(v)
    scores = jnp.einsum("hqd,hkd->hqk", qh, kh) / math.sqrt(D_K)
    scores = jnp.where(mask[None, :, :] == 0.0, -1e9, scores)
    attn = jax.nn.softmax(scores, axis=-1)
    out = jnp.einsum("hqk,hkd->hqd", attn, vh)
    out = out.transpose(1, 0, 2).reshape(q.shape[0], D_MODEL)
    return out @ wo.T


def decoder_ref(x, enc, tgt_mask, src_mask, layer_params):
    def one(xb, eb, tm, sm):
        h = xb
        for p in layer_params:
            n = _ref_layer_norm(h)
            h = h + _ref_mha(n, n, n, tm,
                             p["wq_s"], p["wk_s"], p["wv_s"], p["wo_s"])
            n = _ref_layer_norm(h)
            h = h + _ref_mha(n, eb, eb, sm,
                             p["wq_c"], p["wk_c"], p["wv_c"], p["wo_c"])
            n = _ref_layer_norm(h)
            ff = jnp.maximum(n @ p["fc1_w"].T + p["fc1_b"], 0.0) @ p["fc2_w"].T \
                + p["fc2_b"]
            h = h + ff
        return _ref_layer_norm(h)

    return jax.vmap(one)(x, enc, tgt_mask, src_mask)


# ---------------- main ---------------------------------------------------
if __name__ == "__main__":
    key = jax.random.PRNGKey(0)
    keys = jax.random.split(key, N_LAYERS * 12 + 2)

    def init(k, shape, scale=0.1):
        return (scale * jax.random.normal(k, shape)).astype(jnp.float32)

    names_shapes = [
        ("wq_s", (D_MODEL, D_MODEL)), ("wk_s", (D_MODEL, D_MODEL)),
        ("wv_s", (D_MODEL, D_MODEL)), ("wo_s", (D_MODEL, D_MODEL)),
        ("wq_c", (D_MODEL, D_MODEL)), ("wk_c", (D_MODEL, D_MODEL)),
        ("wv_c", (D_MODEL, D_MODEL)), ("wo_c", (D_MODEL, D_MODEL)),
        ("fc1_w", (D_FF, D_MODEL)), ("fc1_b", (D_FF,)),
        ("fc2_w", (D_MODEL, D_FF)), ("fc2_b", (D_MODEL,)),
    ]
    layer_params = []
    ki = 0
    for _ in range(N_LAYERS):
        p = {}
        for name, shape in names_shapes:
            p[name] = init(keys[ki], shape)
            ki += 1
        layer_params.append(p)

    x = init(keys[-2], (B, S_TGT, D_MODEL), scale=1.0)
    enc = init(keys[-1], (B, S_SRC, D_MODEL), scale=1.0)

    # Standard decoder masks: causal target mask, all-ones source mask.
    causal = jnp.tril(jnp.ones((S_TGT, S_TGT), jnp.float32))
    tgt_mask = jnp.broadcast_to(causal, (B, S_TGT, S_TGT))
    src_mask = jnp.ones((B, S_TGT, S_SRC), jnp.float32)

    packed = pack_decoder_params(layer_params)       # one-time host-side packing
    out = decoder_forward(x, enc, tgt_mask, src_mask, packed)
    out = jax.block_until_ready(out)

    ref = decoder_ref(x, enc, tgt_mask, src_mask, layer_params)
    assert out.shape == (B, S_TGT, D_MODEL)
    # Tolerance relaxed vs. exact-division version because the softmax uses the
    # EUP approximate reciprocal (pl.reciprocal(approx=True)); still f32 math.
    assert jnp.allclose(out, ref, atol=2e-3, rtol=2e-3), "mismatch vs reference"

    print("KERNEL_OK")
</pallas_src>

<mosaic_0001>
module attributes {stable_mosaic.version = 11 : i64} {
  func.func @decoder_kernel(%arg0: i32, %arg1: memref<2x8x32xf32, #tpu.memory_space<vmem>>, %arg2: memref<2x8x32xf32, #tpu.memory_space<vmem>>, %arg3: memref<2x8x8xf32, #tpu.memory_space<vmem>>, %arg4: memref<2x8x8xf32, #tpu.memory_space<vmem>>, %arg5: memref<2x32x96xf32, #tpu.memory_space<vmem>>, %arg6: memref<2x32x32xf32, #tpu.memory_space<vmem>>, %arg7: memref<2x32x32xf32, #tpu.memory_space<vmem>>, %arg8: memref<32x128xf32, #tpu.memory_space<vmem>>, %arg9: memref<2x32x32xf32, #tpu.memory_space<vmem>>, %arg10: memref<2x32x64xf32, #tpu.memory_space<vmem>>, %arg11: memref<2x1x64xf32, #tpu.memory_space<vmem>>, %arg12: memref<2x64x32xf32, #tpu.memory_space<vmem>>, %arg13: memref<2x1x32xf32, #tpu.memory_space<vmem>>, %arg14: memref<2x8x32xf32, #tpu.memory_space<vmem>>) attributes {dimension_semantics = [#tpu.dimension_semantics<parallel>], iteration_bounds = array<i64: 1>, scalar_prefetch = 0 : i64, scratch_operands = 0 : i64, tpu.core_type = #tpu.core_type<tc>, window_params = [{transform_indices = @transform_0, window_bounds = array<i64: 2, 8, 32>}, {transform_indices = @transform_1, window_bounds = array<i64: 2, 8, 32>}, {transform_indices = @transform_2, window_bounds = array<i64: 2, 8, 8>}, {transform_indices = @transform_3, window_bounds = array<i64: 2, 8, 8>}, {pipeline_mode = #tpu.pipeline_mode<synchronous>, transform_indices = @transform_4, window_bounds = array<i64: 2, 32, 96>}, {pipeline_mode = #tpu.pipeline_mode<synchronous>, transform_indices = @transform_5, window_bounds = array<i64: 2, 32, 32>}, {pipeline_mode = #tpu.pipeline_mode<synchronous>, transform_indices = @transform_6, window_bounds = array<i64: 2, 32, 32>}, {pipeline_mode = #tpu.pipeline_mode<synchronous>, transform_indices = @transform_7, window_bounds = array<i64: 32, 128>}, {pipeline_mode = #tpu.pipeline_mode<synchronous>, transform_indices = @transform_8, window_bounds = array<i64: 2, 32, 32>}, {pipeline_mode = #tpu.pipeline_mode<synchronous>, transform_indices = @transform_9, window_bounds = array<i64: 2, 32, 64>}, {pipeline_mode = #tpu.pipeline_mode<synchronous>, transform_indices = @transform_10, window_bounds = array<i64: 2, 1, 64>}, {pipeline_mode = #tpu.pipeline_mode<synchronous>, transform_indices = @transform_11, window_bounds = array<i64: 2, 64, 32>}, {pipeline_mode = #tpu.pipeline_mode<synchronous>, transform_indices = @transform_12, window_bounds = array<i64: 2, 1, 32>}, {transform_indices = @transform_13, window_bounds = array<i64: 2, 8, 32>}]} {
    %c0 = arith.constant 0 : index
    %c0_0 = arith.constant 0 : index
    %c0_1 = arith.constant 0 : index
    %0 = vector.load %arg1[%c0, %c0_0, %c0_1] : memref<2x8x32xf32, #tpu.memory_space<vmem>>, vector<2x8x32xf32>
    %1 = vector.shape_cast %0 : vector<2x8x32xf32> to vector<16x32xf32>
    %c0_2 = arith.constant 0 : index
    %c0_3 = arith.constant 0 : index
    %c0_4 = arith.constant 0 : index
    %2 = vector.load %arg2[%c0_2, %c0_3, %c0_4] : memref<2x8x32xf32, #tpu.memory_space<vmem>>, vector<2x8x32xf32>
    %3 = vector.shape_cast %2 : vector<2x8x32xf32> to vector<16x32xf32>
    %c0_5 = arith.constant 0 : index
    %c0_6 = arith.constant 0 : index
    %c0_7 = arith.constant 0 : index
    %4 = vector.load %arg3[%c0_5, %c0_6, %c0_7] : memref<2x8x8xf32, #tpu.memory_space<vmem>>, vector<2x8x8xf32>
    %5 = tpu.concatenate %4, %4, %4, %4 in 0 : vector<2x8x8xf32>, vector<2x8x8xf32>, vector<2x8x8xf32>, vector<2x8x8xf32> -> vector<8x8x8xf32>
    %c0_8 = arith.constant 0 : index
    %c0_9 = arith.constant 0 : index
    %c0_10 = arith.constant 0 : index
    %6 = vector.load %arg4[%c0_8, %c0_9, %c0_10] : memref<2x8x8xf32, #tpu.memory_space<vmem>>, vector<2x8x8xf32>
    %7 = tpu.concatenate %6, %6, %6, %6 in 0 : vector<2x8x8xf32>, vector<2x8x8xf32>, vector<2x8x8xf32>, vector<2x8x8xf32> -> vector<8x8x8xf32>
    %c0_11 = arith.constant 0 : index
    %c0_12 = arith.constant 0 : index
    %8 = vector.load %arg8[%c0_11, %c0_12] : memref<32x128xf32, #tpu.memory_space<vmem>>, vector<32x128xf32>
    %cst = arith.constant dense<0.000000e+00> : vector<16x128xf32>
    %9 = tpu.matmul %3, %8, %cst {dimension_numbers = #tpu.dot_dimension_numbers<[1], [0], [0], [1], [0, 0, 1, 1], [], []>} : vector<16x32xf32>, vector<32x128xf32>, vector<16x128xf32> -> vector<16x128xf32>
    %cst_13 = arith.constant dense<0.000000e+00> : vector<16xf32>
    %10 = vector.multi_reduction <add>, %1, %cst_13 [1] : vector<16x32xf32> to vector<16xf32>
    %11 = vector.shape_cast %10 : vector<16xf32> to vector<16x1xf32>
    %cst_14 = arith.constant 3.200000e+01 : f32
    %12 = vector.broadcast %cst_14 : f32 to vector<16x1xf32>
    %13 = arith.divf %11, %12 : vector<16x1xf32>
    %14 = vector.broadcast %13 : vector<16x1xf32> to vector<16x32xf32>
    %15 = arith.subf %1, %14 : vector<16x32xf32>
    %16 = arith.mulf %15, %15 : vector<16x32xf32>
    %cst_15 = arith.constant dense<0.000000e+00> : vector<16xf32>
    %17 = vector.multi_reduction <add>, %16, %cst_15 [1] : vector<16x32xf32> to vector<16xf32>
    %18 = vector.shape_cast %17 : vector<16xf32> to vector<16x1xf32>
    %cst_16 = arith.constant 3.100000e+01 : f32
    %19 = vector.broadcast %cst_16 : f32 to vector<16x1xf32>
    %20 = arith.divf %18, %19 : vector<16x1xf32>
    %21 = math.sqrt %20 : vector<16x1xf32>
    %22 = vector.broadcast %13 : vector<16x1xf32> to vector<16x32xf32>
    %23 = arith.subf %1, %22 : vector<16x32xf32>
    %cst_17 = arith.constant 9.99999997E-7 : f32
    %24 = vector.broadcast %cst_17 : f32 to vector<16x1xf32>
    %25 = arith.addf %21, %24 : vector<16x1xf32>
    %26 = vector.broadcast %25 : vector<16x1xf32> to vector<16x32xf32>
    %27 = arith.divf %23, %26 : vector<16x32xf32>
    %c0_18 = arith.constant 0 : index
    %c0_19 = arith.constant 0 : index
    %c0_20 = arith.constant 0 : index
    %28 = vector.load %arg5[%c0_18, %c0_19, %c0_20] : memref<2x32x96xf32, #tpu.memory_space<vmem>>, vector<1x32x96xf32>
    %29 = vector.shape_cast %28 : vector<1x32x96xf32> to vector<32x96xf32>
    %cst_21 = arith.constant dense<0.000000e+00> : vector<16x96xf32>
    %30 = tpu.matmul %27, %29, %cst_21 {dimension_numbers = #tpu.dot_dimension_numbers<[1], [0], [0], [1], [0, 0, 1, 1], [], []>} : vector<16x32xf32>, vector<32x96xf32>, vector<16x96xf32> -> vector<16x96xf32>
    %31 = vector.extract_strided_slice %30 {offsets = [0, 0], sizes = [16, 32], strides = [1, 1]} : vector<16x96xf32> to vector<16x32xf32>
    %32 = vector.extract_strided_slice %31 {offsets = [0, 0], sizes = [16, 8], strides = [1, 1]} : vector<16x32xf32> to vector<16x8xf32>
    %33 = vector.shape_cast %32 : vector<16x8xf32> to vector<2x8x8xf32>
    %34 = vector.extract_strided_slice %31 {offsets = [0, 8], sizes = [16, 8], strides = [1, 1]} : vector<16x32xf32> to vector<16x8xf32>
    %35 = vector.shape_cast %34 : vector<16x8xf32> to vector<2x8x8xf32>
    %36 = vector.extract_strided_slice %31 {offsets = [0, 16], sizes = [16, 8], strides = [1, 1]} : vector<16x32xf32> to vector<16x8xf32>
    %37 = vector.shape_cast %36 : vector<16x8xf32> to vector<2x8x8xf32>
    %38 = vector.extract_strided_slice %31 {offsets = [0, 24], sizes = [16, 8], strides = [1, 1]} : vector<16x32xf32> to vector<16x8xf32>
    %39 = vector.shape_cast %38 : vector<16x8xf32> to vector<2x8x8xf32>
    %40 = tpu.concatenate %33, %35, %37, %39 in 0 : vector<2x8x8xf32>, vector<2x8x8xf32>, vector<2x8x8xf32>, vector<2x8x8xf32> -> vector<8x8x8xf32>
    %41 = vector.extract_strided_slice %30 {offsets = [0, 32], sizes = [16, 32], strides = [1, 1]} : vector<16x96xf32> to vector<16x32xf32>
    %42 = vector.extract_strided_slice %41 {offsets = [0, 0], sizes = [16, 8], strides = [1, 1]} : vector<16x32xf32> to vector<16x8xf32>
    %43 = vector.shape_cast %42 : vector<16x8xf32> to vector<2x8x8xf32>
    %44 = vector.extract_strided_slice %41 {offsets = [0, 8], sizes = [16, 8], strides = [1, 1]} : vector<16x32xf32> to vector<16x8xf32>
    %45 = vector.shape_cast %44 : vector<16x8xf32> to vector<2x8x8xf32>
    %46 = vector.extract_strided_slice %41 {offsets = [0, 16], sizes = [16, 8], strides = [1, 1]} : vector<16x32xf32> to vector<16x8xf32>
    %47 = vector.shape_cast %46 : vector<16x8xf32> to vector<2x8x8xf32>
    %48 = vector.extract_strided_slice %41 {offsets = [0, 24], sizes = [16, 8], strides = [1, 1]} : vector<16x32xf32> to vector<16x8xf32>
    %49 = vector.shape_cast %48 : vector<16x8xf32> to vector<2x8x8xf32>
    %50 = tpu.concatenate %43, %45, %47, %49 in 0 : vector<2x8x8xf32>, vector<2x8x8xf32>, vector<2x8x8xf32>, vector<2x8x8xf32> -> vector<8x8x8xf32>
    %51 = vector.extract_strided_slice %30 {offsets = [0, 64], sizes = [16, 32], strides = [1, 1]} : vector<16x96xf32> to vector<16x32xf32>
    %52 = vector.extract_strided_slice %51 {offsets = [0, 0], sizes = [16, 8], strides = [1, 1]} : vector<16x32xf32> to vector<16x8xf32>
    %53 = vector.shape_cast %52 : vector<16x8xf32> to vector<2x8x8xf32>
    %54 = vector.extract_strided_slice %51 {offsets = [0, 8], sizes = [16, 8], strides = [1, 1]} : vector<16x32xf32> to vector<16x8xf32>
    %55 = vector.shape_cast %54 : vector<16x8xf32> to vector<2x8x8xf32>
    %56 = vector.extract_strided_slice %51 {offsets = [0, 16], sizes = [16, 8], strides = [1, 1]} : vector<16x32xf32> to vector<16x8xf32>
    %57 = vector.shape_cast %56 : vector<16x8xf32> to vector<2x8x8xf32>
    %58 = vector.extract_strided_slice %51 {offsets = [0, 24], sizes = [16, 8], strides = [1, 1]} : vector<16x32xf32> to vector<16x8xf32>
    %59 = vector.shape_cast %58 : vector<16x8xf32> to vector<2x8x8xf32>
    %60 = tpu.concatenate %53, %55, %57, %59 in 0 : vector<2x8x8xf32>, vector<2x8x8xf32>, vector<2x8x8xf32>, vector<2x8x8xf32> -> vector<8x8x8xf32>
    "tpu.trace_start"() <{level = 10 : i32, message = "gqd,gkd->gqk"}> : () -> ()
    %cst_22 = arith.constant dense<0.000000e+00> : vector<8x8x8xf32>
    %61 = tpu.matmul %40, %50, %cst_22 {dimension_numbers = #tpu.dot_dimension_numbers<[2], [2], [1], [1], [0, 0, 0, 1, 1, 1], [0], [0]>} : vector<8x8x8xf32>, vector<8x8x8xf32>, vector<8x8x8xf32> -> vector<8x8x8xf32>
    "tpu.trace_stop"() : () -> ()
    %62 = arith.addf %61, %5 : vector<8x8x8xf32>
    %cst_23 = arith.constant dense<0xFF800000> : vector<8x8xf32>
    %63 = vector.multi_reduction <maximumf>, %62, %cst_23 [2] : vector<8x8x8xf32> to vector<8x8xf32>
    %64 = vector.shape_cast %63 : vector<8x8xf32> to vector<8x8x1xf32>
    %65 = vector.broadcast %64 : vector<8x8x1xf32> to vector<8x8x8xf32>
    %66 = arith.subf %62, %65 : vector<8x8x8xf32>
    %67 = math.exp %66 : vector<8x8x8xf32>
    %cst_24 = arith.constant dense<0.000000e+00> : vector<8x8xf32>
    %68 = vector.multi_reduction <add>, %67, %cst_24 [2] : vector<8x8x8xf32> to vector<8x8xf32>
    %69 = vector.shape_cast %68 : vector<8x8xf32> to vector<8x8x1xf32>
    %70 = tpu.reciprocal %69 {approx = true} : vector<8x8x1xf32> -> vector<8x8x1xf32>
    %71 = vector.broadcast %70 : vector<8x8x1xf32> to vector<8x8x8xf32>
    %72 = arith.mulf %67, %71 : vector<8x8x8xf32>
    "tpu.trace_start"() <{level = 10 : i32, message = "gqk,gkd->gqd"}> : () -> ()
    %cst_25 = arith.constant dense<0.000000e+00> : vector<8x8x8xf32>
    %73 = tpu.matmul %72, %60, %cst_25 {dimension_numbers = #tpu.dot_dimension_numbers<[2], [1], [1], [2], [0, 0, 0, 1, 1, 2], [0], [0]>} : vector<8x8x8xf32>, vector<8x8x8xf32>, vector<8x8x8xf32> -> vector<8x8x8xf32>
    "tpu.trace_stop"() : () -> ()
    %74 = vector.extract_strided_slice %73 {offsets = [0, 0, 0], sizes = [2, 8, 8], strides = [1, 1, 1]} : vector<8x8x8xf32> to vector<2x8x8xf32>
    %75 = vector.shape_cast %74 : vector<2x8x8xf32> to vector<16x8xf32>
    %76 = vector.extract_strided_slice %73 {offsets = [2, 0, 0], sizes = [2, 8, 8], strides = [1, 1, 1]} : vector<8x8x8xf32> to vector<2x8x8xf32>
    %77 = vector.shape_cast %76 : vector<2x8x8xf32> to vector<16x8xf32>
    %78 = vector.extract_strided_slice %73 {offsets = [4, 0, 0], sizes = [2, 8, 8], strides = [1, 1, 1]} : vector<8x8x8xf32> to vector<2x8x8xf32>
    %79 = vector.shape_cast %78 : vector<2x8x8xf32> to vector<16x8xf32>
    %80 = vector.extract_strided_slice %73 {offsets = [6, 0, 0], sizes = [2, 8, 8], strides = [1, 1, 1]} : vector<8x8x8xf32> to vector<2x8x8xf32>
    %81 = vector.shape_cast %80 : vector<2x8x8xf32> to vector<16x8xf32>
    %82 = tpu.concatenate %75, %77, %79, %81 in 1 : vector<16x8xf32>, vector<16x8xf32>, vector<16x8xf32>, vector<16x8xf32> -> vector<16x32xf32>
    %c0_26 = arith.constant 0 : index
    %c0_27 = arith.constant 0 : index
    %c0_28 = arith.constant 0 : index
    %83 = vector.load %arg6[%c0_26, %c0_27, %c0_28] : memref<2x32x32xf32, #tpu.memory_space<vmem>>, vector<1x32x32xf32>
    %84 = vector.shape_cast %83 : vector<1x32x32xf32> to vector<32x32xf32>
    %cst_29 = arith.constant dense<0.000000e+00> : vector<16x32xf32>
    %85 = tpu.matmul %82, %84, %cst_29 {dimension_numbers = #tpu.dot_dimension_numbers<[1], [0], [0], [1], [0, 0, 1, 1], [], []>} : vector<16x32xf32>, vector<32x32xf32>, vector<16x32xf32> -> vector<16x32xf32>
    %86 = arith.addf %1, %85 : vector<16x32xf32>
    %cst_30 = arith.constant dense<0.000000e+00> : vector<16xf32>
    %87 = vector.multi_reduction <add>, %86, %cst_30 [1] : vector<16x32xf32> to vector<16xf32>
    %88 = vector.shape_cast %87 : vector<16xf32> to vector<16x1xf32>
    %cst_31 = arith.constant 3.200000e+01 : f32
    %89 = vector.broadcast %cst_31 : f32 to vector<16x1xf32>
    %90 = arith.divf %88, %89 : vector<16x1xf32>
    %91 = vector.broadcast %90 : vector<16x1xf32> to vector<16x32xf32>
    %92 = arith.subf %86, %91 : vector<16x32xf32>
    %93 = arith.mulf %92, %92 : vector<16x32xf32>
    %cst_32 = arith.constant dense<0.000000e+00> : vector<16xf32>
    %94 = vector.multi_reduction <add>, %93, %cst_32 [1] : vector<16x32xf32> to vector<16xf32>
    %95 = vector.shape_cast %94 : vector<16xf32> to vector<16x1xf32>
    %cst_33 = arith.constant 3.100000e+01 : f32
    %96 = vector.broadcast %cst_33 : f32 to vector<16x1xf32>
    %97 = arith.divf %95, %96 : vector<16x1xf32>
    %98 = math.sqrt %97 : vector<16x1xf32>
    %99 = vector.broadcast %90 : vector<16x1xf32> to vector<16x32xf32>
    %100 = arith.subf %86, %99 : vector<16x32xf32>
    %cst_34 = arith.constant 9.99999997E-7 : f32
    %101 = vector.broadcast %cst_34 : f32 to vector<16x1xf32>
    %102 = arith.addf %98, %101 : vector<16x1xf32>
    %103 = vector.broadcast %102 : vector<16x1xf32> to vector<16x32xf32>
    %104 = arith.divf %100, %103 : vector<16x32xf32>
    %c0_35 = arith.constant 0 : index
    %c0_36 = arith.constant 0 : index
    %c0_37 = arith.constant 0 : index
    %105 = vector.load %arg7[%c0_35, %c0_36, %c0_37] : memref<2x32x32xf32, #tpu.memory_space<vmem>>, vector<1x32x32xf32>
    %106 = vector.shape_cast %105 : vector<1x32x32xf32> to vector<32x32xf32>
    %cst_38 = arith.constant dense<0.000000e+00> : vector<16x32xf32>
    %107 = tpu.matmul %104, %106, %cst_38 {dimension_numbers = #tpu.dot_dimension_numbers<[1], [0], [0], [1], [0, 0, 1, 1], [], []>} : vector<16x32xf32>, vector<32x32xf32>, vector<16x32xf32> -> vector<16x32xf32>
    %108 = vector.extract_strided_slice %9 {offsets = [0, 0], sizes = [16, 64], strides = [1, 1]} : vector<16x128xf32> to vector<16x64xf32>
    %109 = vector.extract_strided_slice %107 {offsets = [0, 0], sizes = [16, 8], strides = [1, 1]} : vector<16x32xf32> to vector<16x8xf32>
    %110 = vector.shape_cast %109 : vector<16x8xf32> to vector<2x8x8xf32>
    %111 = vector.extract_strided_slice %107 {offsets = [0, 8], sizes = [16, 8], strides = [1, 1]} : vector<16x32xf32> to vector<16x8xf32>
    %112 = vector.shape_cast %111 : vector<16x8xf32> to vector<2x8x8xf32>
    %113 = vector.extract_strided_slice %107 {offsets = [0, 16], sizes = [16, 8], strides = [1, 1]} : vector<16x32xf32> to vector<16x8xf32>
    %114 = vector.shape_cast %113 : vector<16x8xf32> to vector<2x8x8xf32>
    %115 = vector.extract_strided_slice %107 {offsets = [0, 24], sizes = [16, 8], strides = [1, 1]} : vector<16x32xf32> to vector<16x8xf32>
    %116 = vector.shape_cast %115 : vector<16x8xf32> to vector<2x8x8xf32>
    %117 = tpu.concatenate %110, %112, %114, %116 in 0 : vector<2x8x8xf32>, vector<2x8x8xf32>, vector<2x8x8xf32>, vector<2x8x8xf32> -> vector<8x8x8xf32>
    %118 = vector.extract_strided_slice %108 {offsets = [0, 0], sizes = [16, 32], strides = [1, 1]} : vector<16x64xf32> to vector<16x32xf32>
    %119 = vector.extract_strided_slice %118 {offsets = [0, 0], sizes = [16, 8], strides = [1, 1]} : vector<16x32xf32> to vector<16x8xf32>
    %120 = vector.shape_cast %119 : vector<16x8xf32> to vector<2x8x8xf32>
    %121 = vector.extract_strided_slice %118 {offsets = [0, 8], sizes = [16, 8], strides = [1, 1]} : vector<16x32xf32> to vector<16x8xf32>
    %122 = vector.shape_cast %121 : vector<16x8xf32> to vector<2x8x8xf32>
    %123 = vector.extract_strided_slice %118 {offsets = [0, 16], sizes = [16, 8], strides = [1, 1]} : vector<16x32xf32> to vector<16x8xf32>
    %124 = vector.shape_cast %123 : vector<16x8xf32> to vector<2x8x8xf32>
    %125 = vector.extract_strided_slice %118 {offsets = [0, 24], sizes = [16, 8], strides = [1, 1]} : vector<16x32xf32> to vector<16x8xf32>
    %126 = vector.shape_cast %125 : vector<16x8xf32> to vector<2x8x8xf32>
    %127 = tpu.concatenate %120, %122, %124, %126 in 0 : vector<2x8x8xf32>, vector<2x8x8xf32>, vector<2x8x8xf32>, vector<2x8x8xf32> -> vector<8x8x8xf32>
    %128 = vector.extract_strided_slice %108 {offsets = [0, 32], sizes = [16, 32], strides = [1, 1]} : vector<16x64xf32> to vector<16x32xf32>
    %129 = vector.extract_strided_slice %128 {offsets = [0, 0], sizes = [16, 8], strides = [1, 1]} : vector<16x32xf32> to vector<16x8xf32>
    %130 = vector.shape_cast %129 : vector<16x8xf32> to vector<2x8x8xf32>
    %131 = vector.extract_strided_slice %128 {offsets = [0, 8], sizes = [16, 8], strides = [1, 1]} : vector<16x32xf32> to vector<16x8xf32>
    %132 = vector.shape_cast %131 : vector<16x8xf32> to vector<2x8x8xf32>
    %133 = vector.extract_strided_slice %128 {offsets = [0, 16], sizes = [16, 8], strides = [1, 1]} : vector<16x32xf32> to vector<16x8xf32>
    %134 = vector.shape_cast %133 : vector<16x8xf32> to vector<2x8x8xf32>
    %135 = vector.extract_strided_slice %128 {offsets = [0, 24], sizes = [16, 8], strides = [1, 1]} : vector<16x32xf32> to vector<16x8xf32>
    %136 = vector.shape_cast %135 : vector<16x8xf32> to vector<2x8x8xf32>
    %137 = tpu.concatenate %130, %132, %134, %136 in 0 : vector<2x8x8xf32>, vector<2x8x8xf32>, vector<2x8x8xf32>, vector<2x8x8xf32> -> vector<8x8x8xf32>
    "tpu.trace_start"() <{level = 10 : i32, message = "gqd,gkd->gqk"}> : () -> ()
    %cst_39 = arith.constant dense<0.000000e+00> : vector<8x8x8xf32>
    %138 = tpu.matmul %117, %127, %cst_39 {dimension_numbers = #tpu.dot_dimension_numbers<[2], [2], [1], [1], [0, 0, 0, 1, 1, 1], [0], [0]>} : vector<8x8x8xf32>, vector<8x8x8xf32>, vector<8x8x8xf32> -> vector<8x8x8xf32>
    "tpu.trace_stop"() : () -> ()
    %139 = arith.addf %138, %7 : vector<8x8x8xf32>
    %cst_40 = arith.constant dense<0xFF800000> : vector<8x8xf32>
    %140 = vector.multi_reduction <maximumf>, %139, %cst_40 [2] : vector<8x8x8xf32> to vector<8x8xf32>
    %141 = vector.shape_cast %140 : vector<8x8xf32> to vector<8x8x1xf32>
    %142 = vector.broadcast %141 : vector<8x8x1xf32> to vector<8x8x8xf32>
    %143 = arith.subf %139, %142 : vector<8x8x8xf32>
    %144 = math.exp %143 : vector<8x8x8xf32>
    %cst_41 = arith.constant dense<0.000000e+00> : vector<8x8xf32>
    %145 = vector.multi_reduction <add>, %144, %cst_41 [2] : vector<8x8x8xf32> to vector<8x8xf32>
    %146 = vector.shape_cast %145 : vector<8x8xf32> to vector<8x8x1xf32>
    %147 = tpu.reciprocal %146 {approx = true} : vector<8x8x1xf32> -> vector<8x8x1xf32>
    %148 = vector.broadcast %147 : vector<8x8x1xf32> to vector<8x8x8xf32>
    %149 = arith.mulf %144, %148 : vector<8x8x8xf32>
    "tpu.trace_start"() <{level = 10 : i32, message = "gqk,gkd->gqd"}> : () -> ()
    %cst_42 = arith.constant dense<0.000000e+00> : vector<8x8x8xf32>
    %150 = tpu.matmul %149, %137, %cst_42 {dimension_numbers = #tpu.dot_dimension_numbers<[2], [1], [1], [2], [0, 0, 0, 1, 1, 2], [0], [0]>} : vector<8x8x8xf32>, vector<8x8x8xf32>, vector<8x8x8xf32> -> vector<8x8x8xf32>
    "tpu.trace_stop"() : () -> ()
    %151 = vector.extract_strided_slice %150 {offsets = [0, 0, 0], sizes = [2, 8, 8], strides = [1, 1, 1]} : vector<8x8x8xf32> to vector<2x8x8xf32>
    %152 = vector.shape_cast %151 : vector<2x8x8xf32> to vector<16x8xf32>
    %153 = vector.extract_strided_slice %150 {offsets = [2, 0, 0], sizes = [2, 8, 8], strides = [1, 1, 1]} : vector<8x8x8xf32> to vector<2x8x8xf32>
    %154 = vector.shape_cast %153 : vector<2x8x8xf32> to vector<16x8xf32>
    %155 = vector.extract_strided_slice %150 {offsets = [4, 0, 0], sizes = [2, 8, 8], strides = [1, 1, 1]} : vector<8x8x8xf32> to vector<2x8x8xf32>
    %156 = vector.shape_cast %155 : vector<2x8x8xf32> to vector<16x8xf32>
    %157 = vector.extract_strided_slice %150 {offsets = [6, 0, 0], sizes = [2, 8, 8], strides = [1, 1, 1]} : vector<8x8x8xf32> to vector<2x8x8xf32>
    %158 = vector.shape_cast %157 : vector<2x8x8xf32> to vector<16x8xf32>
    %159 = tpu.concatenate %152, %154, %156, %158 in 1 : vector<16x8xf32>, vector<16x8xf32>, vector<16x8xf32>, vector<16x8xf32> -> vector<16x32xf32>
    %c0_43 = arith.constant 0 : index
    %c0_44 = arith.constant 0 : index
    %c0_45 = arith.constant 0 : index
    %160 = vector.load %arg9[%c0_43, %c0_44, %c0_45] : memref<2x32x32xf32, #tpu.memory_space<vmem>>, vector<1x32x32xf32>
    %161 = vector.shape_cast %160 : vector<1x32x32xf32> to vector<32x32xf32>
    %cst_46 = arith.constant dense<0.000000e+00> : vector<16x32xf32>
    %162 = tpu.matmul %159, %161, %cst_46 {dimension_numbers = #tpu.dot_dimension_numbers<[1], [0], [0], [1], [0, 0, 1, 1], [], []>} : vector<16x32xf32>, vector<32x32xf32>, vector<16x32xf32> -> vector<16x32xf32>
    %163 = arith.addf %86, %162 : vector<16x32xf32>
    %cst_47 = arith.constant dense<0.000000e+00> : vector<16xf32>
    %164 = vector.multi_reduction <add>, %163, %cst_47 [1] : vector<16x32xf32> to vector<16xf32>
    %165 = vector.shape_cast %164 : vector<16xf32> to vector<16x1xf32>
    %cst_48 = arith.constant 3.200000e+01 : f32
    %166 = vector.broadcast %cst_48 : f32 to vector<16x1xf32>
    %167 = arith.divf %165, %166 : vector<16x1xf32>
    %168 = vector.broadcast %167 : vector<16x1xf32> to vector<16x32xf32>
    %169 = arith.subf %163, %168 : vector<16x32xf32>
    %170 = arith.mulf %169, %169 : vector<16x32xf32>
    %cst_49 = arith.constant dense<0.000000e+00> : vector<16xf32>
    %171 = vector.multi_reduction <add>, %170, %cst_49 [1] : vector<16x32xf32> to vector<16xf32>
    %172 = vector.shape_cast %171 : vector<16xf32> to vector<16x1xf32>
    %cst_50 = arith.constant 3.100000e+01 : f32
    %173 = vector.broadcast %cst_50 : f32 to vector<16x1xf32>
    %174 = arith.divf %172, %173 : vector<16x1xf32>
    %175 = math.sqrt %174 : vector<16x1xf32>
    %176 = vector.broadcast %167 : vector<16x1xf32> to vector<16x32xf32>
    %177 = arith.subf %163, %176 : vector<16x32xf32>
    %cst_51 = arith.constant 9.99999997E-7 : f32
    %178 = vector.broadcast %cst_51 : f32 to vector<16x1xf32>
    %179 = arith.addf %175, %178 : vector<16x1xf32>
    %180 = vector.broadcast %179 : vector<16x1xf32> to vector<16x32xf32>
    %181 = arith.divf %177, %180 : vector<16x32xf32>
    %c0_52 = arith.constant 0 : index
    %c0_53 = arith.constant 0 : index
    %c0_54 = arith.constant 0 : index
    %182 = vector.load %arg10[%c0_52, %c0_53, %c0_54] : memref<2x32x64xf32, #tpu.memory_space<vmem>>, vector<1x32x64xf32>
    %183 = vector.shape_cast %182 : vector<1x32x64xf32> to vector<32x64xf32>
    %cst_55 = arith.constant dense<0.000000e+00> : vector<16x64xf32>
    %184 = tpu.matmul %181, %183, %cst_55 {dimension_numbers = #tpu.dot_dimension_numbers<[1], [0], [0], [1], [0, 0, 1, 1], [], []>} : vector<16x32xf32>, vector<32x64xf32>, vector<16x64xf32> -> vector<16x64xf32>
    %c0_56 = arith.constant 0 : index
    %c0_57 = arith.constant 0 : index
    %c0_58 = arith.constant 0 : index
    %185 = vector.load %arg11[%c0_56, %c0_57, %c0_58] : memref<2x1x64xf32, #tpu.memory_space<vmem>>, vector<1x1x64xf32>
    %186 = vector.shape_cast %185 : vector<1x1x64xf32> to vector<1x64xf32>
    %187 = vector.broadcast %186 : vector<1x64xf32> to vector<16x64xf32>
    %188 = arith.addf %184, %187 : vector<16x64xf32>
    %cst_59 = arith.constant 0.000000e+00 : f32
    %189 = vector.broadcast %cst_59 : f32 to vector<16x64xf32>
    %190 = arith.maximumf %188, %189 : vector<16x64xf32>
    %c0_60 = arith.constant 0 : index
    %c0_61 = arith.constant 0 : index
    %c0_62 = arith.constant 0 : index
    %191 = vector.load %arg12[%c0_60, %c0_61, %c0_62] : memref<2x64x32xf32, #tpu.memory_space<vmem>>, vector<1x64x32xf32>
    %192 = vector.shape_cast %191 : vector<1x64x32xf32> to vector<64x32xf32>
    %cst_63 = arith.constant dense<0.000000e+00> : vector<16x32xf32>
    %193 = tpu.matmul %190, %192, %cst_63 {dimension_numbers = #tpu.dot_dimension_numbers<[1], [0], [0], [1], [0, 0, 1, 1], [], []>} : vector<16x64xf32>, vector<64x32xf32>, vector<16x32xf32> -> vector<16x32xf32>
    %c0_64 = arith.constant 0 : index
    %c0_65 = arith.constant 0 : index
    %c0_66 = arith.constant 0 : index
    %194 = vector.load %arg13[%c0_64, %c0_65, %c0_66] : memref<2x1x32xf32, #tpu.memory_space<vmem>>, vector<1x1x32xf32>
    %195 = vector.shape_cast %194 : vector<1x1x32xf32> to vector<1x32xf32>
    %196 = vector.broadcast %195 : vector<1x32xf32> to vector<16x32xf32>
    %197 = arith.addf %193, %196 : vector<16x32xf32>
    %198 = arith.addf %163, %197 : vector<16x32xf32>
    %cst_67 = arith.constant dense<0.000000e+00> : vector<16xf32>
    %199 = vector.multi_reduction <add>, %198, %cst_67 [1] : vector<16x32xf32> to vector<16xf32>
    %200 = vector.shape_cast %199 : vector<16xf32> to vector<16x1xf32>
    %cst_68 = arith.constant 3.200000e+01 : f32
    %201 = vector.broadcast %cst_68 : f32 to vector<16x1xf32>
    %202 = arith.divf %200, %201 : vector<16x1xf32>
    %203 = vector.broadcast %202 : vector<16x1xf32> to vector<16x32xf32>
    %204 = arith.subf %198, %203 : vector<16x32xf32>
    %205 = arith.mulf %204, %204 : vector<16x32xf32>
    %cst_69 = arith.constant dense<0.000000e+00> : vector<16xf32>
    %206 = vector.multi_reduction <add>, %205, %cst_69 [1] : vector<16x32xf32> to vector<16xf32>
    %207 = vector.shape_cast %206 : vector<16xf32> to vector<16x1xf32>
    %cst_70 = arith.constant 3.100000e+01 : f32
    %208 = vector.broadcast %cst_70 : f32 to vector<16x1xf32>
    %209 = arith.divf %207, %208 : vector<16x1xf32>
    %210 = math.sqrt %209 : vector<16x1xf32>
    %211 = vector.broadcast %202 : vector<16x1xf32> to vector<16x32xf32>
    %212 = arith.subf %198, %211 : vector<16x32xf32>
    %cst_71 = arith.constant 9.99999997E-7 : f32
    %213 = vector.broadcast %cst_71 : f32 to vector<16x1xf32>
    %214 = arith.addf %210, %213 : vector<16x1xf32>
    %215 = vector.broadcast %214 : vector<16x1xf32> to vector<16x32xf32>
    %216 = arith.divf %212, %215 : vector<16x32xf32>
    %c1 = arith.constant 1 : index
    %c0_72 = arith.constant 0 : index
    %c0_73 = arith.constant 0 : index
    %217 = vector.load %arg5[%c1, %c0_72, %c0_73] : memref<2x32x96xf32, #tpu.memory_space<vmem>>, vector<1x32x96xf32>
    %218 = vector.shape_cast %217 : vector<1x32x96xf32> to vector<32x96xf32>
    %cst_74 = arith.constant dense<0.000000e+00> : vector<16x96xf32>
    %219 = tpu.matmul %216, %218, %cst_74 {dimension_numbers = #tpu.dot_dimension_numbers<[1], [0], [0], [1], [0, 0, 1, 1], [], []>} : vector<16x32xf32>, vector<32x96xf32>, vector<16x96xf32> -> vector<16x96xf32>
    %220 = vector.extract_strided_slice %219 {offsets = [0, 0], sizes = [16, 32], strides = [1, 1]} : vector<16x96xf32> to vector<16x32xf32>
    %221 = vector.extract_strided_slice %220 {offsets = [0, 0], sizes = [16, 8], strides = [1, 1]} : vector<16x32xf32> to vector<16x8xf32>
    %222 = vector.shape_cast %221 : vector<16x8xf32> to vector<2x8x8xf32>
    %223 = vector.extract_strided_slice %220 {offsets = [0, 8], sizes = [16, 8], strides = [1, 1]} : vector<16x32xf32> to vector<16x8xf32>
    %224 = vector.shape_cast %223 : vector<16x8xf32> to vector<2x8x8xf32>
    %225 = vector.extract_strided_slice %220 {offsets = [0, 16], sizes = [16, 8], strides = [1, 1]} : vector<16x32xf32> to vector<16x8xf32>
    %226 = vector.shape_cast %225 : vector<16x8xf32> to vector<2x8x8xf32>
    %227 = vector.extract_strided_slice %220 {offsets = [0, 24], sizes = [16, 8], strides = [1, 1]} : vector<16x32xf32> to vector<16x8xf32>
    %228 = vector.shape_cast %227 : vector<16x8xf32> to vector<2x8x8xf32>
    %229 = tpu.concatenate %222, %224, %226, %228 in 0 : vector<2x8x8xf32>, vector<2x8x8xf32>, vector<2x8x8xf32>, vector<2x8x8xf32> -> vector<8x8x8xf32>
    %230 = vector.extract_strided_slice %219 {offsets = [0, 32], sizes = [16, 32], strides = [1, 1]} : vector<16x96xf32> to vector<16x32xf32>
    %231 = vector.extract_strided_slice %230 {offsets = [0, 0], sizes = [16, 8], strides = [1, 1]} : vector<16x32xf32> to vector<16x8xf32>
    %232 = vector.shape_cast %231 : vector<16x8xf32> to vector<2x8x8xf32>
    %233 = vector.extract_strided_slice %230 {offsets = [0, 8], sizes = [16, 8], strides = [1, 1]} : vector<16x32xf32> to vector<16x8xf32>
    %234 = vector.shape_cast %233 : vector<16x8xf32> to vector<2x8x8xf32>
    %235 = vector.extract_strided_slice %230 {offsets = [0, 16], sizes = [16, 8], strides = [1, 1]} : vector<16x32xf32> to vector<16x8xf32>
    %236 = vector.shape_cast %235 : vector<16x8xf32> to vector<2x8x8xf32>
    %237 = vector.extract_strided_slice %230 {offsets = [0, 24], sizes = [16, 8], strides = [1, 1]} : vector<16x32xf32> to vector<16x8xf32>
    %238 = vector.shape_cast %237 : vector<16x8xf32> to vector<2x8x8xf32>
    %239 = tpu.concatenate %232, %234, %236, %238 in 0 : vector<2x8x8xf32>, vector<2x8x8xf32>, vector<2x8x8xf32>, vector<2x8x8xf32> -> vector<8x8x8xf32>
    %240 = vector.extract_strided_slice %219 {offsets = [0, 64], sizes = [16, 32], strides = [1, 1]} : vector<16x96xf32> to vector<16x32xf32>
    %241 = vector.extract_strided_slice %240 {offsets = [0, 0], sizes = [16, 8], strides = [1, 1]} : vector<16x32xf32> to vector<16x8xf32>
    %242 = vector.shape_cast %241 : vector<16x8xf32> to vector<2x8x8xf32>
    %243 = vector.extract_strided_slice %240 {offsets = [0, 8], sizes = [16, 8], strides = [1, 1]} : vector<16x32xf32> to vector<16x8xf32>
    %244 = vector.shape_cast %243 : vector<16x8xf32> to vector<2x8x8xf32>
    %245 = vector.extract_strided_slice %240 {offsets = [0, 16], sizes = [16, 8], strides = [1, 1]} : vector<16x32xf32> to vector<16x8xf32>
    %246 = vector.shape_cast %245 : vector<16x8xf32> to vector<2x8x8xf32>
    %247 = vector.extract_strided_slice %240 {offsets = [0, 24], sizes = [16, 8], strides = [1, 1]} : vector<16x32xf32> to vector<16x8xf32>
    %248 = vector.shape_cast %247 : vector<16x8xf32> to vector<2x8x8xf32>
    %249 = tpu.concatenate %242, %244, %246, %248 in 0 : vector<2x8x8xf32>, vector<2x8x8xf32>, vector<2x8x8xf32>, vector<2x8x8xf32> -> vector<8x8x8xf32>
    "tpu.trace_start"() <{level = 10 : i32, message = "gqd,gkd->gqk"}> : () -> ()
    %cst_75 = arith.constant dense<0.000000e+00> : vector<8x8x8xf32>
    %250 = tpu.matmul %229, %239, %cst_75 {dimension_numbers = #tpu.dot_dimension_numbers<[2], [2], [1], [1], [0, 0, 0, 1, 1, 1], [0], [0]>} : vector<8x8x8xf32>, vector<8x8x8xf32>, vector<8x8x8xf32> -> vector<8x8x8xf32>
    "tpu.trace_stop"() : () -> ()
    %251 = arith.addf %250, %5 : vector<8x8x8xf32>
    %cst_76 = arith.constant dense<0xFF800000> : vector<8x8xf32>
    %252 = vector.multi_reduction <maximumf>, %251, %cst_76 [2] : vector<8x8x8xf32> to vector<8x8xf32>
    %253 = vector.shape_cast %252 : vector<8x8xf32> to vector<8x8x1xf32>
    %254 = vector.broadcast %253 : vector<8x8x1xf32> to vector<8x8x8xf32>
    %255 = arith.subf %251, %254 : vector<8x8x8xf32>
    %256 = math.exp %255 : vector<8x8x8xf32>
    %cst_77 = arith.constant dense<0.000000e+00> : vector<8x8xf32>
    %257 = vector.multi_reduction <add>, %256, %cst_77 [2] : vector<8x8x8xf32> to vector<8x8xf32>
    %258 = vector.shape_cast %257 : vector<8x8xf32> to vector<8x8x1xf32>
    %259 = tpu.reciprocal %258 {approx = true} : vector<8x8x1xf32> -> vector<8x8x1xf32>
    %260 = vector.broadcast %259 : vector<8x8x1xf32> to vector<8x8x8xf32>
    %261 = arith.mulf %256, %260 : vector<8x8x8xf32>
    "tpu.trace_start"() <{level = 10 : i32, message = "gqk,gkd->gqd"}> : () -> ()
    %cst_78 = arith.constant dense<0.000000e+00> : vector<8x8x8xf32>
    %262 = tpu.matmul %261, %249, %cst_78 {dimension_numbers = #tpu.dot_dimension_numbers<[2], [1], [1], [2], [0, 0, 0, 1, 1, 2], [0], [0]>} : vector<8x8x8xf32>, vector<8x8x8xf32>, vector<8x8x8xf32> -> vector<8x8x8xf32>
    "tpu.trace_stop"() : () -> ()
    %263 = vector.extract_strided_slice %262 {offsets = [0, 0, 0], sizes = [2, 8, 8], strides = [1, 1, 1]} : vector<8x8x8xf32> to vector<2x8x8xf32>
    %264 = vector.shape_cast %263 : vector<2x8x8xf32> to vector<16x8xf32>
    %265 = vector.extract_strided_slice %262 {offsets = [2, 0, 0], sizes = [2, 8, 8], strides = [1, 1, 1]} : vector<8x8x8xf32> to vector<2x8x8xf32>
    %266 = vector.shape_cast %265 : vector<2x8x8xf32> to vector<16x8xf32>
    %267 = vector.extract_strided_slice %262 {offsets = [4, 0, 0], sizes = [2, 8, 8], strides = [1, 1, 1]} : vector<8x8x8xf32> to vector<2x8x8xf32>
    %268 = vector.shape_cast %267 : vector<2x8x8xf32> to vector<16x8xf32>
    %269 = vector.extract_strided_slice %262 {offsets = [6, 0, 0], sizes = [2, 8, 8], strides = [1, 1, 1]} : vector<8x8x8xf32> to vector<2x8x8xf32>
    %270 = vector.shape_cast %269 : vector<2x8x8xf32> to vector<16x8xf32>
    %271 = tpu.concatenate %264, %266, %268, %270 in 1 : vector<16x8xf32>, vector<16x8xf32>, vector<16x8xf32>, vector<16x8xf32> -> vector<16x32xf32>
    %c1_79 = arith.constant 1 : index
    %c0_80 = arith.constant 0 : index
    %c0_81 = arith.constant 0 : index
    %272 = vector.load %arg6[%c1_79, %c0_80, %c0_81] : memref<2x32x32xf32, #tpu.memory_space<vmem>>, vector<1x32x32xf32>
    %273 = vector.shape_cast %272 : vector<1x32x32xf32> to vector<32x32xf32>
    %cst_82 = arith.constant dense<0.000000e+00> : vector<16x32xf32>
    %274 = tpu.matmul %271, %273, %cst_82 {dimension_numbers = #tpu.dot_dimension_numbers<[1], [0], [0], [1], [0, 0, 1, 1], [], []>} : vector<16x32xf32>, vector<32x32xf32>, vector<16x32xf32> -> vector<16x32xf32>
    %275 = arith.addf %198, %274 : vector<16x32xf32>
    %cst_83 = arith.constant dense<0.000000e+00> : vector<16xf32>
    %276 = vector.multi_reduction <add>, %275, %cst_83 [1] : vector<16x32xf32> to vector<16xf32>
    %277 = vector.shape_cast %276 : vector<16xf32> to vector<16x1xf32>
    %cst_84 = arith.constant 3.200000e+01 : f32
    %278 = vector.broadcast %cst_84 : f32 to vector<16x1xf32>
    %279 = arith.divf %277, %278 : vector<16x1xf32>
    %280 = vector.broadcast %279 : vector<16x1xf32> to vector<16x32xf32>
    %281 = arith.subf %275, %280 : vector<16x32xf32>
    %282 = arith.mulf %281, %281 : vector<16x32xf32>
    %cst_85 = arith.constant dense<0.000000e+00> : vector<16xf32>
    %283 = vector.multi_reduction <add>, %282, %cst_85 [1] : vector<16x32xf32> to vector<16xf32>
    %284 = vector.shape_cast %283 : vector<16xf32> to vector<16x1xf32>
    %cst_86 = arith.constant 3.100000e+01 : f32
    %285 = vector.broadcast %cst_86 : f32 to vector<16x1xf32>
    %286 = arith.divf %284, %285 : vector<16x1xf32>
    %287 = math.sqrt %286 : vector<16x1xf32>
    %288 = vector.broadcast %279 : vector<16x1xf32> to vector<16x32xf32>
    %289 = arith.subf %275, %288 : vector<16x32xf32>
    %cst_87 = arith.constant 9.99999997E-7 : f32
    %290 = vector.broadcast %cst_87 : f32 to vector<16x1xf32>
    %291 = arith.addf %287, %290 : vector<16x1xf32>
    %292 = vector.broadcast %291 : vector<16x1xf32> to vector<16x32xf32>
    %293 = arith.divf %289, %292 : vector<16x32xf32>
    %c1_88 = arith.constant 1 : index
    %c0_89 = arith.constant 0 : index
    %c0_90 = arith.constant 0 : index
    %294 = vector.load %arg7[%c1_88, %c0_89, %c0_90] : memref<2x32x32xf32, #tpu.memory_space<vmem>>, vector<1x32x32xf32>
    %295 = vector.shape_cast %294 : vector<1x32x32xf32> to vector<32x32xf32>
    %cst_91 = arith.constant dense<0.000000e+00> : vector<16x32xf32>
    %296 = tpu.matmul %293, %295, %cst_91 {dimension_numbers = #tpu.dot_dimension_numbers<[1], [0], [0], [1], [0, 0, 1, 1], [], []>} : vector<16x32xf32>, vector<32x32xf32>, vector<16x32xf32> -> vector<16x32xf32>
    %297 = vector.extract_strided_slice %9 {offsets = [0, 64], sizes = [16, 64], strides = [1, 1]} : vector<16x128xf32> to vector<16x64xf32>
    %298 = vector.extract_strided_slice %296 {offsets = [0, 0], sizes = [16, 8], strides = [1, 1]} : vector<16x32xf32> to vector<16x8xf32>
    %299 = vector.shape_cast %298 : vector<16x8xf32> to vector<2x8x8xf32>
    %300 = vector.extract_strided_slice %296 {offsets = [0, 8], sizes = [16, 8], strides = [1, 1]} : vector<16x32xf32> to vector<16x8xf32>
    %301 = vector.shape_cast %300 : vector<16x8xf32> to vector<2x8x8xf32>
    %302 = vector.extract_strided_slice %296 {offsets = [0, 16], sizes = [16, 8], strides = [1, 1]} : vector<16x32xf32> to vector<16x8xf32>
    %303 = vector.shape_cast %302 : vector<16x8xf32> to vector<2x8x8xf32>
    %304 = vector.extract_strided_slice %296 {offsets = [0, 24], sizes = [16, 8], strides = [1, 1]} : vector<16x32xf32> to vector<16x8xf32>
    %305 = vector.shape_cast %304 : vector<16x8xf32> to vector<2x8x8xf32>
    %306 = tpu.concatenate %299, %301, %303, %305 in 0 : vector<2x8x8xf32>, vector<2x8x8xf32>, vector<2x8x8xf32>, vector<2x8x8xf32> -> vector<8x8x8xf32>
    %307 = vector.extract_strided_slice %297 {offsets = [0, 0], sizes = [16, 32], strides = [1, 1]} : vector<16x64xf32> to vector<16x32xf32>
    %308 = vector.extract_strided_slice %307 {offsets = [0, 0], sizes = [16, 8], strides = [1, 1]} : vector<16x32xf32> to vector<16x8xf32>
    %309 = vector.shape_cast %308 : vector<16x8xf32> to vector<2x8x8xf32>
    %310 = vector.extract_strided_slice %307 {offsets = [0, 8], sizes = [16, 8], strides = [1, 1]} : vector<16x32xf32> to vector<16x8xf32>
    %311 = vector.shape_cast %310 : vector<16x8xf32> to vector<2x8x8xf32>
    %312 = vector.extract_strided_slice %307 {offsets = [0, 16], sizes = [16, 8], strides = [1, 1]} : vector<16x32xf32> to vector<16x8xf32>
    %313 = vector.shape_cast %312 : vector<16x8xf32> to vector<2x8x8xf32>
    %314 = vector.extract_strided_slice %307 {offsets = [0, 24], sizes = [16, 8], strides = [1, 1]} : vector<16x32xf32> to vector<16x8xf32>
    %315 = vector.shape_cast %314 : vector<16x8xf32> to vector<2x8x8xf32>
    %316 = tpu.concatenate %309, %311, %313, %315 in 0 : vector<2x8x8xf32>, vector<2x8x8xf32>, vector<2x8x8xf32>, vector<2x8x8xf32> -> vector<8x8x8xf32>
    %317 = vector.extract_strided_slice %297 {offsets = [0, 32], sizes = [16, 32], strides = [1, 1]} : vector<16x64xf32> to vector<16x32xf32>
    %318 = vector.extract_strided_slice %317 {offsets = [0, 0], sizes = [16, 8], strides = [1, 1]} : vector<16x32xf32> to vector<16x8xf32>
    %319 = vector.shape_cast %318 : vector<16x8xf32> to vector<2x8x8xf32>
    %320 = vector.extract_strided_slice %317 {offsets = [0, 8], sizes = [16, 8], strides = [1, 1]} : vector<16x32xf32> to vector<16x8xf32>
    %321 = vector.shape_cast %320 : vector<16x8xf32> to vector<2x8x8xf32>
    %322 = vector.extract_strided_slice %317 {offsets = [0, 16], sizes = [16, 8], strides = [1, 1]} : vector<16x32xf32> to vector<16x8xf32>
    %323 = vector.shape_cast %322 : vector<16x8xf32> to vector<2x8x8xf32>
    %324 = vector.extract_strided_slice %317 {offsets = [0, 24], sizes = [16, 8], strides = [1, 1]} : vector<16x32xf32> to vector<16x8xf32>
    %325 = vector.shape_cast %324 : vector<16x8xf32> to vector<2x8x8xf32>
    %326 = tpu.concatenate %319, %321, %323, %325 in 0 : vector<2x8x8xf32>, vector<2x8x8xf32>, vector<2x8x8xf32>, vector<2x8x8xf32> -> vector<8x8x8xf32>
    "tpu.trace_start"() <{level = 10 : i32, message = "gqd,gkd->gqk"}> : () -> ()
    %cst_92 = arith.constant dense<0.000000e+00> : vector<8x8x8xf32>
    %327 = tpu.matmul %306, %316, %cst_92 {dimension_numbers = #tpu.dot_dimension_numbers<[2], [2], [1], [1], [0, 0, 0, 1, 1, 1], [0], [0]>} : vector<8x8x8xf32>, vector<8x8x8xf32>, vector<8x8x8xf32> -> vector<8x8x8xf32>
    "tpu.trace_stop"() : () -> ()
    %328 = arith.addf %327, %7 : vector<8x8x8xf32>
    %cst_93 = arith.constant dense<0xFF800000> : vector<8x8xf32>
    %329 = vector.multi_reduction <maximumf>, %328, %cst_93 [2] : vector<8x8x8xf32> to vector<8x8xf32>
    %330 = vector.shape_cast %329 : vector<8x8xf32> to vector<8x8x1xf32>
    %331 = vector.broadcast %330 : vector<8x8x1xf32> to vector<8x8x8xf32>
    %332 = arith.subf %328, %331 : vector<8x8x8xf32>
    %333 = math.exp %332 : vector<8x8x8xf32>
    %cst_94 = arith.constant dense<0.000000e+00> : vector<8x8xf32>
    %334 = vector.multi_reduction <add>, %333, %cst_94 [2] : vector<8x8x8xf32> to vector<8x8xf32>
    %335 = vector.shape_cast %334 : vector<8x8xf32> to vector<8x8x1xf32>
    %336 = tpu.reciprocal %335 {approx = true} : vector<8x8x1xf32> -> vector<8x8x1xf32>
    %337 = vector.broadcast %336 : vector<8x8x1xf32> to vector<8x8x8xf32>
    %338 = arith.mulf %333, %337 : vector<8x8x8xf32>
    "tpu.trace_start"() <{level = 10 : i32, message = "gqk,gkd->gqd"}> : () -> ()
    %cst_95 = arith.constant dense<0.000000e+00> : vector<8x8x8xf32>
    %339 = tpu.matmul %338, %326, %cst_95 {dimension_numbers = #tpu.dot_dimension_numbers<[2], [1], [1], [2], [0, 0, 0, 1, 1, 2], [0], [0]>} : vector<8x8x8xf32>, vector<8x8x8xf32>, vector<8x8x8xf32> -> vector<8x8x8xf32>
    "tpu.trace_stop"() : () -> ()
    %340 = vector.extract_strided_slice %339 {offsets = [0, 0, 0], sizes = [2, 8, 8], strides = [1, 1, 1]} : vector<8x8x8xf32> to vector<2x8x8xf32>
    %341 = vector.shape_cast %340 : vector<2x8x8xf32> to vector<16x8xf32>
    %342 = vector.extract_strided_slice %339 {offsets = [2, 0, 0], sizes = [2, 8, 8], strides = [1, 1, 1]} : vector<8x8x8xf32> to vector<2x8x8xf32>
    %343 = vector.shape_cast %342 : vector<2x8x8xf32> to vector<16x8xf32>
    %344 = vector.extract_strided_slice %339 {offsets = [4, 0, 0], sizes = [2, 8, 8], strides = [1, 1, 1]} : vector<8x8x8xf32> to vector<2x8x8xf32>
    %345 = vector.shape_cast %344 : vector<2x8x8xf32> to vector<16x8xf32>
    %346 = vector.extract_strided_slice %339 {offsets = [6, 0, 0], sizes = [2, 8, 8], strides = [1, 1, 1]} : vector<8x8x8xf32> to vector<2x8x8xf32>
    %347 = vector.shape_cast %346 : vector<2x8x8xf32> to vector<16x8xf32>
    %348 = tpu.concatenate %341, %343, %345, %347 in 1 : vector<16x8xf32>, vector<16x8xf32>, vector<16x8xf32>, vector<16x8xf32> -> vector<16x32xf32>
    %c1_96 = arith.constant 1 : index
    %c0_97 = arith.constant 0 : index
    %c0_98 = arith.constant 0 : index
    %349 = vector.load %arg9[%c1_96, %c0_97, %c0_98] : memref<2x32x32xf32, #tpu.memory_space<vmem>>, vector<1x32x32xf32>
    %350 = vector.shape_cast %349 : vector<1x32x32xf32> to vector<32x32xf32>
    %cst_99 = arith.constant dense<0.000000e+00> : vector<16x32xf32>
    %351 = tpu.matmul %348, %350, %cst_99 {dimension_numbers = #tpu.dot_dimension_numbers<[1], [0], [0], [1], [0, 0, 1, 1], [], []>} : vector<16x32xf32>, vector<32x32xf32>, vector<16x32xf32> -> vector<16x32xf32>
    %352 = arith.addf %275, %351 : vector<16x32xf32>
    %cst_100 = arith.constant dense<0.000000e+00> : vector<16xf32>
    %353 = vector.multi_reduction <add>, %352, %cst_100 [1] : vector<16x32xf32> to vector<16xf32>
    %354 = vector.shape_cast %353 : vector<16xf32> to vector<16x1xf32>
    %cst_101 = arith.constant 3.200000e+01 : f32
    %355 = vector.broadcast %cst_101 : f32 to vector<16x1xf32>
    %356 = arith.divf %354, %355 : vector<16x1xf32>
    %357 = vector.broadcast %356 : vector<16x1xf32> to vector<16x32xf32>
    %358 = arith.subf %352, %357 : vector<16x32xf32>
    %359 = arith.mulf %358, %358 : vector<16x32xf32>
    %cst_102 = arith.constant dense<0.000000e+00> : vector<16xf32>
    %360 = vector.multi_reduction <add>, %359, %cst_102 [1] : vector<16x32xf32> to vector<16xf32>
    %361 = vector.shape_cast %360 : vector<16xf32> to vector<16x1xf32>
    %cst_103 = arith.constant 3.100000e+01 : f32
    %362 = vector.broadcast %cst_103 : f32 to vector<16x1xf32>
    %363 = arith.divf %361, %362 : vector<16x1xf32>
    %364 = math.sqrt %363 : vector<16x1xf32>
    %365 = vector.broadcast %356 : vector<16x1xf32> to vector<16x32xf32>
    %366 = arith.subf %352, %365 : vector<16x32xf32>
    %cst_104 = arith.constant 9.99999997E-7 : f32
    %367 = vector.broadcast %cst_104 : f32 to vector<16x1xf32>
    %368 = arith.addf %364, %367 : vector<16x1xf32>
    %369 = vector.broadcast %368 : vector<16x1xf32> to vector<16x32xf32>
    %370 = arith.divf %366, %369 : vector<16x32xf32>
    %c1_105 = arith.constant 1 : index
    %c0_106 = arith.constant 0 : index
    %c0_107 = arith.constant 0 : index
    %371 = vector.load %arg10[%c1_105, %c0_106, %c0_107] : memref<2x32x64xf32, #tpu.memory_space<vmem>>, vector<1x32x64xf32>
    %372 = vector.shape_cast %371 : vector<1x32x64xf32> to vector<32x64xf32>
    %cst_108 = arith.constant dense<0.000000e+00> : vector<16x64xf32>
    %373 = tpu.matmul %370, %372, %cst_108 {dimension_numbers = #tpu.dot_dimension_numbers<[1], [0], [0], [1], [0, 0, 1, 1], [], []>} : vector<16x32xf32>, vector<32x64xf32>, vector<16x64xf32> -> vector<16x64xf32>
    %c1_109 = arith.constant 1 : index
    %c0_110 = arith.constant 0 : index
    %c0_111 = arith.constant 0 : index
    %374 = vector.load %arg11[%c1_109, %c0_110, %c0_111] : memref<2x1x64xf32, #tpu.memory_space<vmem>>, vector<1x1x64xf32>
    %375 = vector.shape_cast %374 : vector<1x1x64xf32> to vector<1x64xf32>
    %376 = vector.broadcast %375 : vector<1x64xf32> to vector<16x64xf32>
    %377 = arith.addf %373, %376 : vector<16x64xf32>
    %cst_112 = arith.constant 0.000000e+00 : f32
    %378 = vector.broadcast %cst_112 : f32 to vector<16x64xf32>
    %379 = arith.maximumf %377, %378 : vector<16x64xf32>
    %c1_113 = arith.constant 1 : index
    %c0_114 = arith.constant 0 : index
    %c0_115 = arith.constant 0 : index
    %380 = vector.load %arg12[%c1_113, %c0_114, %c0_115] : memref<2x64x32xf32, #tpu.memory_space<vmem>>, vector<1x64x32xf32>
    %381 = vector.shape_cast %380 : vector<1x64x32xf32> to vector<64x32xf32>
    %cst_116 = arith.constant dense<0.000000e+00> : vector<16x32xf32>
    %382 = tpu.matmul %379, %381, %cst_116 {dimension_numbers = #tpu.dot_dimension_numbers<[1], [0], [0], [1], [0, 0, 1, 1], [], []>} : vector<16x64xf32>, vector<64x32xf32>, vector<16x32xf32> -> vector<16x32xf32>
    %c1_117 = arith.constant 1 : index
    %c0_118 = arith.constant 0 : index
    %c0_119 = arith.constant 0 : index
    %383 = vector.load %arg13[%c1_117, %c0_118, %c0_119] : memref<2x1x32xf32, #tpu.memory_space<vmem>>, vector<1x1x32xf32>
    %384 = vector.shape_cast %383 : vector<1x1x32xf32> to vector<1x32xf32>
    %385 = vector.broadcast %384 : vector<1x32xf32> to vector<16x32xf32>
    %386 = arith.addf %382, %385 : vector<16x32xf32>
    %387 = arith.addf %352, %386 : vector<16x32xf32>
    %cst_120 = arith.constant dense<0.000000e+00> : vector<16xf32>
    %388 = vector.multi_reduction <add>, %387, %cst_120 [1] : vector<16x32xf32> to vector<16xf32>
    %389 = vector.shape_cast %388 : vector<16xf32> to vector<16x1xf32>
    %cst_121 = arith.constant 3.200000e+01 : f32
    %390 = vector.broadcast %cst_121 : f32 to vector<16x1xf32>
    %391 = arith.divf %389, %390 : vector<16x1xf32>
    %392 = vector.broadcast %391 : vector<16x1xf32> to vector<16x32xf32>
    %393 = arith.subf %387, %392 : vector<16x32xf32>
    %394 = arith.mulf %393, %393 : vector<16x32xf32>
    %cst_122 = arith.constant dense<0.000000e+00> : vector<16xf32>
    %395 = vector.multi_reduction <add>, %394, %cst_122 [1] : vector<16x32xf32> to vector<16xf32>
    %396 = vector.shape_cast %395 : vector<16xf32> to vector<16x1xf32>
    %cst_123 = arith.constant 3.100000e+01 : f32
    %397 = vector.broadcast %cst_123 : f32 to vector<16x1xf32>
    %398 = arith.divf %396, %397 : vector<16x1xf32>
    %399 = math.sqrt %398 : vector<16x1xf32>
    %400 = vector.broadcast %391 : vector<16x1xf32> to vector<16x32xf32>
    %401 = arith.subf %387, %400 : vector<16x32xf32>
    %cst_124 = arith.constant 9.99999997E-7 : f32
    %402 = vector.broadcast %cst_124 : f32 to vector<16x1xf32>
    %403 = arith.addf %399, %402 : vector<16x1xf32>
    %404 = vector.broadcast %403 : vector<16x1xf32> to vector<16x32xf32>
    %405 = arith.divf %401, %404 : vector<16x32xf32>
    %406 = vector.shape_cast %405 : vector<16x32xf32> to vector<2x8x32xf32>
    %c0_125 = arith.constant 0 : index
    %c0_126 = arith.constant 0 : index
    %c0_127 = arith.constant 0 : index
    %407 = vector.load %arg14[%c0_125, %c0_126, %c0_127] : memref<2x8x32xf32, #tpu.memory_space<vmem>>, vector<2x8x32xf32>
    tpu.vector_store %arg14[%c0_125, %c0_126, %c0_127], %406 {strides = array<i32>} : memref<2x8x32xf32, #tpu.memory_space<vmem>>, vector<2x8x32xf32>,
    return
  }
  func.func @transform_0(%arg0: i32) -> (i32, i32, i32) {
    %c0_i32 = arith.constant 0 : i32
    %c0_i32_0 = arith.constant 0 : i32
    %c0_i32_1 = arith.constant 0 : i32
    return %arg0, %c0_i32, %c0_i32_0 : i32, i32, i32
  }
  func.func @transform_1(%arg0: i32) -> (i32, i32, i32) {
    %c0_i32 = arith.constant 0 : i32
    %c0_i32_0 = arith.constant 0 : i32
    %c0_i32_1 = arith.constant 0 : i32
    return %arg0, %c0_i32, %c0_i32_0 : i32, i32, i32
  }
  func.func @transform_2(%arg0: i32) -> (i32, i32, i32) {
    %c0_i32 = arith.constant 0 : i32
    %c0_i32_0 = arith.constant 0 : i32
    %c0_i32_1 = arith.constant 0 : i32
    return %arg0, %c0_i32, %c0_i32_0 : i32, i32, i32
  }
  func.func @transform_3(%arg0: i32) -> (i32, i32, i32) {
    %c0_i32 = arith.constant 0 : i32
    %c0_i32_0 = arith.constant 0 : i32
    %c0_i32_1 = arith.constant 0 : i32
    return %arg0, %c0_i32, %c0_i32_0 : i32, i32, i32
  }
  func.func @transform_4(%arg0: i32) -> (i32, i32, i32) {
    %c0_i32 = arith.constant 0 : i32
    %c0_i32_0 = arith.constant 0 : i32
    %c0_i32_1 = arith.constant 0 : i32
    %c0_i32_2 = arith.constant 0 : i32
    return %c0_i32, %c0_i32_0, %c0_i32_1 : i32, i32, i32
  }
  func.func @transform_5(%arg0: i32) -> (i32, i32, i32) {
    %c0_i32 = arith.constant 0 : i32
    %c0_i32_0 = arith.constant 0 : i32
    %c0_i32_1 = arith.constant 0 : i32
    %c0_i32_2 = arith.constant 0 : i32
    return %c0_i32, %c0_i32_0, %c0_i32_1 : i32, i32, i32
  }
  func.func @transform_6(%arg0: i32) -> (i32, i32, i32) {
    %c0_i32 = arith.constant 0 : i32
    %c0_i32_0 = arith.constant 0 : i32
    %c0_i32_1 = arith.constant 0 : i32
    %c0_i32_2 = arith.constant 0 : i32
    return %c0_i32, %c0_i32_0, %c0_i32_1 : i32, i32, i32
  }
  func.func @transform_7(%arg0: i32) -> (i32, i32) {
    %c0_i32 = arith.constant 0 : i32
    %c0_i32_0 = arith.constant 0 : i32
    %c0_i32_1 = arith.constant 0 : i32
    return %c0_i32, %c0_i32_0 : i32, i32
  }
  func.func @transform_8(%arg0: i32) -> (i32, i32, i32) {
    %c0_i32 = arith.constant 0 : i32
    %c0_i32_0 = arith.constant 0 : i32
    %c0_i32_1 = arith.constant 0 : i32
    %c0_i32_2 = arith.constant 0 : i32
    return %c0_i32, %c0_i32_0, %c0_i32_1 : i32, i32, i32
  }
  func.func @transform_9(%arg0: i32) -> (i32, i32, i32) {
    %c0_i32 = arith.constant 0 : i32
    %c0_i32_0 = arith.constant 0 : i32
    %c0_i32_1 = arith.constant 0 : i32
    %c0_i32_2 = arith.constant 0 : i32
    return %c0_i32, %c0_i32_0, %c0_i32_1 : i32, i32, i32
  }
  func.func @transform_10(%arg0: i32) -> (i32, i32, i32) {
    %c0_i32 = arith.constant 0 : i32
    %c0_i32_0 = arith.constant 0 : i32
    %c0_i32_1 = arith.constant 0 : i32
    %c0_i32_2 = arith.constant 0 : i32
    return %c0_i32, %c0_i32_0, %c0_i32_1 : i32, i32, i32
  }
  func.func @transform_11(%arg0: i32) -> (i32, i32, i32) {
    %c0_i32 = arith.constant 0 : i32
    %c0_i32_0 = arith.constant 0 : i32
    %c0_i32_1 = arith.constant 0 : i32
    %c0_i32_2 = arith.constant 0 : i32
    return %c0_i32, %c0_i32_0, %c0_i32_1 : i32, i32, i32
  }
  func.func @transform_12(%arg0: i32) -> (i32, i32, i32) {
    %c0_i32 = arith.constant 0 : i32
    %c0_i32_0 = arith.constant 0 : i32
    %c0_i32_1 = arith.constant 0 : i32
    %c0_i32_2 = arith.constant 0 : i32
    return %c0_i32, %c0_i32_0, %c0_i32_1 : i32, i32, i32
  }
  func.func @transform_13(%arg0: i32) -> (i32, i32, i32) {
    %c0_i32 = arith.constant 0 : i32
    %c0_i32_0 = arith.constant 0 : i32
    %c0_i32_1 = arith.constant 0 : i32
    return %arg0, %c0_i32, %c0_i32_0 : i32, i32, i32
  }
}

</mosaic_0001>

<bundles_post_ra>
// kernel: tpu_custom_call.1
= control target key start
LH: loop header
LB: loop body
LE: loop exit
PB: predicated region body
PF: predicated region fallthrough
CT: control target
= control target key end

     0   :  { %18 = vsyncpa [#allocation3], 0  ;;  %s9538_s0 = inlined_call_operand.hbm [shape: f32[2,8,32], index: 0, kind: input, shape index: {}]   ;;  %s9539_s1 = inlined_call_operand.hbm [shape: f32[2,8,32], index: 1, kind: input, shape index: {}]   ;;  %s9540_s2 = inlined_call_operand.hbm [shape: f32[2,8,8], index: 2, kind: input, shape index: {}]   ;;  %s9541_s3 = inlined_call_operand.hbm [shape: f32[2,8,8], index: 3, kind: input, shape index: {}]   ;;  %s9542_s4 = inlined_call_operand.vmem [shape: f32[2,32,96], index: 4, kind: input, shape index: {}]   ;;  %s9543_s5 = inlined_call_operand.vmem [shape: f32[2,32,32], index: 5, kind: input, shape index: {}]   ;;  %s9544_s6 = inlined_call_operand.vmem [shape: f32[2,32,32], index: 6, kind: input, shape index: {}]   ;;  %s9545_s7 = inlined_call_operand.hbm [shape: f32[32,128], index: 7, kind: input, shape index: {}]   ;;  %s9546_s8 = inlined_call_operand.hbm [shape: f32[2,32,32], index: 8, kind: input, shape index: {}]   ;;  %s9547_s9 = inlined_call_operand.hbm [shape: f32[2,32,64], index: 9, kind: input, shape index: {}]   ;;  %s9548_s10 = inlined_call_operand.vmem [shape: f32[2,1,64], index: 10, kind: input, shape index: {}]   ;;  %s9549_s11 = inlined_call_operand.vmem [shape: f32[2,64,32], index: 11, kind: input, shape index: {}]   ;;  %s9550_s12 = inlined_call_operand.vmem [shape: f32[2,1,32], index: 12, kind: input, shape index: {}]   ;;  %s9551_s13 = inlined_call_operand.hbm [shape: f32[2,8,32], index: 13, kind: output, shape index: {}]  }
   0x1   :  { %19 = vsyncpa [#allocation6], 0 }
   0x2   :  { %20 = vsyncpa [#allocation9], 0 }
   0x3   :  { %21 = vsyncpa [#allocation12], 0 }
   0x4   :  { %22 = vsyncpa [#allocation4], 0  ;;  %s8367_s25 = smov [#allocation5]   ;;  %s8368_s27 = smov [#allocation8]  }
   0x5   :  { %s40_s26 = sshll.u32 %s8367_s25, 4  ;;  %s64_s28 = sshll.u32 %s8368_s27, 4  ;;  %s41_s26 = int_to_ptr.vmem [resolvable:$true] %s40_s26  ;;  %s8457_s28 = int_to_ptr.vmem [resolvable:$true] %s64_s28 }
   0x6   :  { %s8181_s14 = scalar_lea.hbm %s9539_s1, 256 }
   0x7   :  { %p8182_p0 = scmp.ne.s32.totalorder %s9539_s1, %s8181_s14  ;;  %p8185_p1 = scmp.lt.u32.totalorder %s8181_s14, %s9539_s1 }
   0x9   :  { %p8187_p2 = pnand %p8185_p1, %p8182_p0 }
   0xb   :  { %8190 = shalt.err (!%p8187_p2)
}
   0xc   :  { %s8191_s19 = scalar_lea.vmem %s41_s26, 256  ;;  %p8196_p4 = scmp.lt.s32.totalorder %s41_s26, %s41_s26 }
   0xd   :  { %p8192_p3 = scmp.ne.s32.totalorder %s41_s26, %s8191_s19  ;;  %p8197_p5 = scmp.lt.s32.totalorder %s8191_s19, %s8191_s19 }
   0xf   :  { %p8198_p6 = por %p8197_p5, %p8196_p4 }
  0x11   :  { %p8199_p7 = pnand %p8198_p6, %p8192_p3 }
  0x13   :  { %8202 = shalt.err (!%p8199_p7)
}
  0x14   :  { %s8369_s20 = smov 128   ;;  %s8370_s21 = smov 8  }
  0x15   :  { %46 = dma.hbm_to_vmem [thread:$0]  %s9539_s1, 256, %s41_s26, [#allocation6], %s8369_s20, %s8369_s20, %s8370_s21  }
  0x16   :  { %s8203_s27 = scalar_lea.hbm %s9541_s3, 256 }
  0x17   :  { %p8204_p8 = scmp.ne.s32.totalorder %s9541_s3, %s8203_s27  ;;  %p8207_p9 = scmp.lt.u32.totalorder %s8203_s27, %s9541_s3 }
  0x19   :  { %p8209_p10 = pnand %p8207_p9, %p8204_p8 }
  0x1b   :  { %8212 = shalt.err (!%p8209_p10)
}
  0x1c   :  { %s8213_s16 = scalar_lea.vmem %s8457_s28, 256  ;;  %p8218_p12 = scmp.lt.s32.totalorder %s8457_s28, %s8457_s28 }
  0x1d   :  { %p8214_p11 = scmp.ne.s32.totalorder %s8457_s28, %s8213_s16  ;;  %p8219_p13 = scmp.lt.s32.totalorder %s8213_s16, %s8213_s16 }
  0x1f   :  { %p8220_p0 = por %p8219_p13, %p8218_p12 }
  0x21   :  { %p8221_p1 = pnand %p8220_p0, %p8214_p11 }
  0x23   :  { %8224 = shalt.err (!%p8221_p1)
}
  0x24   :  { %70 = dma.hbm_to_vmem [thread:$0]  %s9541_s3, 256, %s8457_s28, [#allocation9], %s8369_s20, %s8369_s20, %s8370_s21  }
  0x25   :  { %s8371_s17 = smov [#allocation11]   ;;  %s8372_s19 = smov [#allocation2]  }
  0x26   :  { %s94_s18 = sshll.u32 %s8371_s17, 4  ;;  %s28_s22 = sshll.u32 %s8372_s19, 4  ;;  %s95_s18 = int_to_ptr.vmem [resolvable:$true] %s94_s18  ;;  %s8494_s22 = int_to_ptr.vmem [resolvable:$true] %s28_s22 }
  0x27   :  { %s8225_s25 = scalar_lea.hbm %s9546_s8, 1024 }
  0x28   :  { %p8226_p2 = scmp.ne.s32.totalorder %s9546_s8, %s8225_s25  ;;  %p8229_p3 = scmp.lt.u32.totalorder %s8225_s25, %s9546_s8 }
  0x2a   :  { %p8231_p4 = pnand %p8229_p3, %p8226_p2 }
  0x2c   :  { %8234 = shalt.err (!%p8231_p4)
}
  0x2d   :  { %s8235_s3 = scalar_lea.vmem %s95_s18, 1024  ;;  %p8240_p6 = scmp.lt.s32.totalorder %s95_s18, %s95_s18 }
  0x2e   :  { %p8236_p5 = scmp.ne.s32.totalorder %s95_s18, %s8235_s3  ;;  %p8241_p7 = scmp.lt.s32.totalorder %s8235_s3, %s8235_s3 }
  0x30   :  { %p8242_p8 = por %p8241_p7, %p8240_p6 }
  0x32   :  { %p8243_p9 = pnand %p8242_p8, %p8236_p5 }
  0x34   :  { %8246 = shalt.err (!%p8243_p9)
}
  0x35   :  { %100 = dma.hbm_to_vmem [thread:$0]  %s9546_s8, 1024, %s95_s18, [#allocation12], %s8369_s20, %s8369_s20, %s8370_s21  }
  0x36   :  { %s8247_s26 = scalar_lea.hbm %s9538_s0, 256 }
  0x37   :  { %p8248_p10 = scmp.ne.s32.totalorder %s9538_s0, %s8247_s26  ;;  %p8251_p11 = scmp.lt.u32.totalorder %s8247_s26, %s9538_s0 }
  0x39   :  { %p8253_p12 = pnand %p8251_p11, %p8248_p10 }
  0x3b   :  { %8256 = shalt.err (!%p8253_p12)
}
  0x3c   :  { %s8257_s25 = scalar_lea.vmem %s8494_s22, 256  ;;  %p8262_p0 = scmp.lt.s32.totalorder %s8494_s22, %s8494_s22 }
  0x3d   :  { %p8258_p13 = scmp.ne.s32.totalorder %s8494_s22, %s8257_s25  ;;  %p8263_p1 = scmp.lt.s32.totalorder %s8257_s25, %s8257_s25 }
  0x3f   :  { %p8264_p2 = por %p8263_p1, %p8262_p0 }
  0x41   :  { %p8265_p3 = pnand %p8264_p2, %p8258_p13 }
  0x43   :  { %8268 = shalt.err (!%p8265_p3)
}
  0x44   :  { %34 = dma.hbm_to_vmem [thread:$0]  %s9538_s0, 256, %s8494_s22, [#allocation3], %s8369_s20, %s8369_s20, %s8370_s21  }
  0x45   :  { %s8373_s27 = smov [#allocation7]   ;;  %s8374_s30 = smov [#allocation10]  }
  0x46   :  { %s52_s29 = sshll.u32 %s8373_s27, 4  ;;  %s82_s14 = sshll.u32 %s8374_s30, 4  ;;  %s53_s29 = int_to_ptr.vmem [resolvable:$true] %s52_s29  ;;  %s8531_s14 = int_to_ptr.vmem [resolvable:$true] %s82_s14 }
  0x47   :  { %s8269_s15 = scalar_lea.hbm %s9540_s2, 256 }
  0x48   :  { %p8270_p4 = scmp.ne.s32.totalorder %s9540_s2, %s8269_s15  ;;  %p8273_p5 = scmp.lt.u32.totalorder %s8269_s15, %s9540_s2 }
  0x4a   :  { %p8275_p6 = pnand %p8273_p5, %p8270_p4 }
  0x4c   :  { %8278 = shalt.err (!%p8275_p6)
}
  0x4d   :  { %s8279_s0 = scalar_lea.vmem %s53_s29, 256  ;;  %p8284_p8 = scmp.lt.s32.totalorder %s53_s29, %s53_s29 }
  0x4e   :  { %p8280_p7 = scmp.ne.s32.totalorder %s53_s29, %s8279_s0  ;;  %p8285_p9 = scmp.lt.s32.totalorder %s8279_s0, %s8279_s0 }
  0x50   :  { %p8286_p10 = por %p8285_p9, %p8284_p8 }
  0x52   :  { %p8287_p11 = pnand %p8286_p10, %p8280_p7 }
  0x54   :  { %8290 = shalt.err (!%p8287_p11)
}
  0x55   :  { %58 = dma.hbm_to_vmem [thread:$0]  %s9540_s2, 256, %s53_s29, [#allocation6], %s8369_s20, %s8369_s20, %s8370_s21  }
  0x56   :  { %s8291_s25 = scalar_lea.hbm %s9545_s7, 512 }
  0x57   :  { %p8292_p12 = scmp.ne.s32.totalorder %s9545_s7, %s8291_s25  ;;  %p8295_p13 = scmp.lt.u32.totalorder %s8291_s25, %s9545_s7 }
  0x59   :  { %p8297_p0 = pnand %p8295_p13, %p8292_p12 }
  0x5b   :  { %8300 = shalt.err (!%p8297_p0)
}
  0x5c   :  { %s8301_s3 = scalar_lea.vmem %s8531_s14, 512  ;;  %p8306_p2 = scmp.lt.s32.totalorder %s8531_s14, %s8531_s14 }
  0x5d   :  { %p8302_p1 = scmp.ne.s32.totalorder %s8531_s14, %s8301_s3  ;;  %p8307_p3 = scmp.lt.s32.totalorder %s8301_s3, %s8301_s3 }
  0x5f   :  { %p8308_p4 = por %p8307_p3, %p8306_p2 }
  0x61   :  { %p8309_p5 = pnand %p8308_p4, %p8302_p1 }
  0x63   :  { %8312 = shalt.err (!%p8309_p5)
}
  0x64   :  { %88 = dma.hbm_to_vmem [thread:$0]  %s9545_s7, 512, %s8531_s14, [#allocation9], %s8369_s20, %s8369_s20, %s8370_s21  }
  0x65   :  { %s8375_s28 = smov [#allocation13]   ;;  %s8313_s26 = scalar_lea.hbm %s9547_s9, 1024 }
  0x66   :  { %s106_s15 = sshll.u32 %s8375_s28, 4  ;;  %p8314_p6 = scmp.ne.s32.totalorder %s9547_s9, %s8313_s26  ;;  %s107_s15 = int_to_ptr.vmem [resolvable:$true] %s106_s15 }
  0x67   :  { %p8317_p7 = scmp.lt.u32.totalorder %s8313_s26, %s9547_s9 }
  0x69   :  { %p8319_p8 = pnand %p8317_p7, %p8314_p6 }
  0x6b   :  { %8322 = shalt.err (!%p8319_p8)
}
  0x6c   :  { %s8323_s23 = scalar_lea.vmem %s107_s15, 1024  ;;  %p8328_p10 = scmp.lt.s32.totalorder %s107_s15, %s107_s15 }
  0x6d   :  { %p8324_p9 = scmp.ne.s32.totalorder %s107_s15, %s8323_s23  ;;  %p8329_p11 = scmp.lt.s32.totalorder %s8323_s23, %s8323_s23 }
  0x6f   :  { %p8330_p12 = por %p8329_p11, %p8328_p10 }
  0x71   :  { %p8331_p13 = pnand %p8330_p12, %p8324_p9 }
  0x73   :  { %8334 = shalt.err (!%p8331_p13)
}
  0x74   :  { %112 = dma.hbm_to_vmem [thread:$0]  %s9547_s9, 1024, %s107_s15, [#allocation12], %s8369_s20, %s8369_s20, %s8370_s21  }
  0x75   :  { %8357 = dma.done.wait [#allocation3], 256  }
  0x76   :  { %8358 = vsyncadd [#allocation3], 4294967040 }
  0x77   :  { %8359 = dma.done.wait [#allocation6], 512  }
  0x78   :  { %8360 = vsyncadd [#allocation6], 4294966784 }
  0x79   :  { %8361 = dma.done.wait [#allocation9], 768  }
  0x7a   :  { %8362 = vsyncadd [#allocation9], 4294966528 }
  0x7b   :  { %8363 = dma.done.wait [#allocation12], 2048  }
  0x7c   :  { %8364 = vsyncadd [#allocation12], 4294965248  ;;  %vm152_vm0 = vcmask 261120   ;;  %v8583_v0 = vld [vmem:[#allocation2] sm:$0xff]  ;;  %v8585_v1 = vld [vmem:[#allocation2 + $0x8] sm:$0xff]  ;;  %v8376_v50 = vmov 0.0  }
  0x7d   :  { %v234_v2 = vsel %vm152_vm0, %v8583_v0, 0.0  ;;  %v237_v3 = vsel %vm152_vm0, %v8585_v1, 0.0  ;;  %v148_v14 = vld [vmem:[#allocation10] sm:$0xff]  ;;  %v149_v15 = vld [vmem:[#allocation10 + $0x8] sm:$0xff]  ;;  %v150_v17 = vld [vmem:[#allocation10 + $0x10] sm:$0xff]  ;;  %7396 = vmatprep.subr.mxu0 %v8376_v50  ;;  %vm8377_vm5 = vmmov 0  }
  0x7e   :  { %235 = vadd.xlane.f32.xlu0 %v234_v2  ;;  %v7853_v16 = vpack.c.bf16 %v149_v15, %v148_v14  ;;  %v151_v18 = vld [vmem:[#allocation10 + $0x18] sm:$0xff]  ;;  %v142_v20 = vld [vmem:[#allocation5] sm:$0xff]  ;;  %v276_v21 = vld [vmem:[%s9542_s4] sm:$0xff]  ;;  %7398 = vmatprep.mubr.msk.f32.mxu0 %vm8377_vm5, %v8376_v50  ;;  %s8378_s2 = smov 120   ;;  %s8379_s29 = smov 112   ;;  %vm377_vm6 = vcmask 64512  }
  0x7f   :  { %v7857_v19 = vpack.c.bf16 %v151_v18, %v150_v17  ;;  %7382 = vmatprep.mubr.msk.f32.mxu1 %vm152_vm0, %v142_v20  ;;  %v277_v22 = vld [vmem:[%s9542_s4 + $0x8] sm:$0xff]  ;;  %v278_v23 = vld [vmem:[%s9542_s4 + $0x10] sm:$0xff]  ;;  %v279_v24 = vld [vmem:[%s9542_s4 + $0x18] sm:$0xff]  ;;  %s8380_s28 = smov 104   ;;  %s8381_s15 = smov 96   ;;  %vm1706_vm7 = vcmask 130048  }
  0x80   :  { %7854 = vmatprep.subr.bf16.mxu1 %v7853_v16  ;;  %v143_v25 = vld [vmem:[#allocation5 + $0x8] sm:$0xff]  ;;  %v7861_v26 = vpack.c.bf16 %v277_v22, %v276_v21  ;;  %v7865_v27 = vpack.c.bf16 %v279_v24, %v278_v23  ;;  %s8382_s16 = smov 64   ;;  %s8383_s14 = smov 16   ;;  %vm1709_vm8 = vcmask 195584  }
  0x81   :  { %7856 = vmatpush3.bf16.msra.mxu1 %v7853_v16  ;;  %s8384_s9 = smov 24  }
  0x82   :  { %238 = vadd.xlane.f32.xlu0 %v237_v3  ;;  %7858 = vmatprep.subr.bf16.mxu1 %v7857_v19 }
  0x85   :  { %7860 = vmatpush3.bf16.msra.mxu1 %v7857_v19 }
  0x86   :  { %7862 = vmatprep.subr.bf16.mxu1 %v7861_v26 }
  0x88   :  { %7383 = vmatmul.mubr.msk.f32.vlgmr.msra.gmra.mrb[0].mxu1 %vm152_vm0, %v143_v25 }
  0x89   :  { %7864 = vmatpush3.bf16.msra.mxu1 %v7861_v26 }
  0x8a   :  { %7866 = vmatprep.subr.bf16.mxu1 %v7865_v27 }
  0x8d   :  { %7868 = vmatpush3.bf16.msra.mxu1 %v7865_v27 }
  0x8e   :  { %7401 = vmatprep.subr.mxu1 %v8376_v50 }
 0x10b   :  { %v236_v4 = vpop.xlane.xlu0 %235 }
 0x10c   :  { %v241_v5 = vmul.f32 0.03125, %v236_v4 }
 0x10e   :  { %v243_v6 = vsub.f32 %v8583_v0, %v241_v5  ;;  %v144_v5 = vld [vmem:[#allocation7] sm:$0xff] }
 0x10f   :  { %v239_v7 = vpop.xlane.xlu0 %238 }
 0x110   :  { %v242_v8 = vmul.f32 0.03125, %v239_v7  ;;  %v245_v9 = vmul.f32 %v243_v6, %v243_v6 }
 0x112   :  { %v244_v10 = vsub.f32 %v8585_v1, %v242_v8  ;;  %v247_v11 = vsel %vm152_vm0, %v245_v9, 0.0 }
 0x113   :  { %248 = vadd.xlane.f32.xlu1 %v247_v11 }
 0x114   :  { %v246_v12 = vmul.f32 %v244_v10, %v244_v10 }
 0x116   :  { %v250_v13 = vsel %vm152_vm0, %v246_v12, 0.0 }
 0x117   :  { %251 = vadd.xlane.f32.xlu1 %v250_v13 }
 0x15b   :  { %v8611_v48 = vpop.f32.mrb[0].mxu1 }
 0x15c   :  { %v8613_v49 = vpop.f32.mrb[1].mxu1 }
 0x1a0   :  { %v249_v28 = vpop.xlane.xlu1 %248 }
 0x1a1   :  { %v254_v29 = vmul.f32 0.032258064, %v249_v28 }
 0x1a3   :  { %7993 = vrsqrt.f32 %v254_v29  ;;  %vm258_vm1 = vcmp.eq.f32.partialorder %v254_v29, inf  ;;  %v261_v34 = vand.u32 2147483648, %v254_v29  ;;  %vm260_vm2 = vcmp.eq.f32.partialorder %v254_v29, 0.0 }
 0x1a4   :  { %v252_v30 = vpop.xlane.xlu1 %251 }
 0x1a5   :  { %v255_v31 = vmul.f32 0.032258064, %v252_v30 }
 0x1a7   :  { %7995 = vrsqrt.f32 %v255_v31  ;;  %vm265_vm3 = vcmp.eq.f32.partialorder %v255_v31, inf  ;;  %v268_v40 = vand.u32 2147483648, %v255_v31  ;;  %vm267_vm4 = vcmp.eq.f32.partialorder %v255_v31, 0.0 }
 0x1ad   :  { %v7994_v32 = vpop.eup %7993 }
 0x1ae   :  { %v257_v33 = vmul.f32 %v7994_v32, %v254_v29 }
 0x1b0   :  { %v259_v35 = vsel %vm258_vm1, %v254_v29, %v257_v33 }
 0x1b1   :  { %v7996_v36 = vpop.eup %7995  ;;  %v262_v37 = vsel %vm260_vm2, %v261_v34, %v259_v35  ;;  %vm3506_vm2 = vcmask 523264  }
 0x1b2   :  { %v264_v38 = vmul.f32 %v7996_v36, %v255_v31  ;;  %v270_v39 = vadd.f32 1e-06, %v262_v37 }
 0x1b4   :  { %v266_v41 = vsel %vm265_vm3, %v255_v31, %v264_v38  ;;  %7997 = vrcp.f32 %v270_v39 }
 0x1b5   :  { %v269_v42 = vsel %vm267_vm4, %v268_v40, %v266_v41 }
 0x1b6   :  { %v271_v43 = vadd.f32 1e-06, %v269_v42 }
 0x1b8   :  { %7999 = vrcp.f32 %v271_v43 }
 0x1be   :  { %v7998_v44 = vpop.eup %7997 }
 0x1bf   :  { %v273_v45 = vmul.f32 %v7998_v44, %v243_v6 }
 0x1c1   :  { %7393 = vmatprep.mubr.msk.f32.mxu1 %vm152_vm0, %v273_v45 }
 0x1c2   :  { %v8000_v46 = vpop.eup %7999 }
 0x1c3   :  { %v275_v47 = vmul.f32 %v8000_v46, %v244_v10  ;;  %v145_v10 = vld [vmem:[#allocation7 + $0x8] sm:$0xff] }
 0x1c5   :  { %7394 = vmatmul.mubr.msk.f32.vlgmr.msra.gmra.mrb[2].mxu1 %vm152_vm0, %v275_v47 }
 0x1c6   :  { %7403 = vmatprep.mubr.msk.f32.mxu1 %vm8377_vm5, %v8376_v50 }
 0x298   :  { %v8621_v51 = vpop.f32.mrb[2].mxu1 }
 0x299   :  { %365 = vrot.lane.b32.xlu1 %v8621_v51, %s8378_s2  ;;  %v8625_v52 = vpop.f32.mrb[3].mxu1 }
 0x29a   :  { %363 = vrot.lane.b32.xlu0 %v8625_v52, %s8378_s2 }
 0x29d   :  { %367 = vrot.lane.b32.xlu1 %v8625_v52, %s8379_s29 }
 0x29e   :  { %371 = vrot.lane.b32.xlu0 %v8625_v52, %s8380_s28 }
 0x2a1   :  { %369 = vrot.lane.b32.xlu1 %v8621_v51, %s8379_s29 }
 0x2a2   :  { %375 = vrot.lane.b32.xlu0 %v8625_v52, %s8381_s15 }
 0x2a5   :  { %373 = vrot.lane.b32.xlu1 %v8621_v51, %s8380_s28 }
 0x2a9   :  { %452 = vrot.lane.b32.xlu1 %v8621_v51, %s8381_s15 }
 0x30b   :  { %v8641_v53 = vpop.permute.xlu1 %365 }
 0x30c   :  { %604 = vrot.lane.b32.xlu1 %v8641_v53, %s8381_s15  ;;  %v8645_v54 = vpop.permute.xlu0 %363 }
 0x30d   :  { %528 = vrot.lane.b32.xlu0 %v8645_v54, %s8381_s15 }
 0x30f   :  { %v8649_v55 = vpop.permute.xlu1 %367 }
 0x310   :  { %v8651_v56 = vpop.permute.xlu0 %371 }
 0x311   :  { %680 = vrot.lane.b32.xlu0 %v8649_v55, %s8381_s15 }
 0x313   :  { %v8655_v57 = vpop.permute.xlu1 %369 }
 0x314   :  { %756 = vrot.lane.b32.xlu1 %v8655_v57, %s8381_s15  ;;  %v376_v58 = vpop.permute.xlu0 %375 }
 0x315   :  { %832 = vrot.lane.b32.xlu0 %v8651_v56, %s8381_s15  ;;  %7397 = vmatpush3.xpose.msk.msra.mxu0 %vm377_vm6, %v376_v58 }
 0x316   :  { %7406 = vmatprep.subr.mxu0 %v8376_v50 }
 0x317   :  { %v8663_v59 = vpop.permute.xlu1 %373 }
 0x318   :  { %908 = vrot.lane.b32.xlu1 %v8663_v59, %s8381_s15  ;;  %7399 = vmatmul.mubr.msk.f32.vlgmr.msra.gmra.mrb[0].mxu0 %vm377_vm6, %v8625_v52 }
 0x319   :  { %7408 = vmatprep.mubr.msk.f32.mxu0 %vm8377_vm5, %v8376_v50 }
 0x31b   :  { %v453_v60 = vpop.permute.xlu1 %452 }
 0x31c   :  { %7402 = vmatpush3.xpose.msk.msra.mxu1 %vm377_vm6, %v453_v60 }
 0x31d   :  { %7411 = vmatprep.subr.mxu1 %v8376_v50 }
 0x31f   :  { %7404 = vmatmul.mubr.msk.f32.vlgmr.msra.gmra.mrb[4].mxu1 %vm377_vm6, %v8621_v51 }
 0x320   :  { %7413 = vmatprep.mubr.msk.f32.mxu1 %vm8377_vm5, %v8376_v50 }
 0x37e   :  { %v605_v61 = vpop.permute.xlu1 %604 }
 0x37f   :  { %7412 = vmatpush3.xpose.msk.msra.mxu1 %vm377_vm6, %v605_v61  ;;  %v529_v62 = vpop.permute.xlu0 %528 }
 0x380   :  { %7407 = vmatpush3.xpose.msk.msra.mxu0 %vm377_vm6, %v529_v62  ;;  %7421 = vmatprep.subr.mxu1 %v8376_v50 }
 0x381   :  { %7416 = vmatprep.subr.mxu0 %v8376_v50 }
 0x382   :  { %7414 = vmatmul.mubr.msk.f32.vlgmr.msra.gmra.mrb[6].mxu1 %vm377_vm6, %v8641_v53 }
 0x383   :  { %7409 = vmatmul.mubr.msk.f32.vlgmr.msra.gmra.mrb[2].mxu0 %vm377_vm6, %v8645_v54  ;;  %v681_v63 = vpop.permute.xlu0 %680  ;;  %7423 = vmatprep.mubr.msk.f32.mxu1 %vm8377_vm5, %v8376_v50 }
 0x384   :  { %7417 = vmatpush3.xpose.msk.msra.mxu0 %vm377_vm6, %v681_v63  ;;  %7418 = vmatprep.mubr.msk.f32.mxu0 %vm8377_vm5, %v8376_v50 }
 0x385   :  { %7426 = vmatprep.subr.mxu0 %v8376_v50 }
 0x386   :  { %v757_v2 = vpop.permute.xlu1 %756 }
 0x387   :  { %7419 = vmatmul.mubr.msk.f32.vlgmr.msra.gmra.mrb[4].mxu0 %vm377_vm6, %v8649_v55  ;;  %7422 = vmatpush3.xpose.msk.msra.mxu1 %vm377_vm6, %v757_v2  ;;  %v833_v3 = vpop.permute.xlu0 %832 }
 0x388   :  { %7427 = vmatpush3.xpose.msk.msra.mxu0 %vm377_vm6, %v833_v3  ;;  %7431 = vmatprep.subr.mxu1 %v8376_v50 }
 0x389   :  { %7428 = vmatprep.mubr.msk.f32.mxu0 %vm8377_vm5, %v8376_v50  ;;  %7436 = vmatprep.subr.mxu0 %v8376_v50 }
 0x38a   :  { %7424 = vmatmul.mubr.msk.f32.vlgmr.msra.gmra.mrb[8].mxu1 %vm377_vm6, %v8655_v57  ;;  %v909_v4 = vpop.permute.xlu1 %908 }
 0x38b   :  { %7429 = vmatmul.mubr.msk.f32.vlgmr.msra.gmra.mrb[6].mxu0 %vm377_vm6, %v8651_v56  ;;  %7432 = vmatpush3.xpose.msk.msra.mxu1 %vm377_vm6, %v909_v4 }
 0x38c   :  { %7433 = vmatprep.mubr.msk.f32.mxu1 %vm8377_vm5, %v8376_v50  ;;  %7441 = vmatprep.subr.mxu1 %v8376_v50 }
 0x38d   :  { %7438 = vmatprep.mubr.msk.f32.mxu0 %vm8377_vm5, %v8376_v50 }
 0x38e   :  { %7434 = vmatmul.mubr.msk.f32.vlgmr.msra.gmra.mrb[10].mxu1 %vm377_vm6, %v8663_v59 }
 0x38f   :  { %7443 = vmatprep.mubr.msk.f32.mxu1 %vm8377_vm5, %v8376_v50 }
 0x3eb   :  { %v448_v6 = vpop.f32.mrb[0].mxu0 }
 0x3ec   :  { %v449_v7 = vadd.f32 %v448_v6, %v144_v5  ;;  %v7400_v8 = vpop.f32.mrb[1].mxu0 }
 0x3ee   :  { %v984_v9 = vsel %vm377_vm6, %v449_v7, -inf }
 0x3ef   :  { %985 = vmax.xlane.f32.xlu0 %v984_v9 }
 0x3f2   :  { %v524_v11 = vpop.f32.mrb[4].mxu1 }
 0x3f3   :  { %v525_v12 = vadd.f32 %v524_v11, %v145_v10  ;;  %v7405_v13 = vpop.f32.mrb[5].mxu1 }
 0x3f5   :  { %v987_v14 = vsel %vm377_vm6, %v525_v12, -inf }
 0x3f6   :  { %988 = vmax.xlane.f32.xlu1 %v987_v14 }
 0x455   :  { %v676_v15 = vpop.f32.mrb[6].mxu1 }
 0x456   :  { %v677_v16 = vadd.f32 %v676_v15, %v145_v10  ;;  %v600_v17 = vpop.f32.mrb[2].mxu0  ;;  %v7415_v18 = vpop.f32.mrb[7].mxu1 }
 0x457   :  { %v7410_v19 = vpop.f32.mrb[3].mxu0  ;;  %v601_v20 = vadd.f32 %v600_v17, %v144_v5 }
 0x458   :  { %v993_v21 = vsel %vm377_vm6, %v677_v16, -inf }
 0x459   :  { %994 = vmax.xlane.f32.xlu0 %v993_v21  ;;  %v990_v25 = vsel %vm377_vm6, %v601_v20, -inf }
 0x45a   :  { %v752_v22 = vpop.f32.mrb[4].mxu0 }
 0x45b   :  { %v7420_v23 = vpop.f32.mrb[5].mxu0  ;;  %v753_v24 = vadd.f32 %v752_v22, %v144_v5 }
 0x45d   :  { %v828_v26 = vpop.f32.mrb[8].mxu1  ;;  %991 = vmax.xlane.f32.xlu0 %v990_v25  ;;  %v996_v33 = vsel %vm377_vm6, %v753_v24, -inf }
 0x45e   :  { %v829_v27 = vadd.f32 %v828_v26, %v145_v10  ;;  %v7425_v28 = vpop.f32.mrb[9].mxu1  ;;  %v904_v29 = vpop.f32.mrb[6].mxu0 }
 0x45f   :  { %v7430_v30 = vpop.f32.mrb[7].mxu0  ;;  %v905_v31 = vadd.f32 %v904_v29, %v144_v5 }
 0x460   :  { %v999_v32 = vsel %vm377_vm6, %v829_v27, -inf }
 0x461   :  { %1000 = vmax.xlane.f32.xlu1 %v999_v32  ;;  %v980_v34 = vpop.f32.mrb[10].mxu1  ;;  %997 = vmax.xlane.f32.xlu0 %v996_v33  ;;  %v1002_v38 = vsel %vm377_vm6, %v905_v31, -inf }
 0x462   :  { %v981_v35 = vadd.f32 %v980_v34, %v145_v10  ;;  %v7435_v36 = vpop.f32.mrb[11].mxu1 }
 0x464   :  { %v1005_v37 = vsel %vm377_vm6, %v981_v35, -inf }
 0x465   :  { %1006 = vmax.xlane.f32.xlu1 %v1005_v37  ;;  %1003 = vmax.xlane.f32.xlu0 %v1002_v38 }
 0x476   :  { %1148 = vrot.lane.b32.xlu1 %v8621_v51, %s8382_s16 }
 0x47a   :  { %1224 = vrot.lane.b32.xlu1 %v8645_v54, %s8382_s16 }
 0x47b   :  { %1072 = vrot.lane.b32.xlu0 %v8625_v52, %s8382_s16 }
 0x47c   :  { %v986_v39 = vpop.xlane.xlu0 %985 }
 0x47d   :  { %v1008_v40 = vsub.f32 %v449_v7, %v986_v39 }
 0x47e   :  { %1300 = vrot.lane.b32.xlu1 %v8641_v53, %s8382_s16 }
 0x47f   :  { %1376 = vrot.lane.b32.xlu0 %v8649_v55, %s8382_s16  ;;  %v1016_v41 = vmul.f32 1.442695, %v1008_v40 }
 0x481   :  { %8001 = vpow2.f32 %v1016_v41 }
 0x482   :  { %1452 = vrot.lane.b32.xlu1 %v8655_v57, %s8382_s16 }
 0x483   :  { %v989_v42 = vpop.xlane.xlu1 %988 }
 0x484   :  { %v1009_v43 = vsub.f32 %v525_v12, %v989_v42 }
 0x486   :  { %v1018_v44 = vmul.f32 1.442695, %v1009_v43 }
 0x488   :  { %8003 = vpow2.f32 %v1018_v44 }
 0x48b   :  { %v8733_v45 = vpop.eup %8001 }
 0x48c   :  { %v1032_v46 = vsel %vm377_vm6, %v8733_v45, 0.0 }
 0x492   :  { %v8737_v47 = vpop.eup %8003 }
 0x493   :  { %v1035_v51 = vsel %vm377_vm6, %v8737_v47, 0.0 }
 0x49e   :  { %1033 = vadd.xlane.f32.xlu0 %v1032_v46 }
 0x4a6   :  { %1036 = vadd.xlane.f32.xlu1 %v1035_v51 }
 0x4e6   :  { %v995_v52 = vpop.xlane.xlu0 %994 }
 0x4e7   :  { %v1011_v53 = vsub.f32 %v677_v16, %v995_v52 }
 0x4e9   :  { %v1022_v54 = vmul.f32 1.442695, %v1011_v53 }
 0x4ea   :  { %v992_v55 = vpop.xlane.xlu0 %991 }
 0x4eb   :  { %8005 = vpow2.f32 %v1022_v54  ;;  %v1010_v57 = vsub.f32 %v601_v20, %v992_v55 }
 0x4ed   :  { %v1020_v58 = vmul.f32 1.442695, %v1010_v57 }
 0x4ee   :  { %v1001_v60 = vpop.xlane.xlu1 %1000  ;;  %v998_v61 = vpop.xlane.xlu0 %997 }
 0x4ef   :  { %8007 = vpow2.f32 %v1020_v58  ;;  %v1013_v62 = vsub.f32 %v829_v27, %v1001_v60  ;;  %v1012_v63 = vsub.f32 %v753_v24, %v998_v61  ;;  %v1712_v61 = vld [vmem:[%s9543_s5] sm:$0xff] }
 0x4f1   :  { %v1026_v2 = vmul.f32 1.442695, %v1013_v62  ;;  %v1024_v3 = vmul.f32 1.442695, %v1012_v63  ;;  %v1713_v62 = vld [vmem:[%s9543_s5 + $0x8] sm:$0xff] }
 0x4f2   :  { %v1007_v4 = vpop.xlane.xlu1 %1006  ;;  %v1004_v5 = vpop.xlane.xlu0 %1003  ;;  %v7869_v63 = vpack.c.bf16 %v1713_v62, %v1712_v61 }
 0x4f3   :  { %8009 = vpow2.f32 %v1026_v2  ;;  %v1015_v6 = vsub.f32 %v981_v35, %v1007_v4  ;;  %v1014_v7 = vsub.f32 %v905_v31, %v1004_v5  ;;  %v1714_v2 = vld [vmem:[%s9543_s5 + $0x10] sm:$0xff] }
 0x4f4   :  { %8011 = vpow2.f32 %v1024_v3  ;;  %v1715_v3 = vld [vmem:[%s9543_s5 + $0x18] sm:$0xff] }
 0x4f5   :  { %v8006_v8 = vpop.eup %8005  ;;  %v1030_v9 = vmul.f32 1.442695, %v1015_v6  ;;  %v1028_v10 = vmul.f32 1.442695, %v1014_v7  ;;  %v7873_v4 = vpack.c.bf16 %v1715_v3, %v1714_v2 }
 0x4f6   :  { %v1149_v11 = vpop.permute.xlu1 %1148  ;;  %v1073_v12 = vpop.permute.xlu0 %1072  ;;  %v1041_v13 = vsel %vm377_vm6, %v8006_v8, 0.0 }
 0x4f7   :  { %8013 = vpow2.f32 %v1030_v9  ;;  %7442 = vmatpush3.msra.mxu1 %v1149_v11  ;;  %1042 = vadd.xlane.f32.xlu1 %v1041_v13 }
 0x4f8   :  { %8015 = vpow2.f32 %v1028_v10  ;;  %7437 = vmatpush3.msra.mxu0 %v1073_v12  ;;  %7451 = vmatprep.subr.mxu1 %v8376_v50 }
 0x4f9   :  { %v8008_v14 = vpop.eup %8007  ;;  %7446 = vmatprep.subr.mxu0 %v8376_v50 }
 0x4fa   :  { %v1038_v15 = vsel %vm377_vm6, %v8008_v14, 0.0  ;;  %v1225_v24 = vpop.permute.xlu1 %1224  ;;  %v1377_v25 = vpop.permute.xlu0 %1376 }
 0x4fb   :  { %1039 = vadd.xlane.f32.xlu0 %v1038_v15 }
 0x4fd   :  { %v8010_v16 = vpop.eup %8009 }
 0x4fe   :  { %v8012_v17 = vpop.eup %8011  ;;  %v1047_v18 = vsel %vm377_vm6, %v8010_v16, 0.0  ;;  %v1301_v26 = vpop.permute.xlu1 %1300 }
 0x4ff   :  { %1048 = vadd.xlane.f32.xlu1 %v1047_v18  ;;  %v1044_v19 = vsel %vm377_vm6, %v8012_v17, 0.0 }
 0x500   :  { %1045 = vadd.xlane.f32.xlu0 %v1044_v19 }
 0x501   :  { %v8747_v20 = vpop.eup %8013 }
 0x502   :  { %v8749_v21 = vpop.eup %8015  ;;  %v1053_v22 = vsel %vm377_vm6, %v8747_v20, 0.0  ;;  %v1453_v28 = vpop.permute.xlu1 %1452 }
 0x503   :  { %1054 = vadd.xlane.f32.xlu1 %v1053_v22  ;;  %v1050_v23 = vsel %vm377_vm6, %v8749_v21, 0.0 }
 0x504   :  { %1051 = vadd.xlane.f32.xlu0 %v1050_v23 }
 0x514   :  { %1604 = vrot.lane.b32.xlu1 %v8663_v59, %s8382_s16 }
 0x51a   :  { %1528 = vrot.lane.b32.xlu0 %v8651_v56, %s8382_s16 }
 0x52b   :  { %v1034_v27 = vpop.xlane.xlu0 %1033 }
 0x52c   :  { %8017 = vrcp.f32 %v1034_v27 }
 0x533   :  { %v1037_v29 = vpop.xlane.xlu1 %1036 }
 0x534   :  { %8019 = vrcp.f32 %v1037_v29 }
 0x536   :  { %v8018_v30 = vpop.eup %8017 }
 0x537   :  { %v1064_v31 = vmul.f32 %v8018_v30, %v8733_v45 }
 0x539   :  { %7439 = vmatmul.mubr.msk.f32.vlgmr.msra.gmra.mrb[8].mxu0 %vm377_vm6, %v1064_v31 }
 0x53a   :  { %7447 = vmatpush3.msra.mxu0 %v1225_v24  ;;  %7448 = vmatprep.mubr.msk.f32.mxu0 %vm8377_vm5, %v8376_v50 }
 0x53b   :  { %7456 = vmatprep.subr.mxu0 %v8376_v50 }
 0x53e   :  { %v8020_v56 = vpop.eup %8019 }
 0x53f   :  { %v1065_v59 = vmul.f32 %v8020_v56, %v8737_v47 }
 0x541   :  { %7444 = vmatmul.mubr.msk.f32.vlgmr.msra.gmra.mrb[12].mxu1 %vm377_vm6, %v1065_v59 }
 0x542   :  { %7452 = vmatpush3.msra.mxu1 %v1301_v26  ;;  %7453 = vmatprep.mubr.msk.f32.mxu1 %vm8377_vm5, %v8376_v50 }
 0x543   :  { %7461 = vmatprep.subr.mxu1 %v8376_v50 }
 0x584   :  { %v1043_v32 = vpop.xlane.xlu1 %1042 }
 0x585   :  { %8021 = vrcp.f32 %v1043_v32 }
 0x588   :  { %v1040_v33 = vpop.xlane.xlu0 %1039 }
 0x589   :  { %8023 = vrcp.f32 %v1040_v33 }
 0x58c   :  { %v1049_v34 = vpop.xlane.xlu1 %1048 }
 0x58d   :  { %8025 = vrcp.f32 %v1049_v34  ;;  %v1046_v35 = vpop.xlane.xlu0 %1045 }
 0x58e   :  { %8027 = vrcp.f32 %v1046_v35 }
 0x58f   :  { %v8022_v36 = vpop.eup %8021 }
 0x590   :  { %v1055_v37 = vpop.xlane.xlu1 %1054  ;;  %v1067_v38 = vmul.f32 %v8022_v36, %v8006_v8 }
 0x591   :  { %8029 = vrcp.f32 %v1055_v37  ;;  %v1052_v39 = vpop.xlane.xlu0 %1051 }
 0x592   :  { %8031 = vrcp.f32 %v1052_v39  ;;  %7454 = vmatmul.mubr.msk.f32.vlgmr.msra.gmra.mrb[14].mxu1 %vm377_vm6, %v1067_v38 }
 0x593   :  { %v8024_v40 = vpop.eup %8023  ;;  %7462 = vmatpush3.msra.mxu1 %v1453_v28  ;;  %7463 = vmatprep.mubr.msk.f32.mxu1 %vm8377_vm5, %v8376_v50 }
 0x594   :  { %v1066_v41 = vmul.f32 %v8024_v40, %v8008_v14  ;;  %7471 = vmatprep.subr.mxu1 %v8376_v50  ;;  %v1605_v46 = vpop.permute.xlu1 %1604 }
 0x595   :  { %v1529_v51 = vpop.permute.xlu0 %1528 }
 0x596   :  { %7449 = vmatmul.mubr.msk.f32.vlgmr.msra.gmra.mrb[10].mxu0 %vm377_vm6, %v1066_v41  ;;  %v1839_v41 = vld [vmem:[%s9544_s6] sm:$0xff] }
 0x597   :  { %v8026_v42 = vpop.eup %8025  ;;  %7457 = vmatpush3.msra.mxu0 %v1377_v25  ;;  %7458 = vmatprep.mubr.msk.f32.mxu0 %vm8377_vm5, %v8376_v50 }
 0x598   :  { %v8028_v43 = vpop.eup %8027  ;;  %7466 = vmatprep.subr.mxu0 %v8376_v50  ;;  %v1069_v44 = vmul.f32 %v8026_v42, %v8010_v16  ;;  %v1840_v42 = vld [vmem:[%s9544_s6 + $0x8] sm:$0xff] }
 0x599   :  { %v1068_v45 = vmul.f32 %v8028_v43, %v8012_v17  ;;  %v7877_v43 = vpack.c.bf16 %v1840_v42, %v1839_v41 }
 0x59a   :  { %7464 = vmatmul.mubr.msk.f32.vlgmr.msra.gmra.mrb[16].mxu1 %vm377_vm6, %v1069_v44  ;;  %v1841_v44 = vld [vmem:[%s9544_s6 + $0x10] sm:$0xff] }
 0x59b   :  { %v8030_v47 = vpop.eup %8029  ;;  %7459 = vmatmul.mubr.msk.f32.vlgmr.msra.gmra.mrb[12].mxu0 %vm377_vm6, %v1068_v45  ;;  %7472 = vmatpush3.msra.mxu1 %v1605_v46  ;;  %v1842_v45 = vld [vmem:[%s9544_s6 + $0x18] sm:$0xff] }
 0x59c   :  { %v8032_v52 = vpop.eup %8031  ;;  %7467 = vmatpush3.msra.mxu0 %v1529_v51  ;;  %7468 = vmatprep.mubr.msk.f32.mxu0 %vm8377_vm5, %v8376_v50  ;;  %v1071_v53 = vmul.f32 %v8030_v47, %v8747_v20  ;;  %v7881_v46 = vpack.c.bf16 %v1842_v45, %v1841_v44 }
 0x59d   :  { %7473 = vmatprep.mubr.msk.f32.mxu1 %vm8377_vm5, %v8376_v50  ;;  %v1070_v54 = vmul.f32 %v8032_v52, %v8749_v21  ;;  %7870 = vmatprep.subr.bf16.mxu0 %v7869_v63 }
 0x59e   :  { %7474 = vmatmul.mubr.msk.f32.vlgmr.msra.gmra.mrb[18].mxu1 %vm377_vm6, %v1071_v53  ;;  %7878 = vmatprep.subr.bf16.mxu1 %v7877_v43 }
 0x59f   :  { %7469 = vmatmul.mubr.msk.f32.vlgmr.msra.gmra.mrb[14].mxu0 %vm377_vm6, %v1070_v54  ;;  %7880 = vmatpush3.bf16.msra.mxu1 %v7877_v43 }
 0x5a0   :  { %7872 = vmatpush3.bf16.msra.mxu0 %v7869_v63  ;;  %7882 = vmatprep.subr.bf16.mxu1 %v7881_v46 }
 0x5a1   :  { %7874 = vmatprep.subr.bf16.mxu0 %v7873_v4 }
 0x5a3   :  { %7884 = vmatpush3.bf16.msra.mxu1 %v7881_v46 }
 0x5a4   :  { %7876 = vmatpush3.bf16.msra.mxu0 %v7873_v4  ;;  %7503 = vmatprep.subr.mxu1 %v8376_v50 }
 0x5a5   :  { %7498 = vmatprep.subr.mxu0 %v8376_v50 }
 0x60c   :  { %v1144_v55 = vpop.f32.mrb[8].mxu0 }
 0x60d   :  { %v7440_v57 = vpop.f32.mrb[9].mxu0 }
 0x614   :  { %v1220_v58 = vpop.f32.mrb[12].mxu1 }
 0x615   :  { %v7445_v60 = vpop.f32.mrb[13].mxu1 }
 0x665   :  { %v1372_v5 = vpop.f32.mrb[14].mxu1 }
 0x666   :  { %1684 = vrot.lane.b32.xlu1 %v1372_v5, %s8370_s21  ;;  %v7455_v6 = vpop.f32.mrb[15].mxu1 }
 0x669   :  { %v1296_v7 = vpop.f32.mrb[10].mxu0 }
 0x66a   :  { %1682 = vrot.lane.b32.xlu0 %v1296_v7, %s8370_s21  ;;  %v7450_v8 = vpop.f32.mrb[11].mxu0 }
 0x66d   :  { %v1524_v9 = vpop.f32.mrb[16].mxu1 }
 0x66e   :  { %v1448_v10 = vpop.f32.mrb[12].mxu0  ;;  %1692 = vrot.lane.b32.xlu1 %v1524_v9, %s8383_s14  ;;  %v7465_v11 = vpop.f32.mrb[17].mxu1 }
 0x66f   :  { %1690 = vrot.lane.b32.xlu0 %v1448_v10, %s8383_s14  ;;  %v7460_v12 = vpop.f32.mrb[13].mxu0 }
 0x671   :  { %v1676_v13 = vpop.f32.mrb[18].mxu1 }
 0x672   :  { %v1600_v14 = vpop.f32.mrb[14].mxu0  ;;  %1700 = vrot.lane.b32.xlu1 %v1676_v13, %s8384_s9  ;;  %v7475_v15 = vpop.f32.mrb[19].mxu1 }
 0x673   :  { %1698 = vrot.lane.b32.xlu0 %v1600_v14, %s8384_s9  ;;  %v7470_v16 = vpop.f32.mrb[15].mxu0 }
 0x6d8   :  { %v1685_v17 = vpop.permute.xlu1 %1684 }
 0x6d9   :  { %v1705_v21 = vsel %vm377_vm6, %v1220_v58, %v1685_v17 }
 0x6dc   :  { %v1683_v18 = vpop.permute.xlu0 %1682 }
 0x6dd   :  { %v1704_v22 = vsel %vm377_vm6, %v1144_v55, %v1683_v18 }
 0x6e0   :  { %v1693_v19 = vpop.permute.xlu1 %1692 }
 0x6e1   :  { %v1691_v20 = vpop.permute.xlu0 %1690  ;;  %v1708_v23 = vsel %vm1706_vm7, %v1705_v21, %v1693_v19 }
 0x6e2   :  { %v1707_v25 = vsel %vm1706_vm7, %v1704_v22, %v1691_v20 }
 0x6e4   :  { %v1701_v24 = vpop.permute.xlu1 %1700 }
 0x6e5   :  { %v1711_v26 = vsel %vm1709_vm8, %v1708_v23, %v1701_v24  ;;  %v1699_v27 = vpop.permute.xlu0 %1698  ;;  %v147_v24 = vld [vmem:[#allocation8 + $0x8] sm:$0xff] }
 0x6e6   :  { %v1710_v28 = vsel %vm1709_vm8, %v1707_v25, %v1699_v27 }
 0x6e7   :  { %7484 = vmatprep.mubr.msk.f32.mxu0 %vm152_vm0, %v1710_v28 }
 0x6e8   :  { %7485 = vmatmul.mubr.msk.f32.vlgmr.msra.gmra.mrb[16].mxu0 %vm152_vm0, %v1711_v26  ;;  %v146_v26 = vld [vmem:[#allocation8] sm:$0xff] }
 0x6e9   :  { %7499 = vmatpush3.xpose.msk.msra.mxu0 %vm377_vm6, %v8613_v49  ;;  %7500 = vmatprep.mubr.msk.f32.mxu0 %vm8377_vm5, %v8376_v50 }
 0x6ea   :  { %7508 = vmatprep.subr.mxu0 %v8376_v50 }
 0x7bb   :  { %v7486_v29 = vpop.f32.mrb[16].mxu0 }
 0x7bc   :  { %v8820_v30 = vadd.f32 %v7486_v29, %v8585_v1  ;;  %v1788_v31 = vpop.f32.mrb[17].mxu0 }
 0x7bd   :  { %v8823_v56 = vadd.f32 %v1788_v31, %v8583_v0 }
 0x7be   :  { %v1802_v59 = vsel %vm152_vm0, %v8820_v30, 0.0 }
 0x7bf   :  { %1803 = vadd.xlane.f32.xlu1 %v1802_v59  ;;  %v1799_v32 = vsel %vm152_vm0, %v8823_v56, 0.0 }
 0x7c0   :  { %1800 = vadd.xlane.f32.xlu0 %v1799_v32 }
 0x7d0   :  { %1942 = vrot.lane.b32.xlu1 %v8611_v48, %s8378_s2 }
 0x7d4   :  { %1946 = vrot.lane.b32.xlu1 %v8611_v48, %s8379_s29 }
 0x84c   :  { %v1804_v1 = vpop.xlane.xlu1 %1803 }
 0x84d   :  { %v1806_v33 = vmul.f32 0.03125, %v1804_v1  ;;  %v1801_v34 = vpop.xlane.xlu0 %1800 }
 0x84e   :  { %v1805_v35 = vmul.f32 0.03125, %v1801_v34 }
 0x84f   :  { %v1808_v0 = vsub.f32 %v8820_v30, %v1806_v33 }
 0x850   :  { %v1807_v36 = vsub.f32 %v8823_v56, %v1805_v35  ;;  %v8863_v11 = vpop.permute.xlu1 %1942 }
 0x851   :  { %v1810_v39 = vmul.f32 %v1808_v0, %v1808_v0 }
 0x852   :  { %v1809_v37 = vmul.f32 %v1807_v36, %v1807_v36 }
 0x853   :  { %v1814_v40 = vsel %vm152_vm0, %v1810_v39, 0.0 }
 0x854   :  { %v1811_v38 = vsel %vm152_vm0, %v1809_v37, 0.0  ;;  %v8887_v14 = vpop.permute.xlu1 %1946 }
 0x855   :  { %1812 = vadd.xlane.f32.xlu0 %v1811_v38 }
 0x859   :  { %1815 = vadd.xlane.f32.xlu0 %v1814_v40 }
 0x86f   :  { %1940 = vrot.lane.b32.xlu0 %v8613_v49, %s8378_s2 }
 0x873   :  { %1944 = vrot.lane.b32.xlu0 %v8613_v49, %s8379_s29 }
 0x877   :  { %1948 = vrot.lane.b32.xlu0 %v8613_v49, %s8380_s28 }
 0x8e2   :  { %v1813_v47 = vpop.xlane.xlu0 %1812 }
 0x8e3   :  { %v1817_v51 = vmul.f32 0.032258064, %v1813_v47 }
 0x8e5   :  { %8033 = vrsqrt.f32 %v1817_v51  ;;  %vm1821_vm9 = vcmp.eq.f32.partialorder %v1817_v51, inf  ;;  %v1824_v57 = vand.u32 2147483648, %v1817_v51  ;;  %vm1823_vm10 = vcmp.eq.f32.partialorder %v1817_v51, 0.0 }
 0x8e6   :  { %v1816_v52 = vpop.xlane.xlu0 %1815 }
 0x8e7   :  { %v1818_v53 = vmul.f32 0.032258064, %v1816_v52 }
 0x8e9   :  { %8035 = vrsqrt.f32 %v1818_v53  ;;  %vm1828_vm11 = vcmp.eq.f32.partialorder %v1818_v53, inf  ;;  %v1831_v2 = vand.u32 2147483648, %v1818_v53  ;;  %vm1830_vm12 = vcmp.eq.f32.partialorder %v1818_v53, 0.0 }
 0x8ea   :  { %v8870_v13 = vpop.permute.xlu0 %1940 }
 0x8ee   :  { %v8889_v15 = vpop.permute.xlu0 %1944 }
 0x8ef   :  { %v8034_v54 = vpop.eup %8033 }
 0x8f0   :  { %v1820_v55 = vmul.f32 %v8034_v54, %v1817_v51 }
 0x8f2   :  { %v1822_v58 = vsel %vm1821_vm9, %v1817_v51, %v1820_v55  ;;  %v8892_v17 = vpop.permute.xlu0 %1948 }
 0x8f3   :  { %v8036_v60 = vpop.eup %8035  ;;  %v1825_v61 = vsel %vm1823_vm10, %v1824_v57, %v1822_v58 }
 0x8f4   :  { %v1827_v62 = vmul.f32 %v8036_v60, %v1818_v53  ;;  %v1833_v63 = vadd.f32 1e-06, %v1825_v61 }
 0x8f6   :  { %v1829_v3 = vsel %vm1828_vm11, %v1818_v53, %v1827_v62  ;;  %8037 = vrcp.f32 %v1833_v63 }
 0x8f7   :  { %v1832_v4 = vsel %vm1830_vm12, %v1831_v2, %v1829_v3 }
 0x8f8   :  { %v1834_v5 = vadd.f32 1e-06, %v1832_v4 }
 0x8fa   :  { %8039 = vrcp.f32 %v1834_v5 }
 0x900   :  { %v8038_v6 = vpop.eup %8037 }
 0x901   :  { %v1836_v7 = vmul.f32 %v8038_v6, %v1807_v36 }
 0x903   :  { %7495 = vmatprep.mubr.msk.f32.mxu1 %vm152_vm0, %v1836_v7 }
 0x904   :  { %v8040_v8 = vpop.eup %8039 }
 0x905   :  { %v1838_v9 = vmul.f32 %v8040_v8, %v1808_v0 }
 0x907   :  { %7496 = vmatmul.mubr.msk.f32.vlgmr.msra.gmra.mrb[20].mxu1 %vm152_vm0, %v1838_v9 }
 0x908   :  { %7504 = vmatpush3.xpose.msk.msra.mxu1 %vm377_vm6, %v8611_v48  ;;  %7505 = vmatprep.mubr.msk.f32.mxu1 %vm8377_vm5, %v8376_v50 }
 0x909   :  { %7513 = vmatprep.subr.mxu1 %v8376_v50 }
 0x9da   :  { %v7497_v10 = vpop.f32.mrb[20].mxu1 }
 0x9db   :  { %1928 = vrot.lane.b32.xlu1 %v7497_v10, %s8378_s2  ;;  %v1915_v12 = vpop.f32.mrb[21].mxu1  ;;  %7506 = vmatmul.mubr.msk.f32.vlgmr.msra.gmra.mrb[22].mxu1 %vm377_vm6, %v7497_v10 }
 0x9dc   :  { %7514 = vmatpush3.xpose.msk.msra.mxu1 %vm377_vm6, %v8863_v11  ;;  %1930 = vrot.lane.b32.xlu0 %v1915_v12, %s8379_s29 }
 0x9dd   :  { %7501 = vmatmul.mubr.msk.f32.vlgmr.msra.gmra.mrb[18].mxu0 %vm377_vm6, %v1915_v12  ;;  %7515 = vmatprep.mubr.msk.f32.mxu1 %vm8377_vm5, %v8376_v50 }
 0x9de   :  { %7509 = vmatpush3.xpose.msk.msra.mxu0 %vm377_vm6, %v8870_v13  ;;  %7523 = vmatprep.subr.mxu1 %v8376_v50 }
 0x9df   :  { %1926 = vrot.lane.b32.xlu1 %v1915_v12, %s8378_s2  ;;  %7510 = vmatprep.mubr.msk.f32.mxu0 %vm8377_vm5, %v8376_v50 }
 0x9e0   :  { %1934 = vrot.lane.b32.xlu0 %v1915_v12, %s8380_s28  ;;  %7518 = vmatprep.subr.mxu0 %v8376_v50 }
 0x9e3   :  { %1932 = vrot.lane.b32.xlu1 %v7497_v10, %s8379_s29 }
 0x9e7   :  { %1950 = vrot.lane.b32.xlu1 %v8611_v48, %s8380_s28 }
 0x9eb   :  { %1936 = vrot.lane.b32.xlu1 %v7497_v10, %s8380_s28 }
 0xa4d   :  { %v1929_v16 = vpop.permute.xlu1 %1928 }
 0xa4e   :  { %7516 = vmatmul.mubr.msk.f32.vlgmr.msra.gmra.mrb[24].mxu1 %vm377_vm6, %v1929_v16  ;;  %v1931_v19 = vpop.permute.xlu0 %1930 }
 0xa4f   :  { %7524 = vmatpush3.xpose.msk.msra.mxu1 %vm377_vm6, %v8887_v14  ;;  %7525 = vmatprep.mubr.msk.f32.mxu1 %vm8377_vm5, %v8376_v50 }
 0xa50   :  { %7533 = vmatprep.subr.mxu1 %v8376_v50 }
 0xa51   :  { %v1927_v18 = vpop.permute.xlu1 %1926 }
 0xa52   :  { %7511 = vmatmul.mubr.msk.f32.vlgmr.msra.gmra.mrb[20].mxu0 %vm377_vm6, %v1927_v18  ;;  %v1935_v21 = vpop.permute.xlu0 %1934 }
 0xa53   :  { %7519 = vmatpush3.xpose.msk.msra.mxu0 %vm377_vm6, %v8889_v15  ;;  %7520 = vmatprep.mubr.msk.f32.mxu0 %vm8377_vm5, %v8376_v50 }
 0xa54   :  { %7528 = vmatprep.subr.mxu0 %v8376_v50 }
 0xa55   :  { %v1933_v20 = vpop.permute.xlu1 %1932 }
 0xa56   :  { %7521 = vmatmul.mubr.msk.f32.vlgmr.msra.gmra.mrb[22].mxu0 %vm377_vm6, %v1931_v19  ;;  %7526 = vmatmul.mubr.msk.f32.vlgmr.msra.gmra.mrb[26].mxu1 %vm377_vm6, %v1933_v20 }
 0xa57   :  { %7529 = vmatpush3.xpose.msk.msra.mxu0 %vm377_vm6, %v8892_v17  ;;  %7530 = vmatprep.mubr.msk.f32.mxu0 %vm8377_vm5, %v8376_v50 }
 0xa58   :  { %7535 = vmatprep.mubr.msk.f32.mxu1 %vm8377_vm5, %v8376_v50  ;;  %7538 = vmatprep.subr.mxu0 %v8376_v50 }
 0xa59   :  { %v8914_v22 = vpop.permute.xlu1 %1950 }
 0xa5a   :  { %7531 = vmatmul.mubr.msk.f32.vlgmr.msra.gmra.mrb[24].mxu0 %vm377_vm6, %v1935_v21  ;;  %7534 = vmatpush3.xpose.msk.msra.mxu1 %vm377_vm6, %v8914_v22 }
 0xa5b   :  { %7543 = vmatprep.subr.mxu1 %v8376_v50  ;;  %7540 = vmatprep.mubr.msk.f32.mxu0 %vm8377_vm5, %v8376_v50 }
 0xa5d   :  { %v1937_v23 = vpop.permute.xlu1 %1936 }
 0xa5e   :  { %7536 = vmatmul.mubr.msk.f32.vlgmr.msra.gmra.mrb[28].mxu1 %vm377_vm6, %v1937_v23 }
 0xa5f   :  { %7545 = vmatprep.mubr.msk.f32.mxu1 %vm8377_vm5, %v8376_v50 }
 0xaae   :  { %v2096_v25 = vpop.f32.mrb[22].mxu1 }
 0xaaf   :  { %v2097_v27 = vadd.f32 %v2096_v25, %v147_v24  ;;  %v7507_v28 = vpop.f32.mrb[23].mxu1 }
 0xab0   :  { %v2022_v29 = vpop.f32.mrb[18].mxu0 }
 0xab1   :  { %v2023_v31 = vadd.f32 %v2022_v29, %v146_v26  ;;  %v7502_v59 = vpop.f32.mrb[19].mxu0  ;;  %v2547_v32 = vsel %vm377_vm6, %v2097_v27, -inf }
 0xab2   :  { %2548 = vmax.xlane.f32.xlu1 %v2547_v32 }
 0xab3   :  { %v2544_v1 = vsel %vm377_vm6, %v2023_v31, -inf }
 0xab4   :  { %2545 = vmax.xlane.f32.xlu0 %v2544_v1 }
 0xb21   :  { %v2244_v33 = vpop.f32.mrb[24].mxu1 }
 0xb22   :  { %v2245_v34 = vadd.f32 %v2244_v33, %v147_v24  ;;  %v7517_v35 = vpop.f32.mrb[25].mxu1 }
 0xb24   :  { %v2553_v0 = vsel %vm377_vm6, %v2245_v34, -inf }
 0xb25   :  { %2554 = vmax.xlane.f32.xlu0 %v2553_v0  ;;  %v2170_v36 = vpop.f32.mrb[20].mxu0 }
 0xb26   :  { %v2171_v37 = vadd.f32 %v2170_v36, %v146_v26  ;;  %v7512_v38 = vpop.f32.mrb[21].mxu0 }
 0xb28   :  { %v2550_v39 = vsel %vm377_vm6, %v2171_v37, -inf }
 0xb29   :  { %v2392_v40 = vpop.f32.mrb[26].mxu1  ;;  %2551 = vmax.xlane.f32.xlu0 %v2550_v39  ;;  %v2318_v41 = vpop.f32.mrb[22].mxu0 }
 0xb2a   :  { %v2393_v42 = vadd.f32 %v2392_v40, %v147_v24  ;;  %v2319_v43 = vadd.f32 %v2318_v41, %v146_v26  ;;  %v7522_v44 = vpop.f32.mrb[23].mxu0  ;;  %v7527_v45 = vpop.f32.mrb[27].mxu1 }
 0xb2c   :  { %v2559_v46 = vsel %vm377_vm6, %v2393_v42, -inf  ;;  %v2556_v47 = vsel %vm377_vm6, %v2319_v43, -inf }
 0xb2d   :  { %2560 = vmax.xlane.f32.xlu1 %v2559_v46  ;;  %2557 = vmax.xlane.f32.xlu0 %v2556_v47  ;;  %v2466_v51 = vpop.f32.mrb[24].mxu0 }
 0xb2e   :  { %v2467_v52 = vadd.f32 %v2466_v51, %v146_v26  ;;  %v7532_v53 = vpop.f32.mrb[25].mxu0 }
 0xb30   :  { %v2562_v54 = vsel %vm377_vm6, %v2467_v52, -inf }
 0xb31   :  { %v2540_v55 = vpop.f32.mrb[28].mxu1  ;;  %2563 = vmax.xlane.f32.xlu0 %v2562_v54 }
 0xb32   :  { %v2541_v57 = vadd.f32 %v2540_v55, %v147_v24  ;;  %v7537_v58 = vpop.f32.mrb[29].mxu1 }
 0xb34   :  { %v2565_v60 = vsel %vm377_vm6, %v2541_v57, -inf }
 0xb35   :  { %2566 = vmax.xlane.f32.xlu1 %v2565_v60 }
 0xb3f   :  { %v2549_v2 = vpop.xlane.xlu1 %2548 }
 0xb40   :  { %v2569_v3 = vsub.f32 %v2097_v27, %v2549_v2 }
 0xb41   :  { %v2546_v61 = vpop.xlane.xlu0 %2545 }
 0xb42   :  { %v2568_v62 = vsub.f32 %v2023_v31, %v2546_v61  ;;  %v2578_v4 = vmul.f32 1.442695, %v2569_v3 }
 0xb44   :  { %v2576_v63 = vmul.f32 1.442695, %v2568_v62 }
 0xb46   :  { %2708 = vrot.lane.b32.xlu1 %v8611_v48, %s8381_s15  ;;  %8041 = vpow2.f32 %v2576_v63 }
 0xb47   :  { %2632 = vrot.lane.b32.xlu0 %v8613_v49, %s8381_s15  ;;  %8043 = vpow2.f32 %v2578_v4 }
 0xb4a   :  { %2784 = vrot.lane.b32.xlu1 %v8870_v13, %s8381_s15 }
 0xb4b   :  { %2936 = vrot.lane.b32.xlu0 %v8889_v15, %s8381_s15 }
 0xb4e   :  { %2860 = vrot.lane.b32.xlu1 %v8863_v11, %s8381_s15 }
 0xb50   :  { %v8945_v5 = vpop.eup %8041 }
 0xb51   :  { %v2592_v6 = vsel %vm377_vm6, %v8945_v5, 0.0  ;;  %v8949_v7 = vpop.eup %8043 }
 0xb52   :  { %3012 = vrot.lane.b32.xlu1 %v8887_v14, %s8381_s15  ;;  %v2595_v8 = vsel %vm377_vm6, %v8949_v7, 0.0 }
 0xb6a   :  { %2593 = vadd.xlane.f32.xlu0 %v2592_v6 }
 0xb76   :  { %2596 = vadd.xlane.f32.xlu1 %v2595_v8 }
 0xbb2   :  { %v2555_v9 = vpop.xlane.xlu0 %2554 }
 0xbb3   :  { %v2571_v10 = vsub.f32 %v2245_v34, %v2555_v9 }
 0xbb5   :  { %v2582_v12 = vmul.f32 1.442695, %v2571_v10 }
 0xbb6   :  { %v2552_v16 = vpop.xlane.xlu0 %2551 }
 0xbb7   :  { %8045 = vpow2.f32 %v2582_v12  ;;  %v2570_v18 = vsub.f32 %v2171_v37, %v2552_v16 }
 0xbb9   :  { %v2580_v19 = vmul.f32 1.442695, %v2570_v18 }
 0xbba   :  { %v2561_v20 = vpop.xlane.xlu1 %2560  ;;  %v2558_v21 = vpop.xlane.xlu0 %2557 }
 0xbbb   :  { %8047 = vpow2.f32 %v2580_v19  ;;  %v2573_v23 = vsub.f32 %v2393_v42, %v2561_v20  ;;  %v2572_v24 = vsub.f32 %v2319_v43, %v2558_v21 }
 0xbbd   :  { %v2586_v25 = vmul.f32 1.442695, %v2573_v23  ;;  %v2584_v26 = vmul.f32 1.442695, %v2572_v24 }
 0xbbe   :  { %v2564_v27 = vpop.xlane.xlu0 %2563 }
 0xbbf   :  { %8049 = vpow2.f32 %v2586_v25  ;;  %v2574_v28 = vsub.f32 %v2467_v52, %v2564_v27 }
 0xbc0   :  { %8051 = vpow2.f32 %v2584_v26 }
 0xbc1   :  { %v8046_v29 = vpop.eup %8045  ;;  %v2588_v31 = vmul.f32 1.442695, %v2574_v28  ;;  %v3270_v28 = vld [vmem:[#allocation11] sm:$0xff] }
 0xbc2   :  { %v2567_v59 = vpop.xlane.xlu1 %2566  ;;  %v2633_v32 = vpop.permute.xlu0 %2632  ;;  %v2601_v1 = vsel %vm377_vm6, %v8046_v29, 0.0 }
 0xbc3   :  { %8053 = vpow2.f32 %v2588_v31  ;;  %v2575_v33 = vsub.f32 %v2541_v57, %v2567_v59  ;;  %2602 = vadd.xlane.f32.xlu1 %v2601_v1  ;;  %7539 = vmatpush3.msra.mxu0 %v2633_v32  ;;  %v3272_v32 = vld [vmem:[#allocation11 + $0x10] sm:$0xff]  ;;  %v3273_v1 = vld [vmem:[#allocation11 + $0x18] sm:$0xff] }
 0xbc4   :  { %7548 = vmatprep.subr.mxu0 %v8376_v50 }
 0xbc5   :  { %v8048_v34 = vpop.eup %8047  ;;  %v2590_v35 = vmul.f32 1.442695, %v2575_v33 }
 0xbc6   :  { %v2709_v0 = vpop.permute.xlu1 %2708  ;;  %v2598_v36 = vsel %vm377_vm6, %v8048_v34, 0.0  ;;  %v2937_v45 = vpop.permute.xlu0 %2936 }
 0xbc7   :  { %8055 = vpow2.f32 %v2590_v35  ;;  %7544 = vmatpush3.msra.mxu1 %v2709_v0  ;;  %2599 = vadd.xlane.f32.xlu0 %v2598_v36 }
 0xbc8   :  { %7553 = vmatprep.subr.mxu1 %v8376_v50 }
 0xbc9   :  { %v8050_v37 = vpop.eup %8049 }
 0xbca   :  { %v8052_v38 = vpop.eup %8051  ;;  %v2607_v39 = vsel %vm377_vm6, %v8050_v37, 0.0  ;;  %v2785_v46 = vpop.permute.xlu1 %2784 }
 0xbcb   :  { %2608 = vadd.xlane.f32.xlu1 %v2607_v39  ;;  %v2604_v40 = vsel %vm377_vm6, %v8052_v38, 0.0 }
 0xbcc   :  { %2605 = vadd.xlane.f32.xlu0 %v2604_v40 }
 0xbcd   :  { %v8959_v41 = vpop.eup %8053 }
 0xbce   :  { %v2610_v42 = vsel %vm377_vm6, %v8959_v41, 0.0  ;;  %v2861_v51 = vpop.permute.xlu1 %2860 }
 0xbd0   :  { %2611 = vadd.xlane.f32.xlu0 %v2610_v42 }
 0xbd1   :  { %v8963_v43 = vpop.eup %8055 }
 0xbd2   :  { %v2613_v44 = vsel %vm377_vm6, %v8963_v43, 0.0  ;;  %v3013_v52 = vpop.permute.xlu1 %3012 }
 0xbd3   :  { %2614 = vadd.xlane.f32.xlu1 %v2613_v44 }
 0xbe4   :  { %3164 = vrot.lane.b32.xlu1 %v8914_v22, %s8381_s15 }
 0xbe6   :  { %3088 = vrot.lane.b32.xlu0 %v8892_v17, %s8381_s15 }
 0xbf7   :  { %v2594_v47 = vpop.xlane.xlu0 %2593 }
 0xbf8   :  { %8057 = vrcp.f32 %v2594_v47 }
 0xc02   :  { %v8058_v53 = vpop.eup %8057 }
 0xc03   :  { %v2597_v54 = vpop.xlane.xlu1 %2596  ;;  %v2624_v55 = vmul.f32 %v8058_v53, %v8945_v5 }
 0xc04   :  { %8059 = vrcp.f32 %v2597_v54 }
 0xc05   :  { %7541 = vmatmul.mubr.msk.f32.vlgmr.msra.gmra.mrb[26].mxu0 %vm377_vm6, %v2624_v55 }
 0xc06   :  { %7549 = vmatpush3.msra.mxu0 %v2785_v46  ;;  %7550 = vmatprep.mubr.msk.f32.mxu0 %vm8377_vm5, %v8376_v50 }
 0xc07   :  { %7558 = vmatprep.subr.mxu0 %v8376_v50 }
 0xc0e   :  { %v8060_v57 = vpop.eup %8059 }
 0xc0f   :  { %v2625_v58 = vmul.f32 %v8060_v57, %v8949_v7 }
 0xc11   :  { %7546 = vmatmul.mubr.msk.f32.vlgmr.msra.gmra.mrb[30].mxu1 %vm377_vm6, %v2625_v58 }
 0xc12   :  { %7554 = vmatpush3.msra.mxu1 %v2861_v51  ;;  %7555 = vmatprep.mubr.msk.f32.mxu1 %vm8377_vm5, %v8376_v50 }
 0xc13   :  { %7563 = vmatprep.subr.mxu1 %v8376_v50 }
 0xc50   :  { %v2603_v60 = vpop.xlane.xlu1 %2602 }
 0xc51   :  { %8061 = vrcp.f32 %v2603_v60 }
 0xc54   :  { %v2600_v61 = vpop.xlane.xlu0 %2599 }
 0xc55   :  { %8063 = vrcp.f32 %v2600_v61 }
 0xc58   :  { %v2609_v62 = vpop.xlane.xlu1 %2608 }
 0xc59   :  { %8065 = vrcp.f32 %v2609_v62  ;;  %v2606_v63 = vpop.xlane.xlu0 %2605 }
 0xc5a   :  { %8067 = vrcp.f32 %v2606_v63 }
 0xc5b   :  { %v8062_v2 = vpop.eup %8061 }
 0xc5c   :  { %v2627_v3 = vmul.f32 %v8062_v2, %v8046_v29  ;;  %v3271_v29 = vld [vmem:[#allocation11 + $0x8] sm:$0xff] }
 0xc5d   :  { %v2612_v4 = vpop.xlane.xlu0 %2611  ;;  %v7885_v31 = vpack.c.bf16 %v3271_v29, %v3270_v28  ;;  %v3494_v29 = vld [vmem:[%s9549_s11 + $0x18] sm:$0xff] }
 0xc5e   :  { %8069 = vrcp.f32 %v2612_v4  ;;  %7556 = vmatmul.mubr.msk.f32.vlgmr.msra.gmra.mrb[32].mxu1 %vm377_vm6, %v2627_v3 }
 0xc5f   :  { %v8064_v5 = vpop.eup %8063  ;;  %7564 = vmatpush3.msra.mxu1 %v3013_v52  ;;  %7565 = vmatprep.mubr.msk.f32.mxu1 %vm8377_vm5, %v8376_v50 }
 0xc60   :  { %v2615_v6 = vpop.xlane.xlu1 %2614  ;;  %v2626_v7 = vmul.f32 %v8064_v5, %v8048_v34  ;;  %7573 = vmatprep.subr.mxu1 %v8376_v50  ;;  %v7889_v34 = vpack.c.bf16 %v3273_v1, %v3272_v32  ;;  %v3496_v32 = vld [vmem:[%s9549_s11 + $0x28] sm:$0xff] }
 0xc61   :  { %8071 = vrcp.f32 %v2615_v6  ;;  %v3089_v18 = vpop.permute.xlu0 %3088 }
 0xc62   :  { %7551 = vmatmul.mubr.msk.f32.vlgmr.msra.gmra.mrb[28].mxu0 %vm377_vm6, %v2626_v7 }
 0xc63   :  { %v8066_v8 = vpop.eup %8065  ;;  %7559 = vmatpush3.msra.mxu0 %v2937_v45  ;;  %7560 = vmatprep.mubr.msk.f32.mxu0 %vm8377_vm5, %v8376_v50 }
 0xc64   :  { %v8068_v9 = vpop.eup %8067  ;;  %v3165_v10 = vpop.permute.xlu1 %3164  ;;  %7568 = vmatprep.subr.mxu0 %v8376_v50  ;;  %v2629_v12 = vmul.f32 %v8066_v8, %v8050_v37 }
 0xc65   :  { %v2628_v16 = vmul.f32 %v8068_v9, %v8052_v38 }
 0xc66   :  { %7566 = vmatmul.mubr.msk.f32.vlgmr.msra.gmra.mrb[34].mxu1 %vm377_vm6, %v2629_v12 }
 0xc67   :  { %7561 = vmatmul.mubr.msk.f32.vlgmr.msra.gmra.mrb[30].mxu0 %vm377_vm6, %v2628_v16  ;;  %7574 = vmatpush3.msra.mxu1 %v3165_v10 }
 0xc68   :  { %v8070_v19 = vpop.eup %8069  ;;  %7569 = vmatpush3.msra.mxu0 %v3089_v18  ;;  %7570 = vmatprep.mubr.msk.f32.mxu0 %vm8377_vm5, %v8376_v50  ;;  %v3397_v18 = vld [vmem:[#allocation13] sm:$0xff] }
 0xc69   :  { %v2630_v20 = vmul.f32 %v8070_v19, %v8959_v41  ;;  %7575 = vmatprep.mubr.msk.f32.mxu1 %vm8377_vm5, %v8376_v50  ;;  %7886 = vmatprep.subr.bf16.mxu0 %v7885_v31  ;;  %v3398_v19 = vld [vmem:[#allocation13 + $0x8] sm:$0xff] }
 0xc6b   :  { %v8072_v21 = vpop.eup %8071  ;;  %7571 = vmatmul.mubr.msk.f32.vlgmr.msra.gmra.mrb[32].mxu0 %vm377_vm6, %v2630_v20  ;;  %v3399_v20 = vld [vmem:[#allocation13 + $0x10] sm:$0xff] }
 0xc6c   :  { %v2631_v23 = vmul.f32 %v8072_v21, %v8963_v43  ;;  %7888 = vmatpush3.bf16.msra.mxu0 %v7885_v31  ;;  %v7893_v21 = vpack.c.bf16 %v3398_v19, %v3397_v18 }
 0xc6d   :  { %7890 = vmatprep.subr.bf16.mxu0 %v7889_v34 }
 0xc6e   :  { %7576 = vmatmul.mubr.msk.f32.vlgmr.msra.gmra.mrb[36].mxu1 %vm377_vm6, %v2631_v23  ;;  %v3400_v23 = vld [vmem:[#allocation13 + $0x18] sm:$0xff]  ;;  %7894 = vmatprep.subr.bf16.mxu1 %v7893_v21 }
 0xc6f   :  { %7896 = vmatpush3.bf16.msra.mxu1 %v7893_v21 }
 0xc70   :  { %7892 = vmatpush3.bf16.msra.mxu0 %v7889_v34 }
 0xcd8   :  { %v2704_v24 = vpop.f32.mrb[26].mxu0 }
 0xcd9   :  { %v7542_v25 = vpop.f32.mrb[27].mxu0 }
 0xcda   :  { %v3491_v25 = vld [vmem:[%s9549_s11] sm:$0xff] }
 0xce4   :  { %v2780_v26 = vpop.f32.mrb[30].mxu1 }
 0xce5   :  { %v7547_v27 = vpop.f32.mrb[31].mxu1 }
 0xce6   :  { %v3493_v27 = vld [vmem:[%s9549_s11 + $0x10] sm:$0xff] }
 0xce7   :  { %v7905_v31 = vpack.c.bf16 %v3494_v29, %v3493_v27  ;;  %v7077_v29 = vld [vmem:[%s9542_s4 + $0x28] sm:$0xff] }
 0xd31   :  { %v2932_v59 = vpop.f32.mrb[32].mxu1 }
 0xd32   :  { %3244 = vrot.lane.b32.xlu1 %v2932_v59, %s8370_s21  ;;  %v7557_v33 = vpop.f32.mrb[33].mxu1  ;;  %v3495_v59 = vld [vmem:[%s9549_s11 + $0x20] sm:$0xff] }
 0xd33   :  { %v7909_v1 = vpack.c.bf16 %v3496_v32, %v3495_v59  ;;  %v7079_v32 = vld [vmem:[%s9542_s4 + $0x38] sm:$0xff] }
 0xd35   :  { %v2856_v35 = vpop.f32.mrb[28].mxu0 }
 0xd36   :  { %3242 = vrot.lane.b32.xlu0 %v2856_v35, %s8370_s21  ;;  %v7552_v0 = vpop.f32.mrb[29].mxu0 }
 0xd39   :  { %v3084_v36 = vpop.f32.mrb[34].mxu1 }
 0xd3a   :  { %v3008_v37 = vpop.f32.mrb[30].mxu0  ;;  %3252 = vrot.lane.b32.xlu1 %v3084_v36, %s8383_s14  ;;  %v7567_v38 = vpop.f32.mrb[35].mxu1 }
 0xd3b   :  { %3250 = vrot.lane.b32.xlu0 %v3008_v37, %s8383_s14  ;;  %v7562_v39 = vpop.f32.mrb[31].mxu0 }
 0xd3e   :  { %v3160_v40 = vpop.f32.mrb[32].mxu0 }
 0xd3f   :  { %3258 = vrot.lane.b32.xlu0 %v3160_v40, %s8384_s9  ;;  %v7572_v41 = vpop.f32.mrb[33].mxu0 }
 0xd41   :  { %v3236_v42 = vpop.f32.mrb[36].mxu1 }
 0xd42   :  { %3260 = vrot.lane.b32.xlu1 %v3236_v42, %s8384_s9  ;;  %v7577_v43 = vpop.f32.mrb[37].mxu1 }
 0xda4   :  { %v3245_v45 = vpop.permute.xlu1 %3244 }
 0xda5   :  { %v3265_v55 = vsel %vm377_vm6, %v2780_v26, %v3245_v45  ;;  %v3492_v26 = vld [vmem:[%s9549_s11 + $0x8] sm:$0xff] }
 0xda6   :  { %v7901_v28 = vpack.c.bf16 %v3492_v26, %v3491_v25 }
 0xda8   :  { %v3243_v44 = vpop.permute.xlu0 %3242  ;;  %7902 = vmatprep.subr.bf16.mxu0 %v7901_v28 }
 0xda9   :  { %v3264_v47 = vsel %vm377_vm6, %v2704_v24, %v3243_v44  ;;  %v7897_v24 = vpack.c.bf16 %v3400_v23, %v3399_v20 }
 0xdab   :  { %7898 = vmatprep.subr.bf16.mxu1 %v7897_v24 }
 0xdac   :  { %v3253_v51 = vpop.permute.xlu1 %3252  ;;  %7900 = vmatpush3.bf16.msra.mxu1 %v7897_v24 }
 0xdad   :  { %v3251_v46 = vpop.permute.xlu0 %3250  ;;  %v3267_v57 = vsel %vm1706_vm7, %v3265_v55, %v3253_v51  ;;  %v3497_v55 = vld [vmem:[%s9549_s11 + $0x30] sm:$0xff] }
 0xdae   :  { %v3266_v52 = vsel %vm1706_vm7, %v3264_v47, %v3251_v46 }
 0xdb1   :  { %v3259_v53 = vpop.permute.xlu0 %3258 }
 0xdb2   :  { %v3268_v54 = vsel %vm1709_vm8, %v3266_v52, %v3259_v53 }
 0xdb3   :  { %7586 = vmatprep.mubr.msk.f32.mxu0 %vm152_vm0, %v3268_v54 }
 0xdb4   :  { %v3261_v58 = vpop.permute.xlu1 %3260 }
 0xdb5   :  { %v3269_v60 = vsel %vm1709_vm8, %v3267_v57, %v3261_v58  ;;  %v3498_v57 = vld [vmem:[%s9549_s11 + $0x38] sm:$0xff] }
 0xdb6   :  { %7587 = vmatmul.mubr.msk.f32.vlgmr.msra.gmra.mrb[34].mxu0 %vm152_vm0, %v3269_v60  ;;  %v7913_v58 = vpack.c.bf16 %v3498_v57, %v3497_v55  ;;  %v7070_v60 = vld [vmem:[%s9548_s10] ss:$0 sm:$0xff] }
 0xdb7   :  { %7904 = vmatpush3.bf16.msra.mxu0 %v7901_v28  ;;  %v7076_v28 = vld [vmem:[%s9542_s4 + $0x20] sm:$0xff] }
 0xdb8   :  { %7906 = vmatprep.subr.bf16.mxu0 %v7905_v31  ;;  %v7917_v59 = vpack.c.bf16 %v7077_v29, %v7076_v28 }
 0xdba   :  { %7918 = vmatprep.subr.bf16.mxu1 %v7917_v59 }
 0xdbb   :  { %7908 = vmatpush3.bf16.msra.mxu0 %v7905_v31  ;;  %v7078_v31 = vld [vmem:[%s9542_s4 + $0x30] sm:$0xff] }
 0xdbc   :  { %7910 = vmatprep.subr.bf16.mxu0 %v7909_v1 }
 0xdbf   :  { %7912 = vmatpush3.bf16.msra.mxu0 %v7909_v1  ;;  %v7921_v1 = vpack.c.bf16 %v7079_v32, %v7078_v31 }
 0xdc0   :  { %7914 = vmatprep.subr.bf16.mxu0 %v7913_v58 }
 0xdc3   :  { %7916 = vmatpush3.bf16.msra.mxu0 %v7913_v58 }
 0xdc4   :  { %7640 = vmatprep.subr.mxu0 %v8376_v50 }
 0xe89   :  { %v7588_v61 = vpop.f32.mrb[34].mxu0 }
 0xe8a   :  { %v9014_v62 = vadd.f32 %v7588_v61, %v8820_v30  ;;  %v3346_v63 = vpop.f32.mrb[35].mxu0 }
 0xe8b   :  { %v9017_v2 = vadd.f32 %v3346_v63, %v8823_v56 }
 0xe8c   :  { %v3360_v3 = vsel %vm152_vm0, %v9014_v62, 0.0 }
 0xe8d   :  { %3361 = vadd.xlane.f32.xlu1 %v3360_v3  ;;  %v3357_v4 = vsel %vm152_vm0, %v9017_v2, 0.0 }
 0xe8e   :  { %3358 = vadd.xlane.f32.xlu0 %v3357_v4 }
 0xf1a   :  { %v3362_v5 = vpop.xlane.xlu1 %3361 }
 0xf1b   :  { %v3364_v6 = vmul.f32 0.03125, %v3362_v5  ;;  %v3359_v7 = vpop.xlane.xlu0 %3358 }
 0xf1c   :  { %v3363_v8 = vmul.f32 0.03125, %v3359_v7  ;;  %v7073_v7 = vld [vmem:[%s9550_s12] ss:$0 sm:$0xff] }
 0xf1d   :  { %v3366_v9 = vsub.f32 %v9014_v62, %v3364_v6 }
 0xf1e   :  { %v3365_v30 = vsub.f32 %v9017_v2, %v3363_v8 }
 0xf1f   :  { %v3368_v12 = vmul.f32 %v3366_v9, %v3366_v9 }
 0xf20   :  { %v3367_v10 = vmul.f32 %v3365_v30, %v3365_v30 }
 0xf21   :  { %v3372_v16 = vsel %vm152_vm0, %v3368_v12, 0.0 }
 0xf22   :  { %v3369_v56 = vsel %vm152_vm0, %v3367_v10, 0.0 }
 0xf23   :  { %3370 = vadd.xlane.f32.xlu0 %v3369_v56 }
 0xf27   :  { %3373 = vadd.xlane.f32.xlu0 %v3372_v16 }
 0xfb0   :  { %v3371_v33 = vpop.xlane.xlu0 %3370 }
 0xfb1   :  { %v3375_v34 = vmul.f32 0.032258064, %v3371_v33 }
 0xfb3   :  { %8073 = vrsqrt.f32 %v3375_v34  ;;  %vm3379_vm13 = vcmp.eq.f32.partialorder %v3375_v34, inf  ;;  %v3382_v38 = vand.u32 2147483648, %v3375_v34  ;;  %vm3381_vm14 = vcmp.eq.f32.partialorder %v3375_v34, 0.0 }
 0xfb4   :  { %v3374_v35 = vpop.xlane.xlu0 %3373 }
 0xfb5   :  { %v3376_v0 = vmul.f32 0.032258064, %v3374_v35 }
 0xfb7   :  { %8075 = vrsqrt.f32 %v3376_v0  ;;  %vm3386_vm15 = vcmp.eq.f32.partialorder %v3376_v0, inf  ;;  %v3389_v44 = vand.u32 2147483648, %v3376_v0  ;;  %vm3388_vm1 = vcmp.eq.f32.partialorder %v3376_v0, 0.0 }
 0xfbd   :  { %v8074_v36 = vpop.eup %8073 }
 0xfbe   :  { %v3378_v37 = vmul.f32 %v8074_v36, %v3375_v34 }
 0xfc0   :  { %v3380_v39 = vsel %vm3379_vm13, %v3375_v34, %v3378_v37 }
 0xfc1   :  { %v8076_v40 = vpop.eup %8075  ;;  %v3383_v41 = vsel %vm3381_vm14, %v3382_v38, %v3380_v39 }
 0xfc2   :  { %v3385_v42 = vmul.f32 %v8076_v40, %v3376_v0  ;;  %v3391_v43 = vadd.f32 1e-06, %v3383_v41 }
 0xfc4   :  { %v3387_v45 = vsel %vm3386_vm15, %v3376_v0, %v3385_v42  ;;  %8077 = vrcp.f32 %v3391_v43 }
 0xfc5   :  { %v3390_v46 = vsel %vm3388_vm1, %v3389_v44, %v3387_v45 }
 0xfc6   :  { %v3392_v47 = vadd.f32 1e-06, %v3390_v46 }
 0xfc8   :  { %8079 = vrcp.f32 %v3392_v47 }
 0xfce   :  { %v8078_v51 = vpop.eup %8077 }
 0xfcf   :  { %v3394_v52 = vmul.f32 %v8078_v51, %v3365_v30 }
 0xfd1   :  { %7597 = vmatprep.mubr.msk.f32.mxu1 %vm152_vm0, %v3394_v52 }
 0xfd2   :  { %v8080_v53 = vpop.eup %8079 }
 0xfd3   :  { %v3396_v54 = vmul.f32 %v8080_v53, %v3366_v9 }
 0xfd5   :  { %7598 = vmatmul.mubr.msk.f32.vlgmr.msra.gmra.mrb[38].mxu1 %vm152_vm0, %v3396_v54 }
 0xfd6   :  { %7920 = vmatpush3.bf16.msra.mxu1 %v7917_v59 }
 0xfd7   :  { %7922 = vmatprep.subr.bf16.mxu1 %v7921_v1 }
 0xfda   :  { %7924 = vmatpush3.bf16.msra.mxu1 %v7921_v1 }
 0xfdb   :  { %7630 = vmatprep.subr.mxu1 %v8376_v50 }
0x10a8   :  { %v7599_v61 = vpop.f32.mrb[38].mxu1 }
0x10a9   :  { %v3486_v63 = vadd.f32 %v7599_v61, %v7070_v60  ;;  %v3480_v3 = vpop.f32.mrb[39].mxu1 }
0x10aa   :  { %v3481_v4 = vadd.f32 %v7070_v60, %v3480_v3 }
0x10ab   :  { %v3490_v6 = vmax.f32 %v3486_v63, 0.0 }
0x10ac   :  { %v3489_v5 = vmax.f32 %v3481_v4, 0.0 }
0x10ae   :  { %7616 = vmatprep.mubr.msk.f32.mxu0 %vm3506_vm2, %v3489_v5 }
0x10af   :  { %7617 = vmatmul.mubr.msk.f32.vlgmr.msra.gmra.mrb[36].mxu0 %vm3506_vm2, %v3490_v6 }
0x10b0   :  { %7642 = vmatprep.mubr.msk.f32.mxu0 %vm8377_vm5, %v8376_v50 }
0x1182   :  { %v7618_v8 = vpop.f32.mrb[36].mxu0 }
0x1183   :  { %v3585_v9 = vadd.f32 %v7618_v8, %v7073_v7  ;;  %v3579_v30 = vpop.f32.mrb[37].mxu0 }
0x1184   :  { %v3580_v10 = vadd.f32 %v7073_v7, %v3579_v30 }
0x1185   :  { %v9065_v56 = vadd.f32 %v3585_v9, %v9014_v62 }
0x1186   :  { %v9068_v12 = vadd.f32 %v3580_v10, %v9017_v2 }
0x1187   :  { %v3593_v16 = vsel %vm152_vm0, %v9065_v56, 0.0 }
0x1188   :  { %3594 = vadd.xlane.f32.xlu1 %v3593_v16  ;;  %v3590_v18 = vsel %vm152_vm0, %v9068_v12, 0.0 }
0x1189   :  { %3591 = vadd.xlane.f32.xlu0 %v3590_v18 }
0x1215   :  { %v3595_v19 = vpop.xlane.xlu1 %3594 }
0x1216   :  { %v3597_v20 = vmul.f32 0.03125, %v3595_v19  ;;  %v3592_v21 = vpop.xlane.xlu0 %3591  ;;  %v8177_v19 = vld [vmem:[#allocation7] sm:$0xff] }
0x1217   :  { %v3596_v23 = vmul.f32 0.03125, %v3592_v21 }
0x1218   :  { %v3599_v24 = vsub.f32 %v9065_v56, %v3597_v20 }
0x1219   :  { %v3598_v62 = vsub.f32 %v9068_v12, %v3596_v23 }
0x121a   :  { %v3601_v25 = vmul.f32 %v3599_v24, %v3599_v24 }
0x121b   :  { %v3600_v26 = vmul.f32 %v3598_v62, %v3598_v62 }
0x121c   :  { %v3605_v2 = vsel %vm152_vm0, %v3601_v25, 0.0 }
0x121d   :  { %3606 = vadd.xlane.f32.xlu1 %v3605_v2  ;;  %v3602_v27 = vsel %vm152_vm0, %v3600_v26, 0.0 }
0x121e   :  { %3603 = vadd.xlane.f32.xlu0 %v3602_v27 }
0x12aa   :  { %v3607_v33 = vpop.xlane.xlu1 %3606 }
0x12ab   :  { %v3609_v34 = vmul.f32 0.032258064, %v3607_v33  ;;  %v3604_v35 = vpop.xlane.xlu0 %3603 }
0x12ac   :  { %v3608_v0 = vmul.f32 0.032258064, %v3604_v35 }
0x12ad   :  { %8081 = vrsqrt.f32 %v3609_v34  ;;  %vm3619_vm3 = vcmp.eq.f32.partialorder %v3609_v34, inf  ;;  %v3622_v39 = vand.u32 2147483648, %v3609_v34  ;;  %vm3621_vm4 = vcmp.eq.f32.partialorder %v3609_v34, 0.0 }
0x12ae   :  { %8083 = vrsqrt.f32 %v3608_v0  ;;  %vm3612_vm9 = vcmp.eq.f32.partialorder %v3608_v0, inf  ;;  %v3615_v42 = vand.u32 2147483648, %v3608_v0  ;;  %vm3614_vm10 = vcmp.eq.f32.partialorder %v3608_v0, 0.0 }
0x12b7   :  { %v8082_v36 = vpop.eup %8081 }
0x12b8   :  { %v8084_v37 = vpop.eup %8083  ;;  %v3618_v38 = vmul.f32 %v8082_v36, %v3609_v34 }
0x12b9   :  { %v3611_v40 = vmul.f32 %v8084_v37, %v3608_v0 }
0x12ba   :  { %v3620_v41 = vsel %vm3619_vm3, %v3609_v34, %v3618_v38 }
0x12bb   :  { %v3623_v43 = vsel %vm3621_vm4, %v3622_v39, %v3620_v41  ;;  %v3613_v44 = vsel %vm3612_vm9, %v3608_v0, %v3611_v40 }
0x12bc   :  { %v3625_v45 = vadd.f32 1e-06, %v3623_v43  ;;  %v3616_v46 = vsel %vm3614_vm10, %v3615_v42, %v3613_v44 }
0x12bd   :  { %v3624_v47 = vadd.f32 1e-06, %v3616_v46 }
0x12be   :  { %8085 = vrcp.f32 %v3625_v45 }
0x12bf   :  { %8087 = vrcp.f32 %v3624_v47 }
0x12c8   :  { %v8086_v51 = vpop.eup %8085 }
0x12c9   :  { %v8088_v52 = vpop.eup %8087  ;;  %v3629_v54 = vmul.f32 %v8086_v51, %v3599_v24 }
0x12ca   :  { %v3627_v53 = vmul.f32 %v8088_v52, %v3598_v62  ;;  %v8178_v62 = vld [vmem:[#allocation7 + $0x8] sm:$0xff] }
0x12cc   :  { %7627 = vmatprep.mubr.msk.f32.mxu1 %vm152_vm0, %v3627_v53 }
0x12cd   :  { %7628 = vmatmul.mubr.msk.f32.vlgmr.msra.gmra.mrb[40].mxu1 %vm152_vm0, %v3629_v54 }
0x12ce   :  { %7632 = vmatprep.mubr.msk.f32.mxu1 %vm8377_vm5, %v8376_v50 }
0x13a0   :  { %v9095_v55 = vpop.f32.mrb[40].mxu1 }
0x13a1   :  { %3720 = vrot.lane.b32.xlu1 %v9095_v55, %s8378_s2  ;;  %v9099_v57 = vpop.f32.mrb[41].mxu1 }
0x13a2   :  { %3718 = vrot.lane.b32.xlu0 %v9099_v57, %s8378_s2 }
0x13a5   :  { %3722 = vrot.lane.b32.xlu1 %v9099_v57, %s8379_s29 }
0x13a6   :  { %3726 = vrot.lane.b32.xlu0 %v9099_v57, %s8380_s28 }
0x13a9   :  { %3724 = vrot.lane.b32.xlu1 %v9095_v55, %s8379_s29 }
0x13aa   :  { %3730 = vrot.lane.b32.xlu0 %v9099_v57, %s8381_s15 }
0x13ad   :  { %3728 = vrot.lane.b32.xlu1 %v9095_v55, %s8380_s28 }
0x13b1   :  { %3806 = vrot.lane.b32.xlu1 %v9095_v55, %s8381_s15 }
0x1413   :  { %v9115_v58 = vpop.permute.xlu1 %3720 }
0x1414   :  { %3958 = vrot.lane.b32.xlu1 %v9115_v58, %s8381_s15  ;;  %v9119_v60 = vpop.permute.xlu0 %3718 }
0x1415   :  { %3882 = vrot.lane.b32.xlu0 %v9119_v60, %s8381_s15 }
0x1417   :  { %v9123_v61 = vpop.permute.xlu1 %3722 }
0x1418   :  { %v9125_v63 = vpop.permute.xlu0 %3726 }
0x1419   :  { %4034 = vrot.lane.b32.xlu0 %v9123_v61, %s8381_s15 }
0x141b   :  { %v9129_v3 = vpop.permute.xlu1 %3724 }
0x141c   :  { %4110 = vrot.lane.b32.xlu1 %v9129_v3, %s8381_s15  ;;  %v3731_v4 = vpop.permute.xlu0 %3730 }
0x141d   :  { %4186 = vrot.lane.b32.xlu0 %v9125_v63, %s8381_s15  ;;  %7631 = vmatpush3.xpose.msk.msra.mxu1 %vm377_vm6, %v3731_v4 }
0x141e   :  { %7635 = vmatprep.subr.mxu1 %v8376_v50 }
0x141f   :  { %v9137_v5 = vpop.permute.xlu1 %3728 }
0x1420   :  { %4262 = vrot.lane.b32.xlu1 %v9137_v5, %s8381_s15  ;;  %7633 = vmatmul.mubr.msk.f32.vlgmr.msra.gmra.mrb[42].mxu1 %vm377_vm6, %v9099_v57 }
0x1421   :  { %7637 = vmatprep.mubr.msk.f32.mxu1 %vm8377_vm5, %v8376_v50 }
0x1423   :  { %v3807_v6 = vpop.permute.xlu1 %3806 }
0x1424   :  { %7636 = vmatpush3.xpose.msk.msra.mxu1 %vm377_vm6, %v3807_v6 }
0x1425   :  { %7645 = vmatprep.subr.mxu1 %v8376_v50 }
0x1427   :  { %7638 = vmatmul.mubr.msk.f32.vlgmr.msra.gmra.mrb[44].mxu1 %vm377_vm6, %v9095_v55 }
0x1428   :  { %7647 = vmatprep.mubr.msk.f32.mxu1 %vm8377_vm5, %v8376_v50 }
0x1486   :  { %v3959_v7 = vpop.permute.xlu1 %3958 }
0x1487   :  { %7646 = vmatpush3.xpose.msk.msra.mxu1 %vm377_vm6, %v3959_v7  ;;  %v3883_v8 = vpop.permute.xlu0 %3882 }
0x1488   :  { %7641 = vmatpush3.xpose.msk.msra.mxu0 %vm377_vm6, %v3883_v8  ;;  %7655 = vmatprep.subr.mxu1 %v8376_v50 }
0x1489   :  { %7650 = vmatprep.subr.mxu0 %v8376_v50 }
0x148a   :  { %7648 = vmatmul.mubr.msk.f32.vlgmr.msra.gmra.mrb[46].mxu1 %vm377_vm6, %v9115_v58 }
0x148b   :  { %7643 = vmatmul.mubr.msk.f32.vlgmr.msra.gmra.mrb[38].mxu0 %vm377_vm6, %v9119_v60  ;;  %v4035_v9 = vpop.permute.xlu0 %4034  ;;  %7657 = vmatprep.mubr.msk.f32.mxu1 %vm8377_vm5, %v8376_v50 }
0x148c   :  { %7651 = vmatpush3.xpose.msk.msra.mxu0 %vm377_vm6, %v4035_v9  ;;  %7652 = vmatprep.mubr.msk.f32.mxu0 %vm8377_vm5, %v8376_v50 }
0x148d   :  { %7660 = vmatprep.subr.mxu0 %v8376_v50 }
0x148e   :  { %v4111_v30 = vpop.permute.xlu1 %4110 }
0x148f   :  { %7653 = vmatmul.mubr.msk.f32.vlgmr.msra.gmra.mrb[40].mxu0 %vm377_vm6, %v9123_v61  ;;  %7656 = vmatpush3.xpose.msk.msra.mxu1 %vm377_vm6, %v4111_v30  ;;  %v4187_v10 = vpop.permute.xlu0 %4186 }
0x1490   :  { %7661 = vmatpush3.xpose.msk.msra.mxu0 %vm377_vm6, %v4187_v10  ;;  %7662 = vmatprep.mubr.msk.f32.mxu0 %vm8377_vm5, %v8376_v50 }
0x1491   :  { %7665 = vmatprep.subr.mxu1 %v8376_v50  ;;  %7670 = vmatprep.subr.mxu0 %v8376_v50 }
0x1492   :  { %v4263_v16 = vpop.permute.xlu1 %4262  ;;  %7658 = vmatmul.mubr.msk.f32.vlgmr.msra.gmra.mrb[48].mxu1 %vm377_vm6, %v9129_v3 }
0x1493   :  { %7663 = vmatmul.mubr.msk.f32.vlgmr.msra.gmra.mrb[42].mxu0 %vm377_vm6, %v9125_v63  ;;  %7666 = vmatpush3.xpose.msk.msra.mxu1 %vm377_vm6, %v4263_v16 }
0x1494   :  { %7667 = vmatprep.mubr.msk.f32.mxu1 %vm8377_vm5, %v8376_v50  ;;  %7675 = vmatprep.subr.mxu1 %v8376_v50 }
0x1495   :  { %7672 = vmatprep.mubr.msk.f32.mxu0 %vm8377_vm5, %v8376_v50 }
0x1496   :  { %7668 = vmatmul.mubr.msk.f32.vlgmr.msra.gmra.mrb[50].mxu1 %vm377_vm6, %v9137_v5 }
0x1497   :  { %7677 = vmatprep.mubr.msk.f32.mxu1 %vm8377_vm5, %v8376_v50 }
0x14f3   :  { %v3802_v18 = vpop.f32.mrb[42].mxu1 }
0x14f4   :  { %v3803_v20 = vadd.f32 %v8177_v19, %v3802_v18  ;;  %v7634_v21 = vpop.f32.mrb[43].mxu1 }
0x14f6   :  { %v4338_v23 = vsel %vm377_vm6, %v3803_v20, -inf }
0x14f7   :  { %4339 = vmax.xlane.f32.xlu0 %v4338_v23 }
0x14fa   :  { %v3878_v24 = vpop.f32.mrb[44].mxu1 }
0x14fb   :  { %v3879_v25 = vadd.f32 %v8178_v62, %v3878_v24  ;;  %v7639_v26 = vpop.f32.mrb[45].mxu1 }
0x14fd   :  { %v4341_v2 = vsel %vm377_vm6, %v3879_v25, -inf }
0x14fe   :  { %4342 = vmax.xlane.f32.xlu1 %v4341_v2 }
0x155d   :  { %v4030_v27 = vpop.f32.mrb[46].mxu1 }
0x155e   :  { %v4031_v28 = vadd.f32 %v8178_v62, %v4030_v27  ;;  %v3954_v29 = vpop.f32.mrb[38].mxu0  ;;  %v7649_v31 = vpop.f32.mrb[47].mxu1 }
0x155f   :  { %v7644_v59 = vpop.f32.mrb[39].mxu0  ;;  %v3955_v32 = vadd.f32 %v8177_v19, %v3954_v29 }
0x1560   :  { %v4347_v1 = vsel %vm377_vm6, %v4031_v28, -inf }
0x1561   :  { %4348 = vmax.xlane.f32.xlu0 %v4347_v1  ;;  %v4344_v0 = vsel %vm377_vm6, %v3955_v32, -inf }
0x1562   :  { %v4106_v33 = vpop.f32.mrb[40].mxu0 }
0x1563   :  { %v7654_v34 = vpop.f32.mrb[41].mxu0  ;;  %v4107_v35 = vadd.f32 %v8177_v19, %v4106_v33 }
0x1565   :  { %v4182_v36 = vpop.f32.mrb[48].mxu1  ;;  %4345 = vmax.xlane.f32.xlu0 %v4344_v0  ;;  %v4350_v43 = vsel %vm377_vm6, %v4107_v35, -inf }
0x1566   :  { %v4183_v37 = vadd.f32 %v8178_v62, %v4182_v36  ;;  %v7659_v38 = vpop.f32.mrb[49].mxu1  ;;  %v4258_v39 = vpop.f32.mrb[42].mxu0 }
0x1567   :  { %v7664_v40 = vpop.f32.mrb[43].mxu0  ;;  %v4259_v41 = vadd.f32 %v8177_v19, %v4258_v39 }
0x1568   :  { %v4353_v42 = vsel %vm377_vm6, %v4183_v37, -inf }
0x1569   :  { %4354 = vmax.xlane.f32.xlu1 %v4353_v42  ;;  %v4334_v44 = vpop.f32.mrb[50].mxu1  ;;  %4351 = vmax.xlane.f32.xlu0 %v4350_v43  ;;  %v4356_v51 = vsel %vm377_vm6, %v4259_v41, -inf }
0x156a   :  { %v4335_v45 = vadd.f32 %v8178_v62, %v4334_v44  ;;  %v7669_v46 = vpop.f32.mrb[51].mxu1 }
0x156c   :  { %v4359_v47 = vsel %vm377_vm6, %v4335_v45, -inf }
0x156d   :  { %4360 = vmax.xlane.f32.xlu1 %v4359_v47  ;;  %4357 = vmax.xlane.f32.xlu0 %v4356_v51 }
0x157e   :  { %4502 = vrot.lane.b32.xlu1 %v9095_v55, %s8382_s16 }
0x1582   :  { %4578 = vrot.lane.b32.xlu1 %v9119_v60, %s8382_s16 }
0x1583   :  { %4426 = vrot.lane.b32.xlu0 %v9099_v57, %s8382_s16 }
0x1584   :  { %v4340_v52 = vpop.xlane.xlu0 %4339 }
0x1585   :  { %v4362_v53 = vsub.f32 %v3803_v20, %v4340_v52 }
0x1586   :  { %4654 = vrot.lane.b32.xlu1 %v9115_v58, %s8382_s16 }
0x1587   :  { %4730 = vrot.lane.b32.xlu0 %v9123_v61, %s8382_s16  ;;  %v4370_v54 = vmul.f32 1.442695, %v4362_v53 }
0x1589   :  { %8089 = vpow2.f32 %v4370_v54 }
0x158a   :  { %4806 = vrot.lane.b32.xlu1 %v9129_v3, %s8382_s16 }
0x158b   :  { %v4343_v4 = vpop.xlane.xlu1 %4342 }
0x158c   :  { %v4363_v55 = vsub.f32 %v3879_v25, %v4343_v4 }
0x158e   :  { %v4372_v6 = vmul.f32 1.442695, %v4363_v55 }
0x1590   :  { %8091 = vpow2.f32 %v4372_v6 }
0x1593   :  { %v9207_v60 = vpop.eup %8089 }
0x1594   :  { %v4386_v57 = vsel %vm377_vm6, %v9207_v60, 0.0 }
0x159a   :  { %v9211_v58 = vpop.eup %8091 }
0x159b   :  { %v4389_v61 = vsel %vm377_vm6, %v9211_v58, 0.0 }
0x15a6   :  { %4387 = vadd.xlane.f32.xlu0 %v4386_v57 }
0x15ae   :  { %4390 = vadd.xlane.f32.xlu1 %v4389_v61 }
0x15ee   :  { %v4349_v3 = vpop.xlane.xlu0 %4348 }
0x15ef   :  { %v4365_v7 = vsub.f32 %v4031_v28, %v4349_v3 }
0x15f1   :  { %v4376_v8 = vmul.f32 1.442695, %v4365_v7 }
0x15f2   :  { %v4346_v9 = vpop.xlane.xlu0 %4345 }
0x15f3   :  { %8093 = vpow2.f32 %v4376_v8  ;;  %v4364_v30 = vsub.f32 %v3955_v32, %v4346_v9 }
0x15f5   :  { %v4374_v10 = vmul.f32 1.442695, %v4364_v30 }
0x15f6   :  { %v4355_v16 = vpop.xlane.xlu1 %4354  ;;  %v4352_v18 = vpop.xlane.xlu0 %4351 }
0x15f7   :  { %8095 = vpow2.f32 %v4374_v10  ;;  %v4367_v19 = vsub.f32 %v4183_v37, %v4355_v16  ;;  %v4366_v20 = vsub.f32 %v4107_v35, %v4352_v18 }
0x15f9   :  { %v4380_v21 = vmul.f32 1.442695, %v4367_v19  ;;  %v4378_v23 = vmul.f32 1.442695, %v4366_v20 }
0x15fa   :  { %v4361_v24 = vpop.xlane.xlu1 %4360  ;;  %v4358_v62 = vpop.xlane.xlu0 %4357 }
0x15fb   :  { %8097 = vpow2.f32 %v4380_v21  ;;  %v4369_v25 = vsub.f32 %v4335_v45, %v4361_v24  ;;  %v4368_v26 = vsub.f32 %v4259_v41, %v4358_v62  ;;  %v7106_v62 = vld [vmem:[%s9543_s5 + $0x20] sm:$0xff] }
0x15fc   :  { %8099 = vpow2.f32 %v4378_v23 }
0x15fd   :  { %v8094_v2 = vpop.eup %8093  ;;  %v4384_v27 = vmul.f32 1.442695, %v4369_v25  ;;  %v4382_v28 = vmul.f32 1.442695, %v4368_v26  ;;  %v7107_v25 = vld [vmem:[%s9543_s5 + $0x28] sm:$0xff] }
0x15fe   :  { %v4503_v29 = vpop.permute.xlu1 %4502  ;;  %v4427_v31 = vpop.permute.xlu0 %4426  ;;  %v4395_v59 = vsel %vm377_vm6, %v8094_v2, 0.0  ;;  %v7925_v26 = vpack.c.bf16 %v7107_v25, %v7106_v62 }
0x15ff   :  { %8101 = vpow2.f32 %v4384_v27  ;;  %7676 = vmatpush3.msra.mxu1 %v4503_v29  ;;  %4396 = vadd.xlane.f32.xlu1 %v4395_v59  ;;  %v7109_v27 = vld [vmem:[%s9543_s5 + $0x38] sm:$0xff] }
0x1600   :  { %8103 = vpow2.f32 %v4382_v28  ;;  %7671 = vmatpush3.msra.mxu0 %v4427_v31  ;;  %7685 = vmatprep.subr.mxu1 %v8376_v50 }
0x1601   :  { %v8096_v32 = vpop.eup %8095  ;;  %7680 = vmatprep.subr.mxu0 %v8376_v50 }
0x1602   :  { %v4392_v1 = vsel %vm377_vm6, %v8096_v32, 0.0  ;;  %v4579_v40 = vpop.permute.xlu1 %4578  ;;  %v4731_v41 = vpop.permute.xlu0 %4730 }
0x1603   :  { %4393 = vadd.xlane.f32.xlu0 %v4392_v1 }
0x1605   :  { %v8098_v33 = vpop.eup %8097 }
0x1606   :  { %v8100_v34 = vpop.eup %8099  ;;  %v4401_v35 = vsel %vm377_vm6, %v8098_v33, 0.0  ;;  %v4655_v42 = vpop.permute.xlu1 %4654 }
0x1607   :  { %4402 = vadd.xlane.f32.xlu1 %v4401_v35  ;;  %v4398_v0 = vsel %vm377_vm6, %v8100_v34, 0.0 }
0x1608   :  { %4399 = vadd.xlane.f32.xlu0 %v4398_v0 }
0x1609   :  { %v9221_v36 = vpop.eup %8101 }
0x160a   :  { %v9223_v37 = vpop.eup %8103  ;;  %v4407_v38 = vsel %vm377_vm6, %v9221_v36, 0.0  ;;  %v4807_v44 = vpop.permute.xlu1 %4806 }
0x160b   :  { %4408 = vadd.xlane.f32.xlu1 %v4407_v38  ;;  %v4404_v39 = vsel %vm377_vm6, %v9223_v37, 0.0 }
0x160c   :  { %4405 = vadd.xlane.f32.xlu0 %v4404_v39 }
0x161c   :  { %4958 = vrot.lane.b32.xlu1 %v9137_v5, %s8382_s16 }
0x1622   :  { %4882 = vrot.lane.b32.xlu0 %v9125_v63, %s8382_s16 }
0x1633   :  { %v4388_v43 = vpop.xlane.xlu0 %4387 }
0x1634   :  { %8105 = vrcp.f32 %v4388_v43 }
0x163b   :  { %v4391_v45 = vpop.xlane.xlu1 %4390 }
0x163c   :  { %8107 = vrcp.f32 %v4391_v45 }
0x163e   :  { %v8106_v46 = vpop.eup %8105 }
0x163f   :  { %v4418_v47 = vmul.f32 %v8106_v46, %v9207_v60 }
0x1641   :  { %7673 = vmatmul.mubr.msk.f32.vlgmr.msra.gmra.mrb[44].mxu0 %vm377_vm6, %v4418_v47 }
0x1642   :  { %7681 = vmatpush3.msra.mxu0 %v4579_v40  ;;  %7682 = vmatprep.mubr.msk.f32.mxu0 %vm8377_vm5, %v8376_v50 }
0x1643   :  { %7690 = vmatprep.subr.mxu0 %v8376_v50 }
0x1646   :  { %v8108_v63 = vpop.eup %8107 }
0x1647   :  { %v4419_v5 = vmul.f32 %v8108_v63, %v9211_v58 }
0x1649   :  { %7678 = vmatmul.mubr.msk.f32.vlgmr.msra.gmra.mrb[52].mxu1 %vm377_vm6, %v4419_v5 }
0x164a   :  { %7686 = vmatpush3.msra.mxu1 %v4655_v42  ;;  %7687 = vmatprep.mubr.msk.f32.mxu1 %vm8377_vm5, %v8376_v50 }
0x164b   :  { %7695 = vmatprep.subr.mxu1 %v8376_v50 }
0x168c   :  { %v4397_v51 = vpop.xlane.xlu1 %4396 }
0x168d   :  { %8109 = vrcp.f32 %v4397_v51 }
0x1690   :  { %v4394_v52 = vpop.xlane.xlu0 %4393 }
0x1691   :  { %8111 = vrcp.f32 %v4394_v52 }
0x1694   :  { %v4403_v53 = vpop.xlane.xlu1 %4402 }
0x1695   :  { %8113 = vrcp.f32 %v4403_v53  ;;  %v4400_v54 = vpop.xlane.xlu0 %4399 }
0x1696   :  { %8115 = vrcp.f32 %v4400_v54 }
0x1697   :  { %v8110_v4 = vpop.eup %8109 }
0x1698   :  { %v4421_v55 = vmul.f32 %v8110_v4, %v8094_v2  ;;  %v4409_v6 = vpop.xlane.xlu1 %4408  ;;  %v7108_v2 = vld [vmem:[%s9543_s5 + $0x30] sm:$0xff] }
0x1699   :  { %8117 = vrcp.f32 %v4409_v6  ;;  %v4406_v60 = vpop.xlane.xlu0 %4405  ;;  %v7929_v28 = vpack.c.bf16 %v7109_v27, %v7108_v2 }
0x169a   :  { %8119 = vrcp.f32 %v4406_v60  ;;  %7688 = vmatmul.mubr.msk.f32.vlgmr.msra.gmra.mrb[54].mxu1 %vm377_vm6, %v4421_v55 }
0x169b   :  { %v8112_v57 = vpop.eup %8111  ;;  %7696 = vmatpush3.msra.mxu1 %v4807_v44  ;;  %7697 = vmatprep.mubr.msk.f32.mxu1 %vm8377_vm5, %v8376_v50 }
0x169c   :  { %v4420_v58 = vmul.f32 %v8112_v57, %v8096_v32  ;;  %7705 = vmatprep.subr.mxu1 %v8376_v50  ;;  %v4959_v9 = vpop.permute.xlu1 %4958 }
0x169d   :  { %v4883_v10 = vpop.permute.xlu0 %4882 }
0x169e   :  { %7683 = vmatmul.mubr.msk.f32.vlgmr.msra.gmra.mrb[46].mxu0 %vm377_vm6, %v4420_v58 }
0x169f   :  { %v8114_v61 = vpop.eup %8113  ;;  %7691 = vmatpush3.msra.mxu0 %v4731_v41  ;;  %7692 = vmatprep.mubr.msk.f32.mxu0 %vm8377_vm5, %v8376_v50 }
0x16a0   :  { %v8116_v3 = vpop.eup %8115  ;;  %v4423_v7 = vmul.f32 %v8114_v61, %v8098_v33  ;;  %7700 = vmatprep.subr.mxu0 %v8376_v50 }
0x16a1   :  { %v4422_v8 = vmul.f32 %v8116_v3, %v8100_v34 }
0x16a2   :  { %7698 = vmatmul.mubr.msk.f32.vlgmr.msra.gmra.mrb[56].mxu1 %vm377_vm6, %v4423_v7 }
0x16a3   :  { %v8118_v30 = vpop.eup %8117  ;;  %7693 = vmatmul.mubr.msk.f32.vlgmr.msra.gmra.mrb[48].mxu0 %vm377_vm6, %v4422_v8  ;;  %7706 = vmatpush3.msra.mxu1 %v4959_v9 }
0x16a4   :  { %v8120_v16 = vpop.eup %8119  ;;  %v4425_v18 = vmul.f32 %v8118_v30, %v9221_v36  ;;  %7701 = vmatpush3.msra.mxu0 %v4883_v10  ;;  %7702 = vmatprep.mubr.msk.f32.mxu0 %vm8377_vm5, %v8376_v50  ;;  %v7112_v30 = vld [vmem:[%s9544_s6 + $0x20] sm:$0xff]  ;;  %v7113_v10 = vld [vmem:[%s9544_s6 + $0x28] sm:$0xff] }
0x16a5   :  { %v4424_v19 = vmul.f32 %v8120_v16, %v9223_v37  ;;  %7707 = vmatprep.mubr.msk.f32.mxu1 %vm8377_vm5, %v8376_v50  ;;  %7926 = vmatprep.subr.bf16.mxu0 %v7925_v26  ;;  %v7933_v16 = vpack.c.bf16 %v7113_v10, %v7112_v30 }
0x16a6   :  { %7708 = vmatmul.mubr.msk.f32.vlgmr.msra.gmra.mrb[58].mxu1 %vm377_vm6, %v4425_v18  ;;  %v7114_v18 = vld [vmem:[%s9544_s6 + $0x30] sm:$0xff] }
0x16a7   :  { %7703 = vmatmul.mubr.msk.f32.vlgmr.msra.gmra.mrb[50].mxu0 %vm377_vm6, %v4424_v19  ;;  %7934 = vmatprep.subr.bf16.mxu1 %v7933_v16  ;;  %v7115_v19 = vld [vmem:[%s9544_s6 + $0x38] sm:$0xff]  ;;  %s8385_s6 = smov 32  }
0x16a8   :  { %7928 = vmatpush3.bf16.msra.mxu0 %v7925_v26  ;;  %7936 = vmatpush3.bf16.msra.mxu1 %v7933_v16 }
0x16a9   :  { %7930 = vmatprep.subr.bf16.mxu0 %v7929_v28 }
0x16ac   :  { %7932 = vmatpush3.bf16.msra.mxu0 %v7929_v28 }
0x16ad   :  { %7732 = vmatprep.subr.mxu0 %v8376_v50 }
0x1714   :  { %v4498_v20 = vpop.f32.mrb[44].mxu0 }
0x1715   :  { %v7674_v21 = vpop.f32.mrb[45].mxu0 }
0x171c   :  { %v4574_v23 = vpop.f32.mrb[52].mxu1 }
0x171d   :  { %v7679_v24 = vpop.f32.mrb[53].mxu1 }
0x176d   :  { %v4726_v29 = vpop.f32.mrb[54].mxu1 }
0x176e   :  { %5038 = vrot.lane.b32.xlu1 %v4726_v29, %s8370_s21  ;;  %v7689_v31 = vpop.f32.mrb[55].mxu1 }
0x1771   :  { %v4650_v59 = vpop.f32.mrb[46].mxu0 }
0x1772   :  { %5036 = vrot.lane.b32.xlu0 %v4650_v59, %s8370_s21  ;;  %v7684_v32 = vpop.f32.mrb[47].mxu0 }
0x1775   :  { %v4878_v1 = vpop.f32.mrb[56].mxu1 }
0x1776   :  { %v4802_v33 = vpop.f32.mrb[48].mxu0  ;;  %5046 = vrot.lane.b32.xlu1 %v4878_v1, %s8383_s14  ;;  %v7699_v34 = vpop.f32.mrb[57].mxu1 }
0x1777   :  { %5044 = vrot.lane.b32.xlu0 %v4802_v33, %s8383_s14  ;;  %v7694_v35 = vpop.f32.mrb[49].mxu0 }
0x1779   :  { %v5030_v0 = vpop.f32.mrb[58].mxu1 }
0x177a   :  { %v4954_v36 = vpop.f32.mrb[50].mxu0  ;;  %5054 = vrot.lane.b32.xlu1 %v5030_v0, %s8384_s9  ;;  %v7709_v37 = vpop.f32.mrb[59].mxu1 }
0x177b   :  { %5052 = vrot.lane.b32.xlu0 %v4954_v36, %s8384_s9  ;;  %v7704_v38 = vpop.f32.mrb[51].mxu0 }
0x17e0   :  { %v5039_v39 = vpop.permute.xlu1 %5038 }
0x17e1   :  { %v5059_v43 = vsel %vm377_vm6, %v4574_v23, %v5039_v39 }
0x17e4   :  { %v5037_v40 = vpop.permute.xlu0 %5036 }
0x17e5   :  { %v5058_v44 = vsel %vm377_vm6, %v4498_v20, %v5037_v40  ;;  %v7937_v20 = vpack.c.bf16 %v7115_v19, %v7114_v18 }
0x17e7   :  { %7938 = vmatprep.subr.bf16.mxu1 %v7937_v20 }
0x17e8   :  { %v5047_v41 = vpop.permute.xlu1 %5046  ;;  %7940 = vmatpush3.bf16.msra.mxu1 %v7937_v20 }
0x17e9   :  { %v5045_v42 = vpop.permute.xlu0 %5044  ;;  %v5061_v45 = vsel %vm1706_vm7, %v5059_v43, %v5047_v41  ;;  %7737 = vmatprep.subr.mxu1 %v8376_v50 }
0x17ea   :  { %v5060_v47 = vsel %vm1706_vm7, %v5058_v44, %v5045_v42 }
0x17ec   :  { %v5055_v46 = vpop.permute.xlu1 %5054 }
0x17ed   :  { %v5063_v63 = vsel %vm1709_vm8, %v5061_v45, %v5055_v46  ;;  %v5053_v5 = vpop.permute.xlu0 %5052 }
0x17ee   :  { %v5062_v51 = vsel %vm1709_vm8, %v5060_v47, %v5053_v5 }
0x17ef   :  { %7718 = vmatprep.mubr.msk.f32.mxu0 %vm152_vm0, %v5062_v51 }
0x17f0   :  { %7719 = vmatmul.mubr.msk.f32.vlgmr.msra.gmra.mrb[52].mxu0 %vm152_vm0, %v5063_v63 }
0x17f1   :  { %7734 = vmatprep.mubr.msk.f32.mxu0 %vm8377_vm5, %v8376_v50 }
0x18c3   :  { %v7720_v52 = vpop.f32.mrb[52].mxu0 }
0x18c4   :  { %v9291_v53 = vadd.f32 %v7720_v52, %v9065_v56  ;;  %v5141_v54 = vpop.f32.mrb[53].mxu0 }
0x18c5   :  { %v9294_v4 = vadd.f32 %v5141_v54, %v9068_v12 }
0x18c6   :  { %v5155_v55 = vsel %vm152_vm0, %v9291_v53, 0.0 }
0x18c7   :  { %5156 = vadd.xlane.f32.xlu1 %v5155_v55  ;;  %v5152_v6 = vsel %vm152_vm0, %v9294_v4, 0.0 }
0x18c8   :  { %5153 = vadd.xlane.f32.xlu0 %v5152_v6 }
0x18d8   :  { %5368 = vrot.lane.b32.xlu1 %v8611_v48, %s8382_s16 }
0x18dc   :  { %5444 = vrot.lane.b32.xlu1 %v8870_v13, %s8382_s16 }
0x18e0   :  { %5520 = vrot.lane.b32.xlu1 %v8863_v11, %s8382_s16 }
0x18e4   :  { %5672 = vrot.lane.b32.xlu1 %v8887_v14, %s8382_s16 }
0x18e8   :  { %5824 = vrot.lane.b32.xlu1 %v8914_v22, %s8382_s16 }
0x1954   :  { %v5157_v56 = vpop.xlane.xlu1 %5156 }
0x1955   :  { %v5159_v12 = vmul.f32 0.03125, %v5157_v56  ;;  %v5154_v60 = vpop.xlane.xlu0 %5153  ;;  %v8179_v56 = vld [vmem:[#allocation8 + $0x8] sm:$0xff] }
0x1956   :  { %v5158_v57 = vmul.f32 0.03125, %v5154_v60 }
0x1957   :  { %v5161_v58 = vsub.f32 %v9291_v53, %v5159_v12 }
0x1958   :  { %v5160_v61 = vsub.f32 %v9294_v4, %v5158_v57  ;;  %v5369_v39 = vpop.permute.xlu1 %5368 }
0x1959   :  { %v5163_v8 = vmul.f32 %v5161_v58, %v5161_v58 }
0x195a   :  { %v5162_v3 = vmul.f32 %v5160_v61, %v5160_v61 }
0x195b   :  { %v5167_v9 = vsel %vm152_vm0, %v5163_v8, 0.0 }
0x195c   :  { %v5164_v7 = vsel %vm152_vm0, %v5162_v3, 0.0  ;;  %v5445_v40 = vpop.permute.xlu1 %5444 }
0x195d   :  { %5165 = vadd.xlane.f32.xlu0 %v5164_v7 }
0x1960   :  { %v5521_v42 = vpop.permute.xlu1 %5520 }
0x1961   :  { %5168 = vadd.xlane.f32.xlu0 %v5167_v9 }
0x1964   :  { %v5673_v44 = vpop.permute.xlu1 %5672 }
0x1968   :  { %v5825_v46 = vpop.permute.xlu1 %5824 }
0x1977   :  { %5292 = vrot.lane.b32.xlu0 %v8613_v49, %s8382_s16 }
0x197b   :  { %5596 = vrot.lane.b32.xlu0 %v8889_v15, %s8382_s16 }
0x197f   :  { %5748 = vrot.lane.b32.xlu0 %v8892_v17, %s8382_s16 }
0x19ea   :  { %v5166_v21 = vpop.xlane.xlu0 %5165 }
0x19eb   :  { %v5170_v23 = vmul.f32 0.032258064, %v5166_v21 }
0x19ed   :  { %8121 = vrsqrt.f32 %v5170_v23  ;;  %vm5174_vm11 = vcmp.eq.f32.partialorder %v5170_v23, inf  ;;  %v5177_v27 = vand.u32 2147483648, %v5170_v23  ;;  %vm5176_vm12 = vcmp.eq.f32.partialorder %v5170_v23, 0.0 }
0x19ee   :  { %v5169_v24 = vpop.xlane.xlu0 %5168 }
0x19ef   :  { %v5171_v62 = vmul.f32 0.032258064, %v5169_v24 }
0x19f1   :  { %8123 = vrsqrt.f32 %v5171_v62  ;;  %vm5181_vm13 = vcmp.eq.f32.partialorder %v5171_v62, inf  ;;  %v5184_v1 = vand.u32 2147483648, %v5171_v62  ;;  %vm5183_vm14 = vcmp.eq.f32.partialorder %v5171_v62, 0.0 }
0x19f2   :  { %v5293_v25 = vpop.permute.xlu0 %5292 }
0x19f3   :  { %7733 = vmatpush3.xpose.msk.msra.mxu0 %vm377_vm6, %v5293_v25 }
0x19f4   :  { %7742 = vmatprep.subr.mxu0 %v8376_v50 }
0x19f6   :  { %v5597_v45 = vpop.permute.xlu0 %5596 }
0x19f7   :  { %v8122_v26 = vpop.eup %8121 }
0x19f8   :  { %v5173_v2 = vmul.f32 %v8122_v26, %v5170_v23 }
0x19fa   :  { %v5175_v28 = vsel %vm5174_vm11, %v5170_v23, %v5173_v2  ;;  %v5749_v47 = vpop.permute.xlu0 %5748 }
0x19fb   :  { %v8124_v29 = vpop.eup %8123  ;;  %v5178_v31 = vsel %vm5176_vm12, %v5177_v27, %v5175_v28 }
0x19fc   :  { %v5180_v59 = vmul.f32 %v8124_v29, %v5171_v62  ;;  %v5186_v32 = vadd.f32 1e-06, %v5178_v31 }
0x19fe   :  { %v5182_v33 = vsel %vm5181_vm13, %v5171_v62, %v5180_v59  ;;  %8125 = vrcp.f32 %v5186_v32 }
0x19ff   :  { %v5185_v34 = vsel %vm5183_vm14, %v5184_v1, %v5182_v33 }
0x1a00   :  { %v5187_v35 = vadd.f32 1e-06, %v5185_v34 }
0x1a02   :  { %8127 = vrcp.f32 %v5187_v35 }
0x1a08   :  { %v8126_v0 = vpop.eup %8125 }
0x1a09   :  { %v5189_v36 = vmul.f32 %v8126_v0, %v5160_v61 }
0x1a0b   :  { %7729 = vmatprep.mubr.msk.f32.mxu1 %vm152_vm0, %v5189_v36 }
0x1a0c   :  { %v8128_v37 = vpop.eup %8127 }
0x1a0d   :  { %v5191_v38 = vmul.f32 %v8128_v37, %v5161_v58  ;;  %v8180_v58 = vld [vmem:[#allocation8] sm:$0xff] }
0x1a0f   :  { %7730 = vmatmul.mubr.msk.f32.vlgmr.msra.gmra.mrb[60].mxu1 %vm152_vm0, %v5191_v38 }
0x1a10   :  { %7738 = vmatpush3.xpose.msk.msra.mxu1 %vm377_vm6, %v5369_v39  ;;  %7739 = vmatprep.mubr.msk.f32.mxu1 %vm8377_vm5, %v8376_v50 }
0x1a11   :  { %7747 = vmatprep.subr.mxu1 %v8376_v50 }
0x1ae2   :  { %v7731_v41 = vpop.f32.mrb[60].mxu1 }
0x1ae3   :  { %5282 = vrot.lane.b32.xlu1 %v7731_v41, %s8378_s2  ;;  %v5269_v43 = vpop.f32.mrb[61].mxu1  ;;  %7740 = vmatmul.mubr.msk.f32.vlgmr.msra.gmra.mrb[62].mxu1 %vm377_vm6, %v7731_v41 }
0x1ae4   :  { %7748 = vmatpush3.xpose.msk.msra.mxu1 %vm377_vm6, %v5521_v42  ;;  %5280 = vrot.lane.b32.xlu0 %v5269_v43, %s8378_s2 }
0x1ae5   :  { %7735 = vmatmul.mubr.msk.f32.vlgmr.msra.gmra.mrb[54].mxu0 %vm377_vm6, %v5269_v43  ;;  %7749 = vmatprep.mubr.msk.f32.mxu1 %vm8377_vm5, %v8376_v50 }
0x1ae6   :  { %7743 = vmatpush3.xpose.msk.msra.mxu0 %vm377_vm6, %v5445_v40  ;;  %7757 = vmatprep.subr.mxu1 %v8376_v50 }
0x1ae7   :  { %5286 = vrot.lane.b32.xlu1 %v7731_v41, %s8379_s29  ;;  %7744 = vmatprep.mubr.msk.f32.mxu0 %vm8377_vm5, %v8376_v50 }
0x1ae8   :  { %5284 = vrot.lane.b32.xlu0 %v5269_v43, %s8379_s29  ;;  %7752 = vmatprep.subr.mxu0 %v8376_v50 }
0x1aeb   :  { %5290 = vrot.lane.b32.xlu1 %v7731_v41, %s8380_s28 }
0x1aec   :  { %5288 = vrot.lane.b32.xlu0 %v5269_v43, %s8380_s28 }
0x1b55   :  { %v5283_v63 = vpop.permute.xlu1 %5282 }
0x1b56   :  { %7750 = vmatmul.mubr.msk.f32.vlgmr.msra.gmra.mrb[64].mxu1 %vm377_vm6, %v5283_v63  ;;  %v5281_v5 = vpop.permute.xlu0 %5280 }
0x1b57   :  { %7758 = vmatpush3.xpose.msk.msra.mxu1 %vm377_vm6, %v5673_v44  ;;  %7745 = vmatmul.mubr.msk.f32.vlgmr.msra.gmra.mrb[56].mxu0 %vm377_vm6, %v5281_v5 }
0x1b58   :  { %7753 = vmatpush3.xpose.msk.msra.mxu0 %vm377_vm6, %v5597_v45  ;;  %7759 = vmatprep.mubr.msk.f32.mxu1 %vm8377_vm5, %v8376_v50 }
0x1b59   :  { %v5287_v51 = vpop.permute.xlu1 %5286  ;;  %7767 = vmatprep.subr.mxu1 %v8376_v50  ;;  %7754 = vmatprep.mubr.msk.f32.mxu0 %vm8377_vm5, %v8376_v50 }
0x1b5a   :  { %7760 = vmatmul.mubr.msk.f32.vlgmr.msra.gmra.mrb[66].mxu1 %vm377_vm6, %v5287_v51  ;;  %7762 = vmatprep.subr.mxu0 %v8376_v50  ;;  %v5285_v52 = vpop.permute.xlu0 %5284 }
0x1b5b   :  { %7768 = vmatpush3.xpose.msk.msra.mxu1 %vm377_vm6, %v5825_v46  ;;  %7755 = vmatmul.mubr.msk.f32.vlgmr.msra.gmra.mrb[58].mxu0 %vm377_vm6, %v5285_v52 }
0x1b5c   :  { %7763 = vmatpush3.xpose.msk.msra.mxu0 %vm377_vm6, %v5749_v47  ;;  %7769 = vmatprep.mubr.msk.f32.mxu1 %vm8377_vm5, %v8376_v50 }
0x1b5d   :  { %v5291_v54 = vpop.permute.xlu1 %5290  ;;  %7764 = vmatprep.mubr.msk.f32.mxu0 %vm8377_vm5, %v8376_v50  ;;  %7777 = vmatprep.subr.mxu1 %v8376_v50 }
0x1b5e   :  { %7770 = vmatmul.mubr.msk.f32.vlgmr.msra.gmra.mrb[68].mxu1 %vm377_vm6, %v5291_v54  ;;  %v5289_v55 = vpop.permute.xlu0 %5288  ;;  %7772 = vmatprep.subr.mxu0 %v8376_v50 }
0x1b5f   :  { %7765 = vmatmul.mubr.msk.f32.vlgmr.msra.gmra.mrb[60].mxu0 %vm377_vm6, %v5289_v55  ;;  %7779 = vmatprep.mubr.msk.f32.mxu1 %vm8377_vm5, %v8376_v50 }
0x1b60   :  { %7774 = vmatprep.mubr.msk.f32.mxu0 %vm8377_vm5, %v8376_v50 }
0x1bb6   :  { %v5440_v6 = vpop.f32.mrb[62].mxu1 }
0x1bb7   :  { %v5441_v12 = vadd.f32 %v8179_v56, %v5440_v6  ;;  %v7741_v60 = vpop.f32.mrb[63].mxu1 }
0x1bb8   :  { %v5364_v57 = vpop.f32.mrb[54].mxu0 }
0x1bb9   :  { %v5365_v61 = vadd.f32 %v8180_v58, %v5364_v57  ;;  %v7736_v3 = vpop.f32.mrb[55].mxu0  ;;  %v5903_v7 = vsel %vm377_vm6, %v5441_v12, -inf }
0x1bba   :  { %5904 = vmax.xlane.f32.xlu1 %v5903_v7 }
0x1bbb   :  { %v5900_v8 = vsel %vm377_vm6, %v5365_v61, -inf }
0x1bbc   :  { %5901 = vmax.xlane.f32.xlu0 %v5900_v8 }
0x1c29   :  { %v5592_v9 = vpop.f32.mrb[64].mxu1 }
0x1c2a   :  { %v5593_v30 = vadd.f32 %v8179_v56, %v5592_v9  ;;  %v5516_v10 = vpop.f32.mrb[56].mxu0  ;;  %v7751_v16 = vpop.f32.mrb[65].mxu1 }
0x1c2b   :  { %v7746_v18 = vpop.f32.mrb[57].mxu0  ;;  %v5517_v19 = vadd.f32 %v8180_v58, %v5516_v10 }
0x1c2c   :  { %v5909_v20 = vsel %vm377_vm6, %v5593_v30, -inf }
0x1c2d   :  { %v5744_v21 = vpop.f32.mrb[66].mxu1  ;;  %5910 = vmax.xlane.f32.xlu0 %v5909_v20  ;;  %v5906_v27 = vsel %vm377_vm6, %v5517_v19, -inf }
0x1c2e   :  { %v5745_v23 = vadd.f32 %v8179_v56, %v5744_v21  ;;  %v5668_v24 = vpop.f32.mrb[58].mxu0  ;;  %v7761_v62 = vpop.f32.mrb[67].mxu1 }
0x1c2f   :  { %v7756_v25 = vpop.f32.mrb[59].mxu0  ;;  %v5669_v26 = vadd.f32 %v8180_v58, %v5668_v24 }
0x1c30   :  { %v5915_v2 = vsel %vm377_vm6, %v5745_v23, -inf }
0x1c31   :  { %5916 = vmax.xlane.f32.xlu1 %v5915_v2  ;;  %v5896_v28 = vpop.f32.mrb[68].mxu1  ;;  %5907 = vmax.xlane.f32.xlu0 %v5906_v27  ;;  %v5912_v34 = vsel %vm377_vm6, %v5669_v26, -inf }
0x1c32   :  { %v5897_v29 = vadd.f32 %v8179_v56, %v5896_v28  ;;  %v5820_v31 = vpop.f32.mrb[60].mxu0  ;;  %v7771_v59 = vpop.f32.mrb[69].mxu1 }
0x1c33   :  { %v7766_v32 = vpop.f32.mrb[61].mxu0  ;;  %v5821_v1 = vadd.f32 %v8180_v58, %v5820_v31 }
0x1c34   :  { %v5921_v33 = vsel %vm377_vm6, %v5897_v29, -inf }
0x1c35   :  { %5922 = vmax.xlane.f32.xlu1 %v5921_v33  ;;  %5913 = vmax.xlane.f32.xlu0 %v5912_v34  ;;  %v5918_v35 = vsel %vm377_vm6, %v5821_v1, -inf }
0x1c39   :  { %5919 = vmax.xlane.f32.xlu0 %v5918_v35 }
0x1c46   :  { %6064 = vrot.lane.b32.xlu1 %v8611_v48, %s8385_s6 }
0x1c47   :  { %v5905_v37 = vpop.xlane.xlu1 %5904 }
0x1c48   :  { %v5925_v38 = vsub.f32 %v5441_v12, %v5905_v37 }
0x1c49   :  { %v5902_v0 = vpop.xlane.xlu0 %5901 }
0x1c4a   :  { %6140 = vrot.lane.b32.xlu1 %v8870_v13, %s8385_s6  ;;  %v5924_v36 = vsub.f32 %v5365_v61, %v5902_v0  ;;  %v5934_v39 = vmul.f32 1.442695, %v5925_v38 }
0x1c4c   :  { %v5932_v48 = vmul.f32 1.442695, %v5924_v36 }
0x1c4e   :  { %6216 = vrot.lane.b32.xlu1 %v8863_v11, %s8385_s6  ;;  %8129 = vpow2.f32 %v5932_v48 }
0x1c4f   :  { %5988 = vrot.lane.b32.xlu0 %v8613_v49, %s8385_s6  ;;  %8131 = vpow2.f32 %v5934_v39 }
0x1c52   :  { %6368 = vrot.lane.b32.xlu1 %v8887_v14, %s8385_s6 }
0x1c53   :  { %6292 = vrot.lane.b32.xlu0 %v8889_v15, %s8385_s6 }
0x1c58   :  { %v9403_v13 = vpop.eup %8129 }
0x1c59   :  { %v5948_v11 = vsel %vm377_vm6, %v9403_v13, 0.0  ;;  %v9407_v49 = vpop.eup %8131 }
0x1c5a   :  { %v5951_v14 = vsel %vm377_vm6, %v9407_v49, 0.0 }
0x1c72   :  { %5949 = vadd.xlane.f32.xlu0 %v5948_v11 }
0x1c76   :  { %5952 = vadd.xlane.f32.xlu1 %v5951_v14 }
0x1cba   :  { %v5911_v15 = vpop.xlane.xlu0 %5910 }
0x1cbb   :  { %v5927_v40 = vsub.f32 %v5593_v30, %v5911_v15 }
0x1cbd   :  { %v5938_v41 = vmul.f32 1.442695, %v5927_v40 }
0x1cbe   :  { %v5917_v42 = vpop.xlane.xlu1 %5916  ;;  %v5908_v43 = vpop.xlane.xlu0 %5907 }
0x1cbf   :  { %8133 = vpow2.f32 %v5938_v41  ;;  %v5929_v44 = vsub.f32 %v5745_v23, %v5917_v42  ;;  %v5926_v45 = vsub.f32 %v5517_v19, %v5908_v43 }
0x1cc1   :  { %v5942_v46 = vmul.f32 1.442695, %v5929_v44  ;;  %v5936_v47 = vmul.f32 1.442695, %v5926_v45  ;;  %v6627_v44 = vld [vmem:[#allocation11 + $0x20] sm:$0xff]  ;;  %v6628_v45 = vld [vmem:[#allocation11 + $0x28] sm:$0xff] }
0x1cc2   :  { %v5923_v63 = vpop.xlane.xlu1 %5922  ;;  %v5914_v5 = vpop.xlane.xlu0 %5913 }
0x1cc3   :  { %8135 = vpow2.f32 %v5942_v46  ;;  %v5931_v51 = vsub.f32 %v5897_v29, %v5923_v63  ;;  %v5928_v52 = vsub.f32 %v5669_v26, %v5914_v5  ;;  %v7941_v46 = vpack.c.bf16 %v6628_v45, %v6627_v44  ;;  %v6630_v63 = vld [vmem:[#allocation11 + $0x38] sm:$0xff] }
0x1cc4   :  { %8137 = vpow2.f32 %v5936_v47  ;;  %v6629_v47 = vld [vmem:[#allocation11 + $0x30] sm:$0xff] }
0x1cc5   :  { %v5946_v54 = vmul.f32 1.442695, %v5931_v51  ;;  %v5940_v55 = vmul.f32 1.442695, %v5928_v52  ;;  %v7945_v5 = vpack.c.bf16 %v6630_v63, %v6629_v47 }
0x1cc6   :  { %v6065_v6 = vpop.permute.xlu1 %6064  ;;  %v5920_v56 = vpop.xlane.xlu0 %5919 }
0x1cc7   :  { %8139 = vpow2.f32 %v5946_v54  ;;  %v5930_v12 = vsub.f32 %v5821_v1, %v5920_v56  ;;  %7778 = vmatpush3.msra.mxu1 %v6065_v6 }
0x1cc8   :  { %8141 = vpow2.f32 %v5940_v55  ;;  %7787 = vmatprep.subr.mxu1 %v8376_v50 }
0x1cc9   :  { %v8134_v60 = vpop.eup %8133  ;;  %v5944_v57 = vmul.f32 1.442695, %v5930_v12 }
0x1cca   :  { %v5989_v58 = vpop.permute.xlu0 %5988  ;;  %v5957_v61 = vsel %vm377_vm6, %v8134_v60, 0.0  ;;  %v6141_v21 = vpop.permute.xlu1 %6140 }
0x1ccb   :  { %8143 = vpow2.f32 %v5944_v57  ;;  %5958 = vadd.xlane.f32.xlu1 %v5957_v61  ;;  %7773 = vmatpush3.msra.mxu0 %v5989_v58 }
0x1ccc   :  { %7782 = vmatprep.subr.mxu0 %v8376_v50 }
0x1ccd   :  { %v8136_v3 = vpop.eup %8135 }
0x1cce   :  { %v8138_v7 = vpop.eup %8137  ;;  %v5963_v8 = vsel %vm377_vm6, %v8136_v3, 0.0  ;;  %v6217_v23 = vpop.permute.xlu1 %6216 }
0x1ccf   :  { %5964 = vadd.xlane.f32.xlu1 %v5963_v8  ;;  %v5954_v9 = vsel %vm377_vm6, %v8138_v7, 0.0  ;;  %v6293_v24 = vpop.permute.xlu0 %6292 }
0x1cd0   :  { %5955 = vadd.xlane.f32.xlu0 %v5954_v9 }
0x1cd1   :  { %v8140_v30 = vpop.eup %8139 }
0x1cd2   :  { %v8142_v10 = vpop.eup %8141  ;;  %v5969_v16 = vsel %vm377_vm6, %v8140_v30, 0.0  ;;  %v6369_v62 = vpop.permute.xlu1 %6368 }
0x1cd3   :  { %5970 = vadd.xlane.f32.xlu1 %v5969_v16  ;;  %v5960_v18 = vsel %vm377_vm6, %v8142_v10, 0.0 }
0x1cd4   :  { %5961 = vadd.xlane.f32.xlu0 %v5960_v18 }
0x1cd5   :  { %v9418_v19 = vpop.eup %8143 }
0x1cd6   :  { %v5966_v20 = vsel %vm377_vm6, %v9418_v19, 0.0 }
0x1cd8   :  { %5967 = vadd.xlane.f32.xlu0 %v5966_v20 }
0x1ce4   :  { %6520 = vrot.lane.b32.xlu1 %v8914_v22, %s8385_s6 }
0x1cee   :  { %6444 = vrot.lane.b32.xlu0 %v8892_v17, %s8385_s6 }
0x1cff   :  { %v5950_v25 = vpop.xlane.xlu0 %5949 }
0x1d00   :  { %8145 = vrcp.f32 %v5950_v25 }
0x1d03   :  { %v5953_v26 = vpop.xlane.xlu1 %5952 }
0x1d04   :  { %8147 = vrcp.f32 %v5953_v26 }
0x1d0a   :  { %v8146_v2 = vpop.eup %8145 }
0x1d0b   :  { %v5980_v27 = vmul.f32 %v8146_v2, %v9403_v13 }
0x1d0d   :  { %7775 = vmatmul.mubr.msk.f32.vlgmr.msra.gmra.mrb[62].mxu0 %vm377_vm6, %v5980_v27 }
0x1d0e   :  { %v8148_v28 = vpop.eup %8147  ;;  %7783 = vmatpush3.msra.mxu0 %v6141_v21  ;;  %7784 = vmatprep.mubr.msk.f32.mxu0 %vm8377_vm5, %v8376_v50 }
0x1d0f   :  { %v5981_v17 = vmul.f32 %v8148_v28, %v9407_v49  ;;  %7792 = vmatprep.subr.mxu0 %v8376_v50 }
0x1d11   :  { %7780 = vmatmul.mubr.msk.f32.vlgmr.msra.gmra.mrb[70].mxu1 %vm377_vm6, %v5981_v17 }
0x1d12   :  { %7788 = vmatpush3.msra.mxu1 %v6217_v23  ;;  %7789 = vmatprep.mubr.msk.f32.mxu1 %vm8377_vm5, %v8376_v50 }
0x1d13   :  { %7797 = vmatprep.subr.mxu1 %v8376_v50 }
0x1d58   :  { %v5959_v22 = vpop.xlane.xlu1 %5958 }
0x1d59   :  { %8149 = vrcp.f32 %v5959_v22 }
0x1d5c   :  { %v5965_v29 = vpop.xlane.xlu1 %5964 }
0x1d5d   :  { %8151 = vrcp.f32 %v5965_v29  ;;  %v5956_v31 = vpop.xlane.xlu0 %5955 }
0x1d5e   :  { %8153 = vrcp.f32 %v5956_v31 }
0x1d60   :  { %v5971_v59 = vpop.xlane.xlu1 %5970 }
0x1d61   :  { %8155 = vrcp.f32 %v5971_v59  ;;  %v5962_v32 = vpop.xlane.xlu0 %5961 }
0x1d62   :  { %8157 = vrcp.f32 %v5962_v32 }
0x1d63   :  { %v8150_v1 = vpop.eup %8149 }
0x1d64   :  { %v5983_v33 = vmul.f32 %v8150_v1, %v8134_v60  ;;  %v6521_v38 = vpop.permute.xlu1 %6520 }
0x1d65   :  { %v5968_v34 = vpop.xlane.xlu0 %5967 }
0x1d66   :  { %8159 = vrcp.f32 %v5968_v34  ;;  %7790 = vmatmul.mubr.msk.f32.vlgmr.msra.gmra.mrb[72].mxu1 %vm377_vm6, %v5983_v33  ;;  %v6755_v33 = vld [vmem:[#allocation13 + $0x20] sm:$0xff]  ;;  %v6756_v34 = vld [vmem:[#allocation13 + $0x28] sm:$0xff] }
0x1d67   :  { %v8152_v35 = vpop.eup %8151  ;;  %7798 = vmatpush3.msra.mxu1 %v6369_v62  ;;  %7799 = vmatprep.mubr.msk.f32.mxu1 %vm8377_vm5, %v8376_v50 }
0x1d68   :  { %v8154_v0 = vpop.eup %8153  ;;  %v5985_v36 = vmul.f32 %v8152_v35, %v8136_v3  ;;  %7807 = vmatprep.subr.mxu1 %v8376_v50  ;;  %v6757_v35 = vld [vmem:[#allocation13 + $0x30] sm:$0xff] }
0x1d69   :  { %v5982_v37 = vmul.f32 %v8154_v0, %v8138_v7  ;;  %v6445_v49 = vpop.permute.xlu0 %6444  ;;  %v7949_v0 = vpack.c.bf16 %v6756_v34, %v6755_v33 }
0x1d6a   :  { %7800 = vmatmul.mubr.msk.f32.vlgmr.msra.gmra.mrb[74].mxu1 %vm377_vm6, %v5985_v36  ;;  %v6758_v36 = vld [vmem:[#allocation13 + $0x38] sm:$0xff] }
0x1d6b   :  { %v8156_v48 = vpop.eup %8155  ;;  %7785 = vmatmul.mubr.msk.f32.vlgmr.msra.gmra.mrb[64].mxu0 %vm377_vm6, %v5982_v37  ;;  %7808 = vmatpush3.msra.mxu1 %v6521_v38  ;;  %v7953_v37 = vpack.c.bf16 %v6758_v36, %v6757_v35  ;;  %v7148_v38 = vld [vmem:[%s9549_s11 + $0x40] sm:$0xff] }
0x1d6c   :  { %v8158_v39 = vpop.eup %8157  ;;  %v5987_v13 = vmul.f32 %v8156_v48, %v8140_v30  ;;  %7793 = vmatpush3.msra.mxu0 %v6293_v24  ;;  %7794 = vmatprep.mubr.msk.f32.mxu0 %vm8377_vm5, %v8376_v50  ;;  %v7149_v48 = vld [vmem:[%s9549_s11 + $0x48] sm:$0xff] }
0x1d6d   :  { %v5984_v11 = vmul.f32 %v8158_v39, %v8142_v10  ;;  %7802 = vmatprep.subr.mxu0 %v8376_v50  ;;  %7809 = vmatprep.mubr.msk.f32.mxu1 %vm8377_vm5, %v8376_v50  ;;  %v7150_v39 = vld [vmem:[%s9549_s11 + $0x50] sm:$0xff] }
0x1d6e   :  { %7810 = vmatmul.mubr.msk.f32.vlgmr.msra.gmra.mrb[76].mxu1 %vm377_vm6, %v5987_v13  ;;  %7950 = vmatprep.subr.bf16.mxu1 %v7949_v0  ;;  %v7957_v13 = vpack.c.bf16 %v7149_v48, %v7148_v38 }
0x1d6f   :  { %7795 = vmatmul.mubr.msk.f32.vlgmr.msra.gmra.mrb[66].mxu0 %vm377_vm6, %v5984_v11  ;;  %7952 = vmatpush3.bf16.msra.mxu1 %v7949_v0  ;;  %v7151_v11 = vld [vmem:[%s9549_s11 + $0x58] sm:$0xff] }
0x1d70   :  { %v8160_v14 = vpop.eup %8159  ;;  %7803 = vmatpush3.msra.mxu0 %v6445_v49  ;;  %7804 = vmatprep.mubr.msk.f32.mxu0 %vm8377_vm5, %v8376_v50  ;;  %v7961_v49 = vpack.c.bf16 %v7151_v11, %v7150_v39 }
0x1d71   :  { %v5986_v15 = vmul.f32 %v8160_v14, %v9418_v19  ;;  %7942 = vmatprep.subr.bf16.mxu0 %v7941_v46  ;;  %7954 = vmatprep.subr.bf16.mxu1 %v7953_v37  ;;  %v7152_v14 = vld [vmem:[%s9549_s11 + $0x60] sm:$0xff] }
0x1d73   :  { %7805 = vmatmul.mubr.msk.f32.vlgmr.msra.gmra.mrb[68].mxu0 %vm377_vm6, %v5986_v15  ;;  %7956 = vmatpush3.bf16.msra.mxu1 %v7953_v37  ;;  %v7153_v15 = vld [vmem:[%s9549_s11 + $0x68] sm:$0xff] }
0x1d74   :  { %7944 = vmatpush3.bf16.msra.mxu0 %v7941_v46 }
0x1d75   :  { %7946 = vmatprep.subr.bf16.mxu0 %v7945_v5 }
0x1d78   :  { %7948 = vmatpush3.bf16.msra.mxu0 %v7945_v5 }
0x1d79   :  { %7958 = vmatprep.subr.bf16.mxu0 %v7957_v13 }
0x1de0   :  { %v6060_v40 = vpop.f32.mrb[62].mxu0 }
0x1de1   :  { %v7776_v41 = vpop.f32.mrb[63].mxu0 }
0x1de4   :  { %v6136_v42 = vpop.f32.mrb[70].mxu1 }
0x1de5   :  { %v7781_v43 = vpop.f32.mrb[71].mxu1 }
0x1e39   :  { %v6288_v51 = vpop.f32.mrb[72].mxu1 }
0x1e3a   :  { %6600 = vrot.lane.b32.xlu1 %v6288_v51, %s8370_s21  ;;  %v7791_v50 = vpop.f32.mrb[73].mxu1 }
0x1e3d   :  { %v6440_v52 = vpop.f32.mrb[74].mxu1 }
0x1e3e   :  { %v6212_v54 = vpop.f32.mrb[64].mxu0  ;;  %6608 = vrot.lane.b32.xlu1 %v6440_v52, %s8383_s14  ;;  %v7801_v55 = vpop.f32.mrb[75].mxu1 }
0x1e3f   :  { %6598 = vrot.lane.b32.xlu0 %v6212_v54, %s8370_s21  ;;  %v7786_v6 = vpop.f32.mrb[65].mxu0 }
0x1e41   :  { %v6592_v56 = vpop.f32.mrb[76].mxu1 }
0x1e42   :  { %v6364_v12 = vpop.f32.mrb[66].mxu0  ;;  %6616 = vrot.lane.b32.xlu1 %v6592_v56, %s8384_s9  ;;  %v7811_v60 = vpop.f32.mrb[77].mxu1 }
0x1e43   :  { %6606 = vrot.lane.b32.xlu0 %v6364_v12, %s8383_s14  ;;  %v7796_v57 = vpop.f32.mrb[67].mxu0 }
0x1e46   :  { %v6516_v58 = vpop.f32.mrb[68].mxu0 }
0x1e47   :  { %6614 = vrot.lane.b32.xlu0 %v6516_v58, %s8384_s9  ;;  %v7806_v61 = vpop.f32.mrb[69].mxu0 }
0x1e48   :  { %v7154_v61 = vld [vmem:[%s9549_s11 + $0x70] sm:$0xff] }
0x1eac   :  { %v6601_v3 = vpop.permute.xlu1 %6600 }
0x1ead   :  { %v6621_v16 = vsel %vm377_vm6, %v6136_v42, %v6601_v3  ;;  %v7155_v3 = vld [vmem:[%s9549_s11 + $0x78] sm:$0xff] }
0x1eb0   :  { %v6609_v8 = vpop.permute.xlu1 %6608 }
0x1eb1   :  { %v6599_v7 = vpop.permute.xlu0 %6598  ;;  %v6623_v20 = vsel %vm1706_vm7, %v6621_v16, %v6609_v8  ;;  %v7145_v8 = vld [vmem:[%s9548_s10 + $0x1] ss:$0 sm:$0xff]  ;;  %s8386_s10 = smov [#allocation14]  }
0x1eb2   :  { %v6620_v30 = vsel %vm377_vm6, %v6060_v40, %v6599_v7  ;;  %v7965_v40 = vpack.c.bf16 %v7153_v15, %v7152_v14  ;;  %v7969_v7 = vpack.c.bf16 %v7155_v3, %v7154_v61  ;;  %s6997_s11 = sshll.u32 %s8386_s10, 4  ;;  %s6998_s11 = int_to_ptr.vmem [resolvable:$true] %s6997_s11 }
0x1eb3   :  { %p8340_p1 = scmp.lt.s32.totalorder %s6998_s11, %s6998_s11 }
0x1eb4   :  { %v6617_v10 = vpop.permute.xlu1 %6616 }
0x1eb5   :  { %v6607_v9 = vpop.permute.xlu0 %6606  ;;  %v6625_v23 = vsel %vm1709_vm8, %v6623_v20, %v6617_v10  ;;  %v7157_v20 = vld [vmem:[%s9550_s12 + $0x1] ss:$0 sm:$0xff]  ;;  %s8335_s12 = scalar_lea.vmem %s6998_s11, 256 }
0x1eb6   :  { %v6622_v18 = vsel %vm1706_vm7, %v6620_v30, %v6607_v9  ;;  %p8336_p0 = scmp.ne.s32.totalorder %s6998_s11, %s8335_s12  ;;  %p8341_p2 = scmp.lt.s32.totalorder %s8335_s12, %s8335_s12 }
0x1eb8   :  { %p8342_p3 = por %p8341_p2, %p8340_p1 }
0x1eb9   :  { %v6615_v19 = vpop.permute.xlu0 %6614 }
0x1eba   :  { %v6624_v21 = vsel %vm1709_vm8, %v6622_v18, %v6615_v19  ;;  %p8343_p4 = pnand %p8342_p3, %p8336_p0 }
0x1ebb   :  { %7820 = vmatprep.mubr.msk.f32.mxu0 %vm152_vm0, %v6624_v21 }
0x1ebc   :  { %7821 = vmatmul.mubr.msk.f32.vlgmr.msra.gmra.mrb[70].mxu0 %vm152_vm0, %v6625_v23 }
0x1ebd   :  { %7960 = vmatpush3.bf16.msra.mxu0 %v7957_v13 }
0x1ebe   :  { %7962 = vmatprep.subr.bf16.mxu0 %v7961_v49 }
0x1ec1   :  { %7964 = vmatpush3.bf16.msra.mxu0 %v7961_v49 }
0x1ec2   :  { %7966 = vmatprep.subr.bf16.mxu0 %v7965_v40 }
0x1ec5   :  { %7968 = vmatpush3.bf16.msra.mxu0 %v7965_v40 }
0x1ec6   :  { %7970 = vmatprep.subr.bf16.mxu0 %v7969_v7 }
0x1ec9   :  { %7972 = vmatpush3.bf16.msra.mxu0 %v7969_v7 }
0x1f8f   :  { %v7822_v24 = vpop.f32.mrb[70].mxu0 }
0x1f90   :  { %v9468_v62 = vadd.f32 %v7822_v24, %v9291_v53  ;;  %v6703_v25 = vpop.f32.mrb[71].mxu0 }
0x1f91   :  { %v9471_v26 = vadd.f32 %v6703_v25, %v9294_v4 }
0x1f92   :  { %v6717_v2 = vsel %vm152_vm0, %v9468_v62, 0.0 }
0x1f93   :  { %6718 = vadd.xlane.f32.xlu1 %v6717_v2  ;;  %v6714_v27 = vsel %vm152_vm0, %v9471_v26, 0.0 }
0x1f94   :  { %6715 = vadd.xlane.f32.xlu0 %v6714_v27 }
0x2020   :  { %v6719_v28 = vpop.xlane.xlu1 %6718 }
0x2021   :  { %v6721_v17 = vmul.f32 0.03125, %v6719_v28  ;;  %v6716_v22 = vpop.xlane.xlu0 %6715 }
0x2022   :  { %v6720_v29 = vmul.f32 0.03125, %v6716_v22 }
0x2023   :  { %v6723_v31 = vsub.f32 %v9468_v62, %v6721_v17 }
0x2024   :  { %v6722_v53 = vsub.f32 %v9471_v26, %v6720_v29 }
0x2025   :  { %v6725_v32 = vmul.f32 %v6723_v31, %v6723_v31 }
0x2026   :  { %v6724_v59 = vmul.f32 %v6722_v53, %v6722_v53 }
0x2027   :  { %v6729_v1 = vsel %vm152_vm0, %v6725_v32, 0.0 }
0x2028   :  { %v6726_v4 = vsel %vm152_vm0, %v6724_v59, 0.0 }
0x2029   :  { %6727 = vadd.xlane.f32.xlu0 %v6726_v4 }
0x202d   :  { %6730 = vadd.xlane.f32.xlu0 %v6729_v1 }
0x20b6   :  { %v6728_v41 = vpop.xlane.xlu0 %6727 }
0x20b7   :  { %v6732_v42 = vmul.f32 0.032258064, %v6728_v41 }
0x20b9   :  { %8161 = vrsqrt.f32 %v6732_v42  ;;  %vm6736_vm5 = vcmp.eq.f32.partialorder %v6732_v42, inf  ;;  %v6739_v47 = vand.u32 2147483648, %v6732_v42  ;;  %vm6738_vm6 = vcmp.eq.f32.partialorder %v6732_v42, 0.0 }
0x20ba   :  { %v6731_v43 = vpop.xlane.xlu0 %6730 }
0x20bb   :  { %v6733_v44 = vmul.f32 0.032258064, %v6731_v43 }
0x20bd   :  { %8163 = vrsqrt.f32 %v6733_v44  ;;  %vm6743_vm7 = vcmp.eq.f32.partialorder %v6733_v44, inf  ;;  %v6746_v54 = vand.u32 2147483648, %v6733_v44  ;;  %vm6745_vm8 = vcmp.eq.f32.partialorder %v6733_v44, 0.0 }
0x20c3   :  { %v8162_v45 = vpop.eup %8161 }
0x20c4   :  { %v6735_v46 = vmul.f32 %v8162_v45, %v6732_v42 }
0x20c6   :  { %v6737_v63 = vsel %vm6736_vm5, %v6732_v42, %v6735_v46 }
0x20c7   :  { %v8164_v5 = vpop.eup %8163  ;;  %v6740_v51 = vsel %vm6738_vm6, %v6739_v47, %v6737_v63 }
0x20c8   :  { %v6742_v50 = vmul.f32 %v8164_v5, %v6733_v44  ;;  %v6748_v52 = vadd.f32 1e-06, %v6740_v51 }
0x20ca   :  { %v6744_v55 = vsel %vm6743_vm7, %v6733_v44, %v6742_v50  ;;  %8165 = vrcp.f32 %v6748_v52 }
0x20cb   :  { %v6747_v6 = vsel %vm6745_vm8, %v6746_v54, %v6744_v55 }
0x20cc   :  { %v6749_v56 = vadd.f32 1e-06, %v6747_v6 }
0x20ce   :  { %8167 = vrcp.f32 %v6749_v56 }
0x20d4   :  { %v8166_v12 = vpop.eup %8165 }
0x20d5   :  { %v6751_v60 = vmul.f32 %v8166_v12, %v6722_v53 }
0x20d7   :  { %7831 = vmatprep.mubr.msk.f32.mxu1 %vm152_vm0, %v6751_v60 }
0x20d8   :  { %v8168_v57 = vpop.eup %8167 }
0x20d9   :  { %v6753_v58 = vmul.f32 %v8168_v57, %v6723_v31 }
0x20db   :  { %7832 = vmatmul.mubr.msk.f32.vlgmr.msra.gmra.mrb[78].mxu1 %vm152_vm0, %v6753_v58 }
0x21ae   :  { %v7833_v9 = vpop.f32.mrb[78].mxu1 }
0x21af   :  { %v6845_v30 = vadd.f32 %v7833_v9, %v7145_v8  ;;  %v6839_v10 = vpop.f32.mrb[79].mxu1 }
0x21b0   :  { %v6840_v16 = vadd.f32 %v7145_v8, %v6839_v10 }
0x21b1   :  { %v6849_v19 = vmax.f32 %v6845_v30, 0.0 }
0x21b2   :  { %v6848_v18 = vmax.f32 %v6840_v16, 0.0 }
0x21b4   :  { %7850 = vmatprep.mubr.msk.f32.mxu0 %vm3506_vm2, %v6848_v18 }
0x21b5   :  { %7851 = vmatmul.mubr.msk.f32.vlgmr.msra.gmra.mrb[72].mxu0 %vm3506_vm2, %v6849_v19 }
0x2288   :  { %v7852_v21 = vpop.f32.mrb[72].mxu0 }
0x2289   :  { %v6945_v23 = vadd.f32 %v7852_v21, %v7157_v20  ;;  %v6939_v24 = vpop.f32.mrb[73].mxu0 }
0x228a   :  { %v6940_v25 = vadd.f32 %v7157_v20, %v6939_v24 }
0x228b   :  { %v6949_v2 = vadd.f32 %v6945_v23, %v9468_v62 }
0x228c   :  { %v6948_v27 = vadd.f32 %v6940_v25, %v9471_v26 }
0x228d   :  { %v6953_v28 = vsel %vm152_vm0, %v6949_v2, 0.0 }
0x228e   :  { %6954 = vadd.xlane.f32.xlu1 %v6953_v28  ;;  %v6950_v17 = vsel %vm152_vm0, %v6948_v27, 0.0 }
0x228f   :  { %6951 = vadd.xlane.f32.xlu0 %v6950_v17 }
0x231b   :  { %v6955_v22 = vpop.xlane.xlu1 %6954 }
0x231c   :  { %v6957_v29 = vmul.f32 0.03125, %v6955_v22  ;;  %v6952_v31 = vpop.xlane.xlu0 %6951 }
0x231d   :  { %v6956_v53 = vmul.f32 0.03125, %v6952_v31 }
0x231e   :  { %v6959_v59 = vsub.f32 %v6949_v2, %v6957_v29 }
0x231f   :  { %v6958_v4 = vsub.f32 %v6948_v27, %v6956_v53 }
0x2320   :  { %v6961_v32 = vmul.f32 %v6959_v59, %v6959_v59 }
0x2321   :  { %v6960_v1 = vmul.f32 %v6958_v4, %v6958_v4 }
0x2322   :  { %v6965_v33 = vsel %vm152_vm0, %v6961_v32, 0.0 }
0x2323   :  { %6966 = vadd.xlane.f32.xlu1 %v6965_v33  ;;  %v6962_v62 = vsel %vm152_vm0, %v6960_v1, 0.0 }
0x2324   :  { %6963 = vadd.xlane.f32.xlu0 %v6962_v62 }
0x23b0   :  { %v6967_v26 = vpop.xlane.xlu1 %6966 }
0x23b1   :  { %v6969_v34 = vmul.f32 0.032258064, %v6967_v26  ;;  %v6964_v35 = vpop.xlane.xlu0 %6963 }
0x23b2   :  { %v6968_v0 = vmul.f32 0.032258064, %v6964_v35 }
0x23b3   :  { %8169 = vrsqrt.f32 %v6969_v34  ;;  %vm6979_vm15 = vcmp.eq.f32.partialorder %v6969_v34, inf  ;;  %v6982_v48 = vand.u32 2147483648, %v6969_v34  ;;  %vm6981_vm1 = vcmp.eq.f32.partialorder %v6969_v34, 0.0 }
0x23b4   :  { %8171 = vrsqrt.f32 %v6968_v0  ;;  %vm6972_vm2 = vcmp.eq.f32.partialorder %v6968_v0, inf  ;;  %v6975_v11 = vand.u32 2147483648, %v6968_v0  ;;  %vm6974_vm3 = vcmp.eq.f32.partialorder %v6968_v0, 0.0 }
0x23bd   :  { %v8170_v36 = vpop.eup %8169 }
0x23be   :  { %v8172_v37 = vpop.eup %8171  ;;  %v6978_v38 = vmul.f32 %v8170_v36, %v6969_v34 }
0x23bf   :  { %v6971_v39 = vmul.f32 %v8172_v37, %v6968_v0 }
0x23c0   :  { %v6980_v13 = vsel %vm6979_vm15, %v6969_v34, %v6978_v38 }
0x23c1   :  { %v6973_v49 = vsel %vm6972_vm2, %v6968_v0, %v6971_v39  ;;  %v6983_v14 = vsel %vm6981_vm1, %v6982_v48, %v6980_v13 }
0x23c2   :  { %v6976_v15 = vsel %vm6974_vm3, %v6975_v11, %v6973_v49  ;;  %v6985_v40 = vadd.f32 1e-06, %v6983_v14 }
0x23c3   :  { %v6984_v41 = vadd.f32 1e-06, %v6976_v15 }
0x23c4   :  { %8173 = vrcp.f32 %v6985_v40 }
0x23c5   :  { %8175 = vrcp.f32 %v6984_v41 }
0x23ce   :  { %v8174_v42 = vpop.eup %8173 }
0x23cf   :  { %v8176_v43 = vpop.eup %8175  ;;  %v6989_v44 = vmul.f32 %v8174_v42, %v6959_v59 }
0x23d0   :  { %v6987_v45 = vmul.f32 %v8176_v43, %v6958_v4 }
0x23d1   :  { %6991 = vst.msk [vmem:[#allocation14 + $0x8] sm:$0xff] %vm152_vm0, %v6989_v44 }
0x23d2   :  { %6990 = vst.msk [vmem:[#allocation14] sm:$0xff] %vm152_vm0, %v6987_v45 }
0x23d3   :  { %8346 = shalt.err (!%p8343_p4)
}
0x23d4   :  { %s8347_s8 = scalar_lea.hbm %s9551_s13, 256 }
0x23d5   :  { %p8348_p5 = scmp.ne.s32.totalorder %s9551_s13, %s8347_s8  ;;  %p8351_p6 = scmp.lt.u32.totalorder %s8347_s8, %s9551_s13 }
0x23d7   :  { %p8353_p7 = pnand %p8351_p6, %p8348_p5 }
0x23d9   :  { %8356 = shalt.err (!%p8353_p7)
}
0x23da   :  { %7003 = dma.vmem_to_hbm [thread:$0]  %s6998_s11, 256, %s9551_s13, [#allocation4], %s8369_s20, %s8369_s20, %s8370_s21  }
0x23db   :  { %8365 = dma.done.wait [#allocation4], 256  }
0x23dc   :  { %8366 = vsyncadd [#allocation4], 4294967040 }
0x23dd   :  { %7007 = vsyncpa [#allocation3], 1 }
0x23de   :  { %7008 = vsyncpa [#allocation6], 1 }
0x23df   :  { %7009 = vsyncpa [#allocation9], 1 }
0x23e0   :  { %7010 = vsyncpa [#allocation12], 1 }
0x23e1   :  { %7011 = vsyncpa [#allocation4], 1 }

</bundles_post_ra>
